<compile_context>
chip_gen: v5e
topology: v5e:2x2
jax: 0.10.0
libtpu: 0.0.40
codegen_flags: <defaults>
</compile_context>

<pallas_src>
import functools

import numpy as np
import jax
import jax.numpy as jnp
from jax import lax
from jax.experimental import pallas as pl
from jax.experimental.pallas import tpu as pltpu


# ---------------------------------------------------------------------------
# Math shared by the Pallas kernel body and the pure-JAX reference.
# ---------------------------------------------------------------------------
def _bf16(x):
    return x.astype(jnp.bfloat16)


def _layer_norm(x, gamma, beta, eps=1e-5):
    mean = jnp.mean(x, axis=-1, keepdims=True)
    var = jnp.mean(jnp.square(x - mean), axis=-1, keepdims=True)
    return (x - mean) * lax.rsqrt(var + eps) * gamma + beta


def _encoder_layer_math(x, wqkv, bqkv, wo, bo, g1, beta1,
                        w1, b1, w2, b2, g2, beta2, *,
                        num_heads, group_size, in_kernel):
    """One EncoderLayer on l-major flattened rows.

    x: (rows, D) float32, rows = G * group_size.  Consecutive blocks of
    `group_size` (= batch N) rows share the same sequence position l -- the
    axis PyTorch's batch_first=False MHA batches over -- so attention is
    exactly block-diagonal and is computed per group with no mask.
    """
    rows, D = x.shape
    G = rows // group_size
    dh = D // num_heads
    sm_scale = 1.0 / float(np.sqrt(dh))

    # Fused QKV projection: one lane-dense (rows, 3D) block, bf16 operands,
    # f32 accumulation.
    qkv = jnp.dot(_bf16(x), _bf16(wqkv),
                  preferred_element_type=jnp.float32) + bqkv        # (rows, 3D)

    wo_b = _bf16(wo)
    proj = jnp.zeros((rows, D), jnp.float32)
    # num_heads is tiny; with the block-diagonal restructure every per-head
    # temporary is (G, N, N) / (G, N, D) -- a handful of vregs -- so the
    # unrolled loop cannot build up register pressure like the old (R,R) loop.
    for h in range(num_heads):
        sl = slice(h * dh, (h + 1) * dh)
        qh = _bf16(qkv[:, sl] * sm_scale).reshape(G, group_size, dh)
        kh = _bf16(qkv[:, D + h * dh:D + (h + 1) * dh]
                   ).reshape(G, group_size, dh)
        # Re-associated epilogue: fold the output projection into V *before*
        # attention -> no lane-sparse (rows, dh) o_h intermediate and no
        # final concatenate over heads.
        vwo = jnp.dot(_bf16(qkv[:, 2 * D + h * dh:2 * D + (h + 1) * dh]),
                      wo_b[sl, :],
                      preferred_element_type=jnp.float32)           # (rows, D)
        vwo = _bf16(vwo).reshape(G, group_size, D)

        # Block-diagonal scores: (G, N, N).  No mask needed; ~R/N times less
        # exp / max / sum work than a full masked (R, R) softmax.
        s = jnp.einsum('gnd,gmd->gnm', qh, kh,
                       preferred_element_type=jnp.float32)
        s = s - jnp.max(s, axis=-1, keepdims=True)
        p = jnp.exp(s)
        denom = jnp.sum(p, axis=-1, keepdims=True)
        if in_kernel:
            inv = pl.reciprocal(denom, approx=True)   # EUP slot, frees VALU
        else:
            inv = 1.0 / denom
        contrib = jnp.einsum('gnm,gmk->gnk', _bf16(p), vwo,
                             preferred_element_type=jnp.float32) * inv
        proj = proj + contrib.reshape(rows, D)
    attn = proj + bo

    # residual + LayerNorm (GlobalSelfAttention); dropout == identity in eval.
    y = _layer_norm(x + attn, g1, beta1)

    # FeedForward: Linear -> ReLU -> Linear (+ Dropout == identity in eval).
    hidden = jnp.maximum(
        jnp.dot(_bf16(y), _bf16(w1), preferred_element_type=jnp.float32) + b1,
        0.0)
    ffn = jnp.dot(_bf16(hidden), _bf16(w2),
                  preferred_element_type=jnp.float32) + b2

    # residual + LayerNorm (FeedForward).
    return _layer_norm(y + ffn, g2, beta2)


# ---------------------------------------------------------------------------
# Pallas kernel: grid = (pos-tile [parallel], layer [arbitrary]).
# ---------------------------------------------------------------------------
def _encoder_kernel(x0_ref, wqkv_ref, bqkv_ref, wo_ref, bo_ref,
                    g1_ref, beta1_ref, w1_ref, b1_ref, w2_ref, b2_ref,
                    g2_ref, beta2_ref, out_ref, *, num_heads, group_size):
    # out_ref's block index depends only on the position tile, so within a
    # tile the activation stays resident in VMEM across all layers and is
    # written to HBM exactly once.
    @pl.when(pl.program_id(1) == 0)
    def _():
        # Layer 0: seed the resident activation with the already scaled +
        # position-encoded input tile (x0 aliases the output HBM buffer).
        out_ref[...] = x0_ref[...]

    y = _encoder_layer_math(
        out_ref[...],
        wqkv_ref[...], bqkv_ref[...], wo_ref[...], bo_ref[...],
        g1_ref[...], beta1_ref[...], w1_ref[...], b1_ref[...],
        w2_ref[...], b2_ref[...], g2_ref[...], beta2_ref[...],
        num_heads=num_heads, group_size=group_size, in_kernel=True)
    out_ref[...] = y


def _stacked_spec(per_layer_shape):
    """BlockSpec for a weight stacked with a leading `layer` dim."""
    ndim = len(per_layer_shape)

    def index_map(t, l):
        return (l,) + (0,) * ndim

    return pl.BlockSpec((None,) + tuple(per_layer_shape), index_map)


def pallas_encoder(x0, stacked, *, num_heads, batch, num_pos_tiles):
    R, D = x0.shape                      # rows are l-major, n-minor
    num_layers = stacked[0].shape[0]
    dff = stacked[6].shape[-1]           # w1 is (layers, D, dff)
    N = batch
    L = R // N
    dh = D // num_heads
    tile_rows = R // num_pos_tiles       # whole same-l groups per tile

    act_spec = pl.BlockSpec((tile_rows, D), lambda t, l: (t, 0))
    in_specs = [act_spec] + [_stacked_spec(w.shape[1:]) for w in stacked]

    flops_layer = (2 * R * D * 3 * D                       # fused QKV
                   + num_heads * (2 * R * dh * D           # v @ wo fold
                                  + 2 * L * N * N * dh     # scores
                                  + 2 * L * N * N * D)     # p @ (v wo)
                   + 2 * R * D * dff + 2 * R * dff * D)    # FFN
    weight_bytes = sum(int(np.prod(w.shape)) * w.dtype.itemsize
                       for w in stacked)
    cost = pl.CostEstimate(
        flops=int(num_layers * flops_layer),
        transcendentals=int(num_layers * num_heads * L * N * N),
        bytes_accessed=int(2 * R * D * 4 + num_pos_tiles * weight_bytes))

    return pl.pallas_call(
        functools.partial(_encoder_kernel, num_heads=num_heads, group_size=N),
        out_shape=jax.ShapeDtypeStruct((R, D), jnp.float32),
        grid_spec=pltpu.PrefetchScalarGridSpec(
            num_scalar_prefetch=0,
            grid=(num_pos_tiles, num_layers),
            in_specs=in_specs,
            out_specs=act_spec,
        ),
        # x0 is only read at layer 0 of each tile; alias it with the output so
        # no extra HBM buffer / resident emb+pos blocks are needed.
        input_output_aliases={0: 0},
        compiler_params=pltpu.CompilerParams(
            # pos-tile axis feeds both TensorCores on v7x; layer l+1 depends
            # on layer l, so that axis stays "arbitrary".
            dimension_semantics=("parallel", "arbitrary")),
        cost_estimate=cost,
    )(x0, *stacked)


# ---------------------------------------------------------------------------
# Forward wrappers (Pallas and pure-JAX reference)
# ---------------------------------------------------------------------------
@functools.partial(jax.jit, static_argnums=(4,))
def encoder_forward(tokens, embedding, pos_encoding, stacked, num_heads):
    N, L = tokens.shape
    D = embedding.shape[1]
    emb = jnp.take(embedding, tokens, axis=0)            # (N, L, D) gather glue
    x0 = emb * float(np.sqrt(D)) + pos_encoding[:L][None, :, :]
    # l-major row ordering: consecutive blocks of N rows share the same
    # sequence position l, so in-kernel attention is block-diagonal, mask-free.
    x0_lm = jnp.transpose(x0, (1, 0, 2)).reshape(L * N, D)
    num_pos_tiles = 2 if (L % 2 == 0 and L >= 2) else 1
    out = pallas_encoder(x0_lm, stacked, num_heads=num_heads, batch=N,
                         num_pos_tiles=num_pos_tiles)
    return jnp.transpose(out.reshape(L, N, D), (1, 0, 2))  # back to (N, L, D)


def encoder_forward_ref(tokens, embedding, pos_encoding, stacked, num_heads):
    """Pure-JAX reference using identical math (no Pallas)."""
    N, L = tokens.shape
    D = embedding.shape[1]
    emb = jnp.take(embedding, tokens, axis=0)
    x = emb * float(np.sqrt(D)) + pos_encoding[:L][None, :, :]
    xf = jnp.transpose(x, (1, 0, 2)).reshape(L * N, D)
    for i in range(stacked[0].shape[0]):
        lp = tuple(w[i] for w in stacked)
        xf = _encoder_layer_math(xf, *lp, num_heads=num_heads, group_size=N,
                                 in_kernel=False)
    return jnp.transpose(xf.reshape(L, N, D), (1, 0, 2))


# ---------------------------------------------------------------------------
# Parameters (deterministic synthetic init)
# ---------------------------------------------------------------------------
def positional_encoding(length, depth):
    half = depth / 2
    positions = np.arange(length)[:, np.newaxis]
    depths = np.arange(half)[np.newaxis, :] / half
    angle_rates = 1.0 / (10000.0 ** depths)
    angle_rads = positions * angle_rates
    pe = np.concatenate([np.sin(angle_rads), np.cos(angle_rads)], axis=-1)
    return jnp.asarray(pe, dtype=jnp.float32)


def init_params(key, num_layers, d_model, dff, vocab_size):
    keys = jax.random.split(key, 1 + num_layers)
    embedding = jax.random.normal(keys[0], (vocab_size, d_model), jnp.float32)

    def uinit(k, shape, fan_in):
        bound = 1.0 / np.sqrt(fan_in)
        return jax.random.uniform(k, shape, jnp.float32, -bound, bound)

    per_layer = []
    for i in range(num_layers):
        ks = jax.random.split(keys[1 + i], 12)
        wq = uinit(ks[0], (d_model, d_model), d_model)
        wk = uinit(ks[1], (d_model, d_model), d_model)
        wv = uinit(ks[2], (d_model, d_model), d_model)
        bq = uinit(ks[3], (1, d_model), d_model)
        bk = uinit(ks[4], (1, d_model), d_model)
        bv = uinit(ks[5], (1, d_model), d_model)
        per_layer.append((
            jnp.concatenate([wq, wk, wv], axis=1),        # wqkv (D, 3D) fused
            jnp.concatenate([bq, bk, bv], axis=1),        # bqkv (1, 3D)
            uinit(ks[6], (d_model, d_model), d_model),    # wo
            uinit(ks[7], (1, d_model), d_model),          # bo
            jnp.ones((1, d_model), jnp.float32),          # LN1 gamma
            jnp.zeros((1, d_model), jnp.float32),         # LN1 beta
            uinit(ks[8], (d_model, dff), d_model),        # FFN w1
            uinit(ks[9], (1, dff), d_model),              # FFN b1
            uinit(ks[10], (dff, d_model), dff),           # FFN w2
            uinit(ks[11], (1, d_model), dff),             # FFN b2
            jnp.ones((1, d_model), jnp.float32),          # LN2 gamma
            jnp.zeros((1, d_model), jnp.float32),         # LN2 beta
        ))
    # Stack every weight with a leading layer axis so a single pallas_call can
    # stream them with a grid over layers.
    stacked = [jnp.stack([lp[j] for lp in per_layer], axis=0)
               for j in range(len(per_layer[0]))]
    # Matmul weights live in bf16 (halves weight DMA; matmuls run with bf16
    # operands + f32 accumulation).  Biases / LN params stay f32.
    for j in (0, 2, 6, 8):                                # wqkv, wo, w1, w2
        stacked[j] = stacked[j].astype(jnp.bfloat16)
    stacked = tuple(stacked)

    pos_enc = positional_encoding(2048, d_model)
    return embedding, pos_enc, stacked


if __name__ == "__main__":
    num_layers, d_model, num_heads, dff, vocab_size = 2, 32, 4, 64, 50
    N, L = 8, 16  # batch, sequence length

    key = jax.random.PRNGKey(0)
    k_tok, k_param = jax.random.split(key)
    tokens = jax.random.randint(k_tok, (N, L), 0, vocab_size, dtype=jnp.int32)
    embedding, pos_encoding, stacked = init_params(
        k_param, num_layers, d_model, dff, vocab_size)

    out = encoder_forward(tokens, embedding, pos_encoding, stacked, num_heads)
    out = jax.block_until_ready(out)

    ref = encoder_forward_ref(tokens, embedding, pos_encoding, stacked,
                              num_heads)
    ref = jax.block_until_ready(ref)

    assert out.shape == (N, L, d_model) and out.dtype == jnp.float32
    # Kernel and reference share the same bf16-operand math; residual
    # differences come only from the approximate EUP reciprocal in the
    # kernel's softmax and MXU-vs-XLA accumulation order (~1e-3 level).
    np.testing.assert_allclose(np.asarray(out), np.asarray(ref),
                               rtol=2e-2, atol=2e-2)
    print("KERNEL_OK")
</pallas_src>

<mosaic_0001>
module attributes {stable_mosaic.version = 11 : i64} {
  func.func @_encoder_kernel(%arg0: i32, %arg1: i32, %arg2: memref<64x32xf32, #tpu.memory_space<vmem>>, %arg3: memref<1x32x96xbf16, #tpu.memory_space<vmem>>, %arg4: memref<1x1x96xf32, #tpu.memory_space<vmem>>, %arg5: memref<1x32x32xbf16, #tpu.memory_space<vmem>>, %arg6: memref<1x1x32xf32, #tpu.memory_space<vmem>>, %arg7: memref<1x1x32xf32, #tpu.memory_space<vmem>>, %arg8: memref<1x1x32xf32, #tpu.memory_space<vmem>>, %arg9: memref<1x32x64xbf16, #tpu.memory_space<vmem>>, %arg10: memref<1x1x64xf32, #tpu.memory_space<vmem>>, %arg11: memref<1x64x32xbf16, #tpu.memory_space<vmem>>, %arg12: memref<1x1x32xf32, #tpu.memory_space<vmem>>, %arg13: memref<1x1x32xf32, #tpu.memory_space<vmem>>, %arg14: memref<1x1x32xf32, #tpu.memory_space<vmem>>, %arg15: memref<64x32xf32, #tpu.memory_space<vmem>>) attributes {dimension_semantics = [#tpu.dimension_semantics<parallel>, #tpu.dimension_semantics<arbitrary>], iteration_bounds = array<i64: 2, 2>, scalar_prefetch = 0 : i64, scratch_operands = 0 : i64, tpu.core_type = #tpu.core_type<tc>, window_params = [{transform_indices = @transform_0, window_bounds = array<i64: 64, 32>}, {transform_indices = @transform_1, window_bounds = array<i64: 1, 32, 96>}, {transform_indices = @transform_2, window_bounds = array<i64: 1, 1, 96>}, {transform_indices = @transform_3, window_bounds = array<i64: 1, 32, 32>}, {transform_indices = @transform_4, window_bounds = array<i64: 1, 1, 32>}, {transform_indices = @transform_5, window_bounds = array<i64: 1, 1, 32>}, {transform_indices = @transform_6, window_bounds = array<i64: 1, 1, 32>}, {transform_indices = @transform_7, window_bounds = array<i64: 1, 32, 64>}, {transform_indices = @transform_8, window_bounds = array<i64: 1, 1, 64>}, {transform_indices = @transform_9, window_bounds = array<i64: 1, 64, 32>}, {transform_indices = @transform_10, window_bounds = array<i64: 1, 1, 32>}, {transform_indices = @transform_11, window_bounds = array<i64: 1, 1, 32>}, {transform_indices = @transform_12, window_bounds = array<i64: 1, 1, 32>}, {transform_indices = @transform_13, window_bounds = array<i64: 64, 32>}]} {
    %c0_i32 = arith.constant 0 : i32
    %0 = arith.cmpi eq, %arg1, %c0_i32 : i32
    %1 = arith.extui %0 : i1 to i32
    %c0_i32_0 = arith.constant 0 : i32
    %2 = arith.cmpi ne, %1, %c0_i32_0 : i32
    scf.if %2 {
      %c0_78 = arith.constant 0 : index
      %c0_79 = arith.constant 0 : index
      %208 = vector.load %arg2[%c0_78, %c0_79] : memref<64x32xf32, #tpu.memory_space<vmem>>, vector<64x32xf32>
      %c0_80 = arith.constant 0 : index
      %c0_81 = arith.constant 0 : index
      %209 = vector.load %arg15[%c0_80, %c0_81] : memref<64x32xf32, #tpu.memory_space<vmem>>, vector<64x32xf32>
      tpu.vector_store %arg15[%c0_80, %c0_81], %208 {strides = array<i32>} : memref<64x32xf32, #tpu.memory_space<vmem>>, vector<64x32xf32>,
    } else {
    }
    %c0 = arith.constant 0 : index
    %c0_1 = arith.constant 0 : index
    %3 = vector.load %arg15[%c0, %c0_1] : memref<64x32xf32, #tpu.memory_space<vmem>>, vector<64x32xf32>
    %c0_2 = arith.constant 0 : index
    %c0_3 = arith.constant 0 : index
    %c0_4 = arith.constant 0 : index
    %4 = vector.load %arg3[%c0_2, %c0_3, %c0_4] : memref<1x32x96xbf16, #tpu.memory_space<vmem>>, vector<1x32x96xbf16>
    %5 = vector.shape_cast %4 : vector<1x32x96xbf16> to vector<32x96xbf16>
    %c0_5 = arith.constant 0 : index
    %c0_6 = arith.constant 0 : index
    %c0_7 = arith.constant 0 : index
    %6 = vector.load %arg4[%c0_5, %c0_6, %c0_7] : memref<1x1x96xf32, #tpu.memory_space<vmem>>, vector<1x1x96xf32>
    %7 = vector.shape_cast %6 : vector<1x1x96xf32> to vector<1x96xf32>
    %c0_8 = arith.constant 0 : index
    %c0_9 = arith.constant 0 : index
    %c0_10 = arith.constant 0 : index
    %8 = vector.load %arg5[%c0_8, %c0_9, %c0_10] : memref<1x32x32xbf16, #tpu.memory_space<vmem>>, vector<1x32x32xbf16>
    %9 = vector.shape_cast %8 : vector<1x32x32xbf16> to vector<32x32xbf16>
    %c0_11 = arith.constant 0 : index
    %c0_12 = arith.constant 0 : index
    %c0_13 = arith.constant 0 : index
    %10 = vector.load %arg6[%c0_11, %c0_12, %c0_13] : memref<1x1x32xf32, #tpu.memory_space<vmem>>, vector<1x1x32xf32>
    %11 = vector.shape_cast %10 : vector<1x1x32xf32> to vector<1x32xf32>
    %c0_14 = arith.constant 0 : index
    %c0_15 = arith.constant 0 : index
    %c0_16 = arith.constant 0 : index
    %12 = vector.load %arg7[%c0_14, %c0_15, %c0_16] : memref<1x1x32xf32, #tpu.memory_space<vmem>>, vector<1x1x32xf32>
    %13 = vector.shape_cast %12 : vector<1x1x32xf32> to vector<1x32xf32>
    %c0_17 = arith.constant 0 : index
    %c0_18 = arith.constant 0 : index
    %c0_19 = arith.constant 0 : index
    %14 = vector.load %arg8[%c0_17, %c0_18, %c0_19] : memref<1x1x32xf32, #tpu.memory_space<vmem>>, vector<1x1x32xf32>
    %15 = vector.shape_cast %14 : vector<1x1x32xf32> to vector<1x32xf32>
    %c0_20 = arith.constant 0 : index
    %c0_21 = arith.constant 0 : index
    %c0_22 = arith.constant 0 : index
    %16 = vector.load %arg9[%c0_20, %c0_21, %c0_22] : memref<1x32x64xbf16, #tpu.memory_space<vmem>>, vector<1x32x64xbf16>
    %17 = vector.shape_cast %16 : vector<1x32x64xbf16> to vector<32x64xbf16>
    %c0_23 = arith.constant 0 : index
    %c0_24 = arith.constant 0 : index
    %c0_25 = arith.constant 0 : index
    %18 = vector.load %arg10[%c0_23, %c0_24, %c0_25] : memref<1x1x64xf32, #tpu.memory_space<vmem>>, vector<1x1x64xf32>
    %19 = vector.shape_cast %18 : vector<1x1x64xf32> to vector<1x64xf32>
    %c0_26 = arith.constant 0 : index
    %c0_27 = arith.constant 0 : index
    %c0_28 = arith.constant 0 : index
    %20 = vector.load %arg11[%c0_26, %c0_27, %c0_28] : memref<1x64x32xbf16, #tpu.memory_space<vmem>>, vector<1x64x32xbf16>
    %21 = vector.shape_cast %20 : vector<1x64x32xbf16> to vector<64x32xbf16>
    %c0_29 = arith.constant 0 : index
    %c0_30 = arith.constant 0 : index
    %c0_31 = arith.constant 0 : index
    %22 = vector.load %arg12[%c0_29, %c0_30, %c0_31] : memref<1x1x32xf32, #tpu.memory_space<vmem>>, vector<1x1x32xf32>
    %23 = vector.shape_cast %22 : vector<1x1x32xf32> to vector<1x32xf32>
    %c0_32 = arith.constant 0 : index
    %c0_33 = arith.constant 0 : index
    %c0_34 = arith.constant 0 : index
    %24 = vector.load %arg13[%c0_32, %c0_33, %c0_34] : memref<1x1x32xf32, #tpu.memory_space<vmem>>, vector<1x1x32xf32>
    %25 = vector.shape_cast %24 : vector<1x1x32xf32> to vector<1x32xf32>
    %c0_35 = arith.constant 0 : index
    %c0_36 = arith.constant 0 : index
    %c0_37 = arith.constant 0 : index
    %26 = vector.load %arg14[%c0_35, %c0_36, %c0_37] : memref<1x1x32xf32, #tpu.memory_space<vmem>>, vector<1x1x32xf32>
    %27 = vector.shape_cast %26 : vector<1x1x32xf32> to vector<1x32xf32>
    %28 = arith.truncf %3 : vector<64x32xf32> to vector<64x32xbf16>
    %cst = arith.constant dense<0.000000e+00> : vector<64x96xf32>
    %29 = tpu.matmul %28, %5, %cst {dimension_numbers = #tpu.dot_dimension_numbers<[1], [0], [0], [1], [0, 0, 1, 1], [], []>} : vector<64x32xbf16>, vector<32x96xbf16>, vector<64x96xf32> -> vector<64x96xf32>
    %30 = vector.broadcast %7 : vector<1x96xf32> to vector<64x96xf32>
    %31 = arith.addf %29, %30 : vector<64x96xf32>
    %cst_38 = arith.constant 0.000000e+00 : f32
    %32 = vector.broadcast %cst_38 : f32 to vector<64x32xf32>
    %33 = vector.extract_strided_slice %31 {offsets = [0, 0], sizes = [64, 8], strides = [1, 1]} : vector<64x96xf32> to vector<64x8xf32>
    %cst_39 = arith.constant 0.353553385 : f32
    %34 = vector.broadcast %cst_39 : f32 to vector<64x8xf32>
    %35 = arith.mulf %33, %34 : vector<64x8xf32>
    %36 = arith.truncf %35 : vector<64x8xf32> to vector<64x8xbf16>
    %37 = vector.shape_cast %36 : vector<64x8xbf16> to vector<8x8x8xbf16>
    %38 = vector.extract_strided_slice %31 {offsets = [0, 32], sizes = [64, 8], strides = [1, 1]} : vector<64x96xf32> to vector<64x8xf32>
    %39 = arith.truncf %38 : vector<64x8xf32> to vector<64x8xbf16>
    %40 = vector.shape_cast %39 : vector<64x8xbf16> to vector<8x8x8xbf16>
    %41 = vector.extract_strided_slice %31 {offsets = [0, 64], sizes = [64, 8], strides = [1, 1]} : vector<64x96xf32> to vector<64x8xf32>
    %42 = arith.truncf %41 : vector<64x8xf32> to vector<64x8xbf16>
    %43 = vector.extract_strided_slice %9 {offsets = [0, 0], sizes = [8, 32], strides = [1, 1]} : vector<32x32xbf16> to vector<8x32xbf16>
    %cst_40 = arith.constant dense<0.000000e+00> : vector<64x32xf32>
    %44 = tpu.matmul %42, %43, %cst_40 {dimension_numbers = #tpu.dot_dimension_numbers<[1], [0], [0], [1], [0, 0, 1, 1], [], []>} : vector<64x8xbf16>, vector<8x32xbf16>, vector<64x32xf32> -> vector<64x32xf32>
    %45 = arith.truncf %44 : vector<64x32xf32> to vector<64x32xbf16>
    %46 = vector.shape_cast %45 : vector<64x32xbf16> to vector<8x8x32xbf16>
    "tpu.trace_start"() <{level = 10 : i32, message = "gnd,gmd->gnm"}> : () -> ()
    %cst_41 = arith.constant dense<0.000000e+00> : vector<8x8x8xf32>
    %47 = tpu.matmul %37, %40, %cst_41 {dimension_numbers = #tpu.dot_dimension_numbers<[2], [2], [1], [1], [0, 0, 0, 1, 1, 1], [0], [0]>} : vector<8x8x8xbf16>, vector<8x8x8xbf16>, vector<8x8x8xf32> -> vector<8x8x8xf32>
    "tpu.trace_stop"() : () -> ()
    %cst_42 = arith.constant dense<0xFF800000> : vector<8x8xf32>
    %48 = vector.multi_reduction <maximumf>, %47, %cst_42 [2] : vector<8x8x8xf32> to vector<8x8xf32>
    %49 = vector.shape_cast %48 : vector<8x8xf32> to vector<8x8x1xf32>
    %50 = vector.broadcast %49 : vector<8x8x1xf32> to vector<8x8x8xf32>
    %51 = arith.subf %47, %50 : vector<8x8x8xf32>
    %52 = math.exp %51 : vector<8x8x8xf32>
    %cst_43 = arith.constant dense<0.000000e+00> : vector<8x8xf32>
    %53 = vector.multi_reduction <add>, %52, %cst_43 [2] : vector<8x8x8xf32> to vector<8x8xf32>
    %54 = vector.shape_cast %53 : vector<8x8xf32> to vector<8x8x1xf32>
    %55 = tpu.reciprocal %54 {approx = true} : vector<8x8x1xf32> -> vector<8x8x1xf32>
    %56 = arith.truncf %52 : vector<8x8x8xf32> to vector<8x8x8xbf16>
    "tpu.trace_start"() <{level = 10 : i32, message = "gnm,gmk->gnk"}> : () -> ()
    %cst_44 = arith.constant dense<0.000000e+00> : vector<8x8x32xf32>
    %57 = tpu.matmul %56, %46, %cst_44 {dimension_numbers = #tpu.dot_dimension_numbers<[2], [1], [1], [2], [0, 0, 0, 1, 1, 2], [0], [0]>} : vector<8x8x8xbf16>, vector<8x8x32xbf16>, vector<8x8x32xf32> -> vector<8x8x32xf32>
    "tpu.trace_stop"() : () -> ()
    %58 = vector.broadcast %55 : vector<8x8x1xf32> to vector<8x8x32xf32>
    %59 = arith.mulf %57, %58 : vector<8x8x32xf32>
    %60 = vector.shape_cast %59 : vector<8x8x32xf32> to vector<64x32xf32>
    %61 = arith.addf %32, %60 : vector<64x32xf32>
    %62 = vector.extract_strided_slice %31 {offsets = [0, 8], sizes = [64, 8], strides = [1, 1]} : vector<64x96xf32> to vector<64x8xf32>
    %cst_45 = arith.constant 0.353553385 : f32
    %63 = vector.broadcast %cst_45 : f32 to vector<64x8xf32>
    %64 = arith.mulf %62, %63 : vector<64x8xf32>
    %65 = arith.truncf %64 : vector<64x8xf32> to vector<64x8xbf16>
    %66 = vector.shape_cast %65 : vector<64x8xbf16> to vector<8x8x8xbf16>
    %67 = vector.extract_strided_slice %31 {offsets = [0, 40], sizes = [64, 8], strides = [1, 1]} : vector<64x96xf32> to vector<64x8xf32>
    %68 = arith.truncf %67 : vector<64x8xf32> to vector<64x8xbf16>
    %69 = vector.shape_cast %68 : vector<64x8xbf16> to vector<8x8x8xbf16>
    %70 = vector.extract_strided_slice %31 {offsets = [0, 72], sizes = [64, 8], strides = [1, 1]} : vector<64x96xf32> to vector<64x8xf32>
    %71 = arith.truncf %70 : vector<64x8xf32> to vector<64x8xbf16>
    %72 = vector.extract_strided_slice %9 {offsets = [8, 0], sizes = [8, 32], strides = [1, 1]} : vector<32x32xbf16> to vector<8x32xbf16>
    %cst_46 = arith.constant dense<0.000000e+00> : vector<64x32xf32>
    %73 = tpu.matmul %71, %72, %cst_46 {dimension_numbers = #tpu.dot_dimension_numbers<[1], [0], [0], [1], [0, 0, 1, 1], [], []>} : vector<64x8xbf16>, vector<8x32xbf16>, vector<64x32xf32> -> vector<64x32xf32>
    %74 = arith.truncf %73 : vector<64x32xf32> to vector<64x32xbf16>
    %75 = vector.shape_cast %74 : vector<64x32xbf16> to vector<8x8x32xbf16>
    "tpu.trace_start"() <{level = 10 : i32, message = "gnd,gmd->gnm"}> : () -> ()
    %cst_47 = arith.constant dense<0.000000e+00> : vector<8x8x8xf32>
    %76 = tpu.matmul %66, %69, %cst_47 {dimension_numbers = #tpu.dot_dimension_numbers<[2], [2], [1], [1], [0, 0, 0, 1, 1, 1], [0], [0]>} : vector<8x8x8xbf16>, vector<8x8x8xbf16>, vector<8x8x8xf32> -> vector<8x8x8xf32>
    "tpu.trace_stop"() : () -> ()
    %cst_48 = arith.constant dense<0xFF800000> : vector<8x8xf32>
    %77 = vector.multi_reduction <maximumf>, %76, %cst_48 [2] : vector<8x8x8xf32> to vector<8x8xf32>
    %78 = vector.shape_cast %77 : vector<8x8xf32> to vector<8x8x1xf32>
    %79 = vector.broadcast %78 : vector<8x8x1xf32> to vector<8x8x8xf32>
    %80 = arith.subf %76, %79 : vector<8x8x8xf32>
    %81 = math.exp %80 : vector<8x8x8xf32>
    %cst_49 = arith.constant dense<0.000000e+00> : vector<8x8xf32>
    %82 = vector.multi_reduction <add>, %81, %cst_49 [2] : vector<8x8x8xf32> to vector<8x8xf32>
    %83 = vector.shape_cast %82 : vector<8x8xf32> to vector<8x8x1xf32>
    %84 = tpu.reciprocal %83 {approx = true} : vector<8x8x1xf32> -> vector<8x8x1xf32>
    %85 = arith.truncf %81 : vector<8x8x8xf32> to vector<8x8x8xbf16>
    "tpu.trace_start"() <{level = 10 : i32, message = "gnm,gmk->gnk"}> : () -> ()
    %cst_50 = arith.constant dense<0.000000e+00> : vector<8x8x32xf32>
    %86 = tpu.matmul %85, %75, %cst_50 {dimension_numbers = #tpu.dot_dimension_numbers<[2], [1], [1], [2], [0, 0, 0, 1, 1, 2], [0], [0]>} : vector<8x8x8xbf16>, vector<8x8x32xbf16>, vector<8x8x32xf32> -> vector<8x8x32xf32>
    "tpu.trace_stop"() : () -> ()
    %87 = vector.broadcast %84 : vector<8x8x1xf32> to vector<8x8x32xf32>
    %88 = arith.mulf %86, %87 : vector<8x8x32xf32>
    %89 = vector.shape_cast %88 : vector<8x8x32xf32> to vector<64x32xf32>
    %90 = arith.addf %61, %89 : vector<64x32xf32>
    %91 = vector.extract_strided_slice %31 {offsets = [0, 16], sizes = [64, 8], strides = [1, 1]} : vector<64x96xf32> to vector<64x8xf32>
    %cst_51 = arith.constant 0.353553385 : f32
    %92 = vector.broadcast %cst_51 : f32 to vector<64x8xf32>
    %93 = arith.mulf %91, %92 : vector<64x8xf32>
    %94 = arith.truncf %93 : vector<64x8xf32> to vector<64x8xbf16>
    %95 = vector.shape_cast %94 : vector<64x8xbf16> to vector<8x8x8xbf16>
    %96 = vector.extract_strided_slice %31 {offsets = [0, 48], sizes = [64, 8], strides = [1, 1]} : vector<64x96xf32> to vector<64x8xf32>
    %97 = arith.truncf %96 : vector<64x8xf32> to vector<64x8xbf16>
    %98 = vector.shape_cast %97 : vector<64x8xbf16> to vector<8x8x8xbf16>
    %99 = vector.extract_strided_slice %31 {offsets = [0, 80], sizes = [64, 8], strides = [1, 1]} : vector<64x96xf32> to vector<64x8xf32>
    %100 = arith.truncf %99 : vector<64x8xf32> to vector<64x8xbf16>
    %101 = vector.extract_strided_slice %9 {offsets = [16, 0], sizes = [8, 32], strides = [1, 1]} : vector<32x32xbf16> to vector<8x32xbf16>
    %cst_52 = arith.constant dense<0.000000e+00> : vector<64x32xf32>
    %102 = tpu.matmul %100, %101, %cst_52 {dimension_numbers = #tpu.dot_dimension_numbers<[1], [0], [0], [1], [0, 0, 1, 1], [], []>} : vector<64x8xbf16>, vector<8x32xbf16>, vector<64x32xf32> -> vector<64x32xf32>
    %103 = arith.truncf %102 : vector<64x32xf32> to vector<64x32xbf16>
    %104 = vector.shape_cast %103 : vector<64x32xbf16> to vector<8x8x32xbf16>
    "tpu.trace_start"() <{level = 10 : i32, message = "gnd,gmd->gnm"}> : () -> ()
    %cst_53 = arith.constant dense<0.000000e+00> : vector<8x8x8xf32>
    %105 = tpu.matmul %95, %98, %cst_53 {dimension_numbers = #tpu.dot_dimension_numbers<[2], [2], [1], [1], [0, 0, 0, 1, 1, 1], [0], [0]>} : vector<8x8x8xbf16>, vector<8x8x8xbf16>, vector<8x8x8xf32> -> vector<8x8x8xf32>
    "tpu.trace_stop"() : () -> ()
    %cst_54 = arith.constant dense<0xFF800000> : vector<8x8xf32>
    %106 = vector.multi_reduction <maximumf>, %105, %cst_54 [2] : vector<8x8x8xf32> to vector<8x8xf32>
    %107 = vector.shape_cast %106 : vector<8x8xf32> to vector<8x8x1xf32>
    %108 = vector.broadcast %107 : vector<8x8x1xf32> to vector<8x8x8xf32>
    %109 = arith.subf %105, %108 : vector<8x8x8xf32>
    %110 = math.exp %109 : vector<8x8x8xf32>
    %cst_55 = arith.constant dense<0.000000e+00> : vector<8x8xf32>
    %111 = vector.multi_reduction <add>, %110, %cst_55 [2] : vector<8x8x8xf32> to vector<8x8xf32>
    %112 = vector.shape_cast %111 : vector<8x8xf32> to vector<8x8x1xf32>
    %113 = tpu.reciprocal %112 {approx = true} : vector<8x8x1xf32> -> vector<8x8x1xf32>
    %114 = arith.truncf %110 : vector<8x8x8xf32> to vector<8x8x8xbf16>
    "tpu.trace_start"() <{level = 10 : i32, message = "gnm,gmk->gnk"}> : () -> ()
    %cst_56 = arith.constant dense<0.000000e+00> : vector<8x8x32xf32>
    %115 = tpu.matmul %114, %104, %cst_56 {dimension_numbers = #tpu.dot_dimension_numbers<[2], [1], [1], [2], [0, 0, 0, 1, 1, 2], [0], [0]>} : vector<8x8x8xbf16>, vector<8x8x32xbf16>, vector<8x8x32xf32> -> vector<8x8x32xf32>
    "tpu.trace_stop"() : () -> ()
    %116 = vector.broadcast %113 : vector<8x8x1xf32> to vector<8x8x32xf32>
    %117 = arith.mulf %115, %116 : vector<8x8x32xf32>
    %118 = vector.shape_cast %117 : vector<8x8x32xf32> to vector<64x32xf32>
    %119 = arith.addf %90, %118 : vector<64x32xf32>
    %120 = vector.extract_strided_slice %31 {offsets = [0, 24], sizes = [64, 8], strides = [1, 1]} : vector<64x96xf32> to vector<64x8xf32>
    %cst_57 = arith.constant 0.353553385 : f32
    %121 = vector.broadcast %cst_57 : f32 to vector<64x8xf32>
    %122 = arith.mulf %120, %121 : vector<64x8xf32>
    %123 = arith.truncf %122 : vector<64x8xf32> to vector<64x8xbf16>
    %124 = vector.shape_cast %123 : vector<64x8xbf16> to vector<8x8x8xbf16>
    %125 = vector.extract_strided_slice %31 {offsets = [0, 56], sizes = [64, 8], strides = [1, 1]} : vector<64x96xf32> to vector<64x8xf32>
    %126 = arith.truncf %125 : vector<64x8xf32> to vector<64x8xbf16>
    %127 = vector.shape_cast %126 : vector<64x8xbf16> to vector<8x8x8xbf16>
    %128 = vector.extract_strided_slice %31 {offsets = [0, 88], sizes = [64, 8], strides = [1, 1]} : vector<64x96xf32> to vector<64x8xf32>
    %129 = arith.truncf %128 : vector<64x8xf32> to vector<64x8xbf16>
    %130 = vector.extract_strided_slice %9 {offsets = [24, 0], sizes = [8, 32], strides = [1, 1]} : vector<32x32xbf16> to vector<8x32xbf16>
    %cst_58 = arith.constant dense<0.000000e+00> : vector<64x32xf32>
    %131 = tpu.matmul %129, %130, %cst_58 {dimension_numbers = #tpu.dot_dimension_numbers<[1], [0], [0], [1], [0, 0, 1, 1], [], []>} : vector<64x8xbf16>, vector<8x32xbf16>, vector<64x32xf32> -> vector<64x32xf32>
    %132 = arith.truncf %131 : vector<64x32xf32> to vector<64x32xbf16>
    %133 = vector.shape_cast %132 : vector<64x32xbf16> to vector<8x8x32xbf16>
    "tpu.trace_start"() <{level = 10 : i32, message = "gnd,gmd->gnm"}> : () -> ()
    %cst_59 = arith.constant dense<0.000000e+00> : vector<8x8x8xf32>
    %134 = tpu.matmul %124, %127, %cst_59 {dimension_numbers = #tpu.dot_dimension_numbers<[2], [2], [1], [1], [0, 0, 0, 1, 1, 1], [0], [0]>} : vector<8x8x8xbf16>, vector<8x8x8xbf16>, vector<8x8x8xf32> -> vector<8x8x8xf32>
    "tpu.trace_stop"() : () -> ()
    %cst_60 = arith.constant dense<0xFF800000> : vector<8x8xf32>
    %135 = vector.multi_reduction <maximumf>, %134, %cst_60 [2] : vector<8x8x8xf32> to vector<8x8xf32>
    %136 = vector.shape_cast %135 : vector<8x8xf32> to vector<8x8x1xf32>
    %137 = vector.broadcast %136 : vector<8x8x1xf32> to vector<8x8x8xf32>
    %138 = arith.subf %134, %137 : vector<8x8x8xf32>
    %139 = math.exp %138 : vector<8x8x8xf32>
    %cst_61 = arith.constant dense<0.000000e+00> : vector<8x8xf32>
    %140 = vector.multi_reduction <add>, %139, %cst_61 [2] : vector<8x8x8xf32> to vector<8x8xf32>
    %141 = vector.shape_cast %140 : vector<8x8xf32> to vector<8x8x1xf32>
    %142 = tpu.reciprocal %141 {approx = true} : vector<8x8x1xf32> -> vector<8x8x1xf32>
    %143 = arith.truncf %139 : vector<8x8x8xf32> to vector<8x8x8xbf16>
    "tpu.trace_start"() <{level = 10 : i32, message = "gnm,gmk->gnk"}> : () -> ()
    %cst_62 = arith.constant dense<0.000000e+00> : vector<8x8x32xf32>
    %144 = tpu.matmul %143, %133, %cst_62 {dimension_numbers = #tpu.dot_dimension_numbers<[2], [1], [1], [2], [0, 0, 0, 1, 1, 2], [0], [0]>} : vector<8x8x8xbf16>, vector<8x8x32xbf16>, vector<8x8x32xf32> -> vector<8x8x32xf32>
    "tpu.trace_stop"() : () -> ()
    %145 = vector.broadcast %142 : vector<8x8x1xf32> to vector<8x8x32xf32>
    %146 = arith.mulf %144, %145 : vector<8x8x32xf32>
    %147 = vector.shape_cast %146 : vector<8x8x32xf32> to vector<64x32xf32>
    %148 = arith.addf %119, %147 : vector<64x32xf32>
    %149 = vector.broadcast %11 : vector<1x32xf32> to vector<64x32xf32>
    %150 = arith.addf %148, %149 : vector<64x32xf32>
    %151 = arith.addf %3, %150 : vector<64x32xf32>
    %cst_63 = arith.constant dense<0.000000e+00> : vector<64xf32>
    %152 = vector.multi_reduction <add>, %151, %cst_63 [1] : vector<64x32xf32> to vector<64xf32>
    %153 = vector.shape_cast %152 : vector<64xf32> to vector<64x1xf32>
    %cst_64 = arith.constant 3.200000e+01 : f32
    %154 = vector.broadcast %cst_64 : f32 to vector<64x1xf32>
    %155 = arith.divf %153, %154 : vector<64x1xf32>
    %156 = vector.broadcast %155 : vector<64x1xf32> to vector<64x32xf32>
    %157 = arith.subf %151, %156 : vector<64x32xf32>
    %158 = arith.mulf %157, %157 : vector<64x32xf32>
    %cst_65 = arith.constant dense<0.000000e+00> : vector<64xf32>
    %159 = vector.multi_reduction <add>, %158, %cst_65 [1] : vector<64x32xf32> to vector<64xf32>
    %160 = vector.shape_cast %159 : vector<64xf32> to vector<64x1xf32>
    %cst_66 = arith.constant 3.200000e+01 : f32
    %161 = vector.broadcast %cst_66 : f32 to vector<64x1xf32>
    %162 = arith.divf %160, %161 : vector<64x1xf32>
    %163 = vector.broadcast %155 : vector<64x1xf32> to vector<64x32xf32>
    %164 = arith.subf %151, %163 : vector<64x32xf32>
    %cst_67 = arith.constant 9.99999974E-6 : f32
    %165 = vector.broadcast %cst_67 : f32 to vector<64x1xf32>
    %166 = arith.addf %162, %165 : vector<64x1xf32>
    %167 = math.rsqrt %166 : vector<64x1xf32>
    %168 = vector.broadcast %167 : vector<64x1xf32> to vector<64x32xf32>
    %169 = arith.mulf %164, %168 : vector<64x32xf32>
    %170 = vector.broadcast %13 : vector<1x32xf32> to vector<64x32xf32>
    %171 = arith.mulf %169, %170 : vector<64x32xf32>
    %172 = vector.broadcast %15 : vector<1x32xf32> to vector<64x32xf32>
    %173 = arith.addf %171, %172 : vector<64x32xf32>
    %174 = arith.truncf %173 : vector<64x32xf32> to vector<64x32xbf16>
    %cst_68 = arith.constant dense<0.000000e+00> : vector<64x64xf32>
    %175 = tpu.matmul %174, %17, %cst_68 {dimension_numbers = #tpu.dot_dimension_numbers<[1], [0], [0], [1], [0, 0, 1, 1], [], []>} : vector<64x32xbf16>, vector<32x64xbf16>, vector<64x64xf32> -> vector<64x64xf32>
    %176 = vector.broadcast %19 : vector<1x64xf32> to vector<64x64xf32>
    %177 = arith.addf %175, %176 : vector<64x64xf32>
    %cst_69 = arith.constant 0.000000e+00 : f32
    %178 = vector.broadcast %cst_69 : f32 to vector<64x64xf32>
    %179 = arith.maximumf %177, %178 : vector<64x64xf32>
    %180 = arith.truncf %179 : vector<64x64xf32> to vector<64x64xbf16>
    %cst_70 = arith.constant dense<0.000000e+00> : vector<64x32xf32>
    %181 = tpu.matmul %180, %21, %cst_70 {dimension_numbers = #tpu.dot_dimension_numbers<[1], [0], [0], [1], [0, 0, 1, 1], [], []>} : vector<64x64xbf16>, vector<64x32xbf16>, vector<64x32xf32> -> vector<64x32xf32>
    %182 = vector.broadcast %23 : vector<1x32xf32> to vector<64x32xf32>
    %183 = arith.addf %181, %182 : vector<64x32xf32>
    %184 = arith.addf %173, %183 : vector<64x32xf32>
    %cst_71 = arith.constant dense<0.000000e+00> : vector<64xf32>
    %185 = vector.multi_reduction <add>, %184, %cst_71 [1] : vector<64x32xf32> to vector<64xf32>
    %186 = vector.shape_cast %185 : vector<64xf32> to vector<64x1xf32>
    %cst_72 = arith.constant 3.200000e+01 : f32
    %187 = vector.broadcast %cst_72 : f32 to vector<64x1xf32>
    %188 = arith.divf %186, %187 : vector<64x1xf32>
    %189 = vector.broadcast %188 : vector<64x1xf32> to vector<64x32xf32>
    %190 = arith.subf %184, %189 : vector<64x32xf32>
    %191 = arith.mulf %190, %190 : vector<64x32xf32>
    %cst_73 = arith.constant dense<0.000000e+00> : vector<64xf32>
    %192 = vector.multi_reduction <add>, %191, %cst_73 [1] : vector<64x32xf32> to vector<64xf32>
    %193 = vector.shape_cast %192 : vector<64xf32> to vector<64x1xf32>
    %cst_74 = arith.constant 3.200000e+01 : f32
    %194 = vector.broadcast %cst_74 : f32 to vector<64x1xf32>
    %195 = arith.divf %193, %194 : vector<64x1xf32>
    %196 = vector.broadcast %188 : vector<64x1xf32> to vector<64x32xf32>
    %197 = arith.subf %184, %196 : vector<64x32xf32>
    %cst_75 = arith.constant 9.99999974E-6 : f32
    %198 = vector.broadcast %cst_75 : f32 to vector<64x1xf32>
    %199 = arith.addf %195, %198 : vector<64x1xf32>
    %200 = math.rsqrt %199 : vector<64x1xf32>
    %201 = vector.broadcast %200 : vector<64x1xf32> to vector<64x32xf32>
    %202 = arith.mulf %197, %201 : vector<64x32xf32>
    %203 = vector.broadcast %25 : vector<1x32xf32> to vector<64x32xf32>
    %204 = arith.mulf %202, %203 : vector<64x32xf32>
    %205 = vector.broadcast %27 : vector<1x32xf32> to vector<64x32xf32>
    %206 = arith.addf %204, %205 : vector<64x32xf32>
    %c0_76 = arith.constant 0 : index
    %c0_77 = arith.constant 0 : index
    %207 = vector.load %arg15[%c0_76, %c0_77] : memref<64x32xf32, #tpu.memory_space<vmem>>, vector<64x32xf32>
    tpu.vector_store %arg15[%c0_76, %c0_77], %206 {strides = array<i32>} : memref<64x32xf32, #tpu.memory_space<vmem>>, vector<64x32xf32>,
    return
  }
  func.func @transform_0(%arg0: i32, %arg1: i32) -> (i32, i32) {
    %c0_i32 = arith.constant 0 : i32
    %c0_i32_0 = arith.constant 0 : i32
    return %arg0, %c0_i32 : i32, i32
  }
  func.func @transform_1(%arg0: i32, %arg1: i32) -> (i32, i32, i32) {
    %c0_i32 = arith.constant 0 : i32
    %c0_i32_0 = arith.constant 0 : i32
    %c0_i32_1 = arith.constant 0 : i32
    return %arg1, %c0_i32, %c0_i32_0 : i32, i32, i32
  }
  func.func @transform_2(%arg0: i32, %arg1: i32) -> (i32, i32, i32) {
    %c0_i32 = arith.constant 0 : i32
    %c0_i32_0 = arith.constant 0 : i32
    %c0_i32_1 = arith.constant 0 : i32
    return %arg1, %c0_i32, %c0_i32_0 : i32, i32, i32
  }
  func.func @transform_3(%arg0: i32, %arg1: i32) -> (i32, i32, i32) {
    %c0_i32 = arith.constant 0 : i32
    %c0_i32_0 = arith.constant 0 : i32
    %c0_i32_1 = arith.constant 0 : i32
    return %arg1, %c0_i32, %c0_i32_0 : i32, i32, i32
  }
  func.func @transform_4(%arg0: i32, %arg1: i32) -> (i32, i32, i32) {
    %c0_i32 = arith.constant 0 : i32
    %c0_i32_0 = arith.constant 0 : i32
    %c0_i32_1 = arith.constant 0 : i32
    return %arg1, %c0_i32, %c0_i32_0 : i32, i32, i32
  }
  func.func @transform_5(%arg0: i32, %arg1: i32) -> (i32, i32, i32) {
    %c0_i32 = arith.constant 0 : i32
    %c0_i32_0 = arith.constant 0 : i32
    %c0_i32_1 = arith.constant 0 : i32
    return %arg1, %c0_i32, %c0_i32_0 : i32, i32, i32
  }
  func.func @transform_6(%arg0: i32, %arg1: i32) -> (i32, i32, i32) {
    %c0_i32 = arith.constant 0 : i32
    %c0_i32_0 = arith.constant 0 : i32
    %c0_i32_1 = arith.constant 0 : i32
    return %arg1, %c0_i32, %c0_i32_0 : i32, i32, i32
  }
  func.func @transform_7(%arg0: i32, %arg1: i32) -> (i32, i32, i32) {
    %c0_i32 = arith.constant 0 : i32
    %c0_i32_0 = arith.constant 0 : i32
    %c0_i32_1 = arith.constant 0 : i32
    return %arg1, %c0_i32, %c0_i32_0 : i32, i32, i32
  }
  func.func @transform_8(%arg0: i32, %arg1: i32) -> (i32, i32, i32) {
    %c0_i32 = arith.constant 0 : i32
    %c0_i32_0 = arith.constant 0 : i32
    %c0_i32_1 = arith.constant 0 : i32
    return %arg1, %c0_i32, %c0_i32_0 : i32, i32, i32
  }
  func.func @transform_9(%arg0: i32, %arg1: i32) -> (i32, i32, i32) {
    %c0_i32 = arith.constant 0 : i32
    %c0_i32_0 = arith.constant 0 : i32
    %c0_i32_1 = arith.constant 0 : i32
    return %arg1, %c0_i32, %c0_i32_0 : i32, i32, i32
  }
  func.func @transform_10(%arg0: i32, %arg1: i32) -> (i32, i32, i32) {
    %c0_i32 = arith.constant 0 : i32
    %c0_i32_0 = arith.constant 0 : i32
    %c0_i32_1 = arith.constant 0 : i32
    return %arg1, %c0_i32, %c0_i32_0 : i32, i32, i32
  }
  func.func @transform_11(%arg0: i32, %arg1: i32) -> (i32, i32, i32) {
    %c0_i32 = arith.constant 0 : i32
    %c0_i32_0 = arith.constant 0 : i32
    %c0_i32_1 = arith.constant 0 : i32
    return %arg1, %c0_i32, %c0_i32_0 : i32, i32, i32
  }
  func.func @transform_12(%arg0: i32, %arg1: i32) -> (i32, i32, i32) {
    %c0_i32 = arith.constant 0 : i32
    %c0_i32_0 = arith.constant 0 : i32
    %c0_i32_1 = arith.constant 0 : i32
    return %arg1, %c0_i32, %c0_i32_0 : i32, i32, i32
  }
  func.func @transform_13(%arg0: i32, %arg1: i32) -> (i32, i32) {
    %c0_i32 = arith.constant 0 : i32
    %c0_i32_0 = arith.constant 0 : i32
    return %arg0, %c0_i32 : i32, i32
  }
}

</mosaic_0001>

<bundles_post_ra>
// kernel: encoder_forward.1
= control target key start
LH: loop header
LB: loop body
LE: loop exit
PB: predicated region body
PF: predicated region fallthrough
CT: control target
= control target key end

     0   :  { %s4111_s25 = smov 0   ;;  %s4113_s26 = smov 0   ;;  %s5389_s0 = inlined_call_operand.vmem [shape: f32[128,32], index: 0, kind: input, shape index: {}, may-alias: {0,13}]   ;;  %s5390_s1 = inlined_call_operand.vmem [shape: bf16[2,32,96], index: 1, kind: input, shape index: {}]   ;;  %s5391_s2 = inlined_call_operand.vmem [shape: f32[2,1,96], index: 2, kind: input, shape index: {}]   ;;  %s5392_s3 = inlined_call_operand.vmem [shape: bf16[2,32,32], index: 3, kind: input, shape index: {}]   ;;  %s5393_s4 = inlined_call_operand.vmem [shape: f32[2,1,32], index: 4, kind: input, shape index: {}]   ;;  %s5394_s5 = inlined_call_operand.vmem [shape: f32[2,1,32], index: 5, kind: input, shape index: {}]   ;;  %s5395_s6 = inlined_call_operand.vmem [shape: f32[2,1,32], index: 6, kind: input, shape index: {}]   ;;  %s5396_s7 = inlined_call_operand.vmem [shape: bf16[2,32,64], index: 7, kind: input, shape index: {}]   ;;  %s5397_s8 = inlined_call_operand.vmem [shape: f32[2,1,64], index: 8, kind: input, shape index: {}]   ;;  %s5398_s9 = inlined_call_operand.vmem [shape: bf16[2,64,32], index: 9, kind: input, shape index: {}]   ;;  %s5399_s10 = inlined_call_operand.vmem [shape: f32[2,1,32], index: 10, kind: input, shape index: {}]   ;;  %s5400_s11 = inlined_call_operand.vmem [shape: f32[2,1,32], index: 11, kind: input, shape index: {}]   ;;  %s5401_s12 = inlined_call_operand.vmem [shape: f32[2,1,32], index: 12, kind: input, shape index: {}]   ;;  %s5402_s13 = inlined_call_operand.vmem [shape: f32[128,32], index: 13, kind: output, shape index: {}, may-alias: {0,13}]  }
   0x1   :  { %5407 = sst [smem:[#allocation10_spill]] %s5389_s0  ;;  %s4115_s27 = smov 0  }
   0x2   :  { %5408 = sst [smem:[#allocation11_spill]] %s5390_s1  ;;  %s4117_s28 = smov 0  }
   0x3   :  { %5409 = sst [smem:[#allocation12_spill]] %s5391_s2  ;;  %s4119_s29 = smov 0  }
   0x4   :  { %5410 = sst [smem:[#allocation13_spill]] %s5392_s3 }
   0x5   :  { %5411 = sst [smem:[#allocation14_spill]] %s5396_s7 }
   0x6   :  { %5412 = sst [smem:[#allocation15_spill]] %s5402_s13 }
   0x7 LB: > { %5413 = sst [smem:[#allocation2_spill]] %s4011_s25  ;;  %s32_s30 = sadd.s32 1, %s4019_s27  ;;  %s4027_s29 = sphi %s4119_s29, %s23_s29   ;;  %s4023_s28 = sphi %s4117_s28, %s5440_s28   ;;  %s4019_s27 = sphi %s4115_s27, %s5439_s27   ;;  %s4015_s26 = sphi %s4113_s26, %s5438_s26   ;;  %s4011_s25 = sphi %s4111_s25, %s5437_s25  }
   0x8   : > { %5414 = sst [smem:[#allocation3_spill]] %s4019_s27  ;;  %s35_s14 = sadd.s32 1, %s4023_s28 }
   0x9   : > { %5415 = sst [smem:[#allocation4_spill]] %s4023_s28  ;;  %p33_p0 = scmp.ge.s32.totalorder %s32_s30, 2 }
   0xa   : > { %5416 = sst [smem:[#allocation5_spill]] %s4027_s29  ;;  %p3604_p1 = scmp.ge.s32.totalorder %s4027_s29, 1 }
   0xb   : > { %p504_p2 = scmp.lt.s32.totalorder %s4027_s29, 5  ;;  %s5442_s30 = smov (%p33_p0, %s32_s30), 0 }
   0xc   : > { %5417 = sst [smem:[#allocation6_spill]] %s5442_s30  ;;  %s5444_s14 = smov (!%p33_p0, %s35_s14), %s4023_s28 }
   0xd   : > { %p505_p3 = pnand %p3604_p1, %p504_p2  ;;  %p37_p4 = scmp.ge.s32.totalorder %s5444_s14, 2 }
   0xf   : > { %s5446_s14 = smov (%p37_p4, %s5444_s14), 0  ;;  %508 = sbr.rel (%p505_p3) target bundleno = 2661 (0xa65), region = 72 }
  0x10   : > { %5418 = sst [smem:[#allocation7_spill]] %s5446_s14 }
  0x14   : > { %s3605_s15 = sshll.u32 %s4015_s26, 3  ;;  %p598_p5 = scmp.lt.s32.totalorder %s4011_s25, 1 }
  0x15   : > { %p593_p6 = scmp.lt.s32.totalorder %s3605_s15, 15  ;;  %s5420_s1 = sld [smem:[#allocation11_spill]] }
  0x16   : > { %s4145_s16 = scalar_select %p598_p5, %s4011_s25, 1 }
  0x17   : > { %s5448_s15 = smov (!%p593_p6, %s3605_s15), 15  ;;  %s5421_s0 = sld [smem:[#allocation10_spill]] }
  0x18   : > { %s3744_s17 = sshll.u32 %s4145_s16, 4  ;;  %s3606_s21 = sshll.u32 %s5448_s15, 3 }
  0x19   : > { %s5422_s3 = sld [smem:[#allocation13_spill]]  ;;  %s635_s22 = scalar_lea.vmem %s5399_s10, %s4145_s16 }
  0x1a   : > { %s5423_s7 = sld [smem:[#allocation14_spill]]  ;;  %s638_s2 = scalar_lea.vmem %s5400_s11, %s4145_s16 }
  0x1b   : > { %s4155_s24 = scalar_lea.vmem %s5420_s1, %s3744_s17  ;;  %s641_s20 = scalar_lea.vmem %s5401_s12, %s4145_s16 }
  0x1c   : > { %s5425_s13 = sld [smem:[#allocation2_spill]] }
  0x1d   : > { %s596_s30 = scalar_lea.vmem %s5421_s0, %s3606_s21  ;;  %s5424_s0 = sld [smem:[#allocation15_spill]] }
  0x1f   : > { %s4163_s29 = scalar_lea.vmem %s5422_s3, %s3744_s17  ;;  %s3747_s3 = sshll.u32 %s4145_s16, 5 }
  0x20   : > { %s4180_s26 = scalar_lea.vmem %s5423_s7, %s3744_s17  ;;  %s4190_s18 = scalar_lea.vmem %s5398_s9, %s3747_s3 }
  0x22   : > { %p3617_p7 = scmp.ne.s32.totalorder %s5425_s13, 0 }
  0x23   : > { %s4207_s7 = scalar_lea.vmem %s5424_s0, %s3606_s21 }
  0x24   : > { %652 = sbr.rel (%p3617_p7) target bundleno = 52 (0x34), region = 76 }
  0x29   : > { %v653_v0 = vld [vmem:[%s596_s30] sm:$0xff]  ;;  %v654_v1 = vld [vmem:[%s596_s30 + $0x8] sm:$0xff]  ;;  %v655_v2 = vld [vmem:[%s596_s30 + $0x10] sm:$0xff]  ;;  %vm661_vm0 = vcmask 261120  }
  0x2a   : > { %v656_v3 = vld [vmem:[%s596_s30 + $0x18] sm:$0xff]  ;;  %v657_v4 = vld [vmem:[%s596_s30 + $0x20] sm:$0xff]  ;;  %v658_v5 = vld [vmem:[%s596_s30 + $0x28] sm:$0xff] }
  0x2b   : > { %v659_v6 = vld [vmem:[%s596_s30 + $0x30] sm:$0xff]  ;;  %v660_v7 = vld [vmem:[%s596_s30 + $0x38] sm:$0xff] }
  0x2c   : > { %662 = vst.msk [vmem:[%s4207_s7] sm:$0xff] %vm661_vm0, %v653_v0 }
  0x2d   : > { %663 = vst.msk [vmem:[%s4207_s7 + $0x8] sm:$0xff] %vm661_vm0, %v654_v1 }
  0x2e   : > { %664 = vst.msk [vmem:[%s4207_s7 + $0x10] sm:$0xff] %vm661_vm0, %v655_v2 }
  0x2f   : > { %665 = vst.msk [vmem:[%s4207_s7 + $0x18] sm:$0xff] %vm661_vm0, %v656_v3 }
  0x30   : > { %666 = vst.msk [vmem:[%s4207_s7 + $0x20] sm:$0xff] %vm661_vm0, %v657_v4 }
  0x31   : > { %667 = vst.msk [vmem:[%s4207_s7 + $0x28] sm:$0xff] %vm661_vm0, %v658_v5 }
  0x32   : > { %668 = vst.msk [vmem:[%s4207_s7 + $0x30] sm:$0xff] %vm661_vm0, %v659_v6 }
  0x33   : > { %669 = vst.msk [vmem:[%s4207_s7 + $0x38] sm:$0xff] %vm661_vm0, %v660_v7 }
  0x34 PF: > { %v3749_v8 = vld [vmem:[%s4155_s24 + $0x8] sm:$0xff]  ;;  %v3748_v9 = vld [vmem:[%s4155_s24] sm:$0xff]  ;;  %vm725_vm1 = vcmask 261120   ;;  %s5426_s3 = sld [smem:[#allocation12_spill]]  ;;  %s4029_s21 = smov 96   ;;  %vm820_vm2 = vcmask 1043456  }
  0x35   : > { %v670_v10 = vld [vmem:[%s4207_s7] sm:$0xff]  ;;  %744 = vmatpush.bf16.msra.mxu0 %v3749_v8  ;;  %3756 = vmatpush.bf16.msra.mxu2 %v3749_v8  ;;  %v671_v11 = vld [vmem:[%s4207_s7 + $0x8] sm:$0xff]  ;;  %v672_v16 = vld [vmem:[%s4207_s7 + $0x10] sm:$0xff]  ;;  %s4030_s24 = smov 64   ;;  %vm807_vm3 = vcmask 64512   ;;  %s4031_s25 = smov 88  }
  0x36   : > { %v706_v14 = vpack.c.bf16 %v671_v11, %v670_v10  ;;  %v673_v17 = vld [vmem:[%s4207_s7 + $0x18] sm:$0xff]  ;;  %v683_v3 = vld [vmem:[%s4163_s29] sm:$0xf]  ;;  %s4032_s19 = smov 120   ;;  %s4033_s15 = smov 56  }
  0x37   : > { %v674_v12 = vld [vmem:[%s4207_s7 + $0x20] sm:$0xff]  ;;  %v707_v20 = vpack.c.bf16 %v673_v17, %v672_v16  ;;  %v822_v4 = vsel %vm820_vm2, %v683_v3, 0  ;;  %s4034_s23 = smov 80   ;;  %s4035_s17 = smov 112  }
  0x38   : > { %v675_v13 = vld [vmem:[%s4207_s7 + $0x28] sm:$0xff]  ;;  %831 = vmatpush.bf16.msra.mxu1 %v822_v4  ;;  %3758 = vmatpush.bf16.msra.mxu3 %v822_v4  ;;  %s4036_s14 = smov 48   ;;  %s4037_s27 = smov 72  }
  0x39   : > { %v708_v15 = vpack.c.bf16 %v675_v13, %v674_v12  ;;  %745 = vmatpush.bf16.msra.mxu0 %v3748_v9  ;;  %3757 = vmatpush.bf16.msra.mxu2 %v3748_v9  ;;  %v676_v18 = vld [vmem:[%s4207_s7 + $0x30] sm:$0xff]  ;;  %s4038_s28 = smov 104   ;;  %s4039_s13 = smov 40  }
  0x3a   : > { %v677_v19 = vld [vmem:[%s4207_s7 + $0x38] sm:$0xff]  ;;  %s5427_s30 = scalar_lea.vmem %s5426_s3, %s4145_s16  ;;  %s5430_s1 = scalar_lea.vmem %s5393_s4, %s4145_s16 }
  0x3b   : > { %v709_v21 = vpack.c.bf16 %v677_v19, %v676_v18  ;;  %v3811_v22 = vld [vmem:[%s5427_s30] ss:$0 sm:$0xff]  ;;  %s5433_s30 = scalar_lea.vmem %s5394_s5, %s4145_s16 }
  0x3c   : > { %3626 = vmatmul.msk.bf16.vlgmr.msra.gmra.mxu0 %vm725_vm1, %v706_v14  ;;  %3628 = vmatmul.msk.bf16.vlgmr.msra.gmra.mxu2 %vm725_vm1, %v708_v15 }
  0x4c   : > { %3627 = vmatmul.msk.bf16.gmra.mxu0 %vm725_vm1, %v707_v20  ;;  %3629 = vmatmul.msk.bf16.gmra.mxu2 %vm725_vm1, %v709_v21 }
  0xb9   : > { %v747_v23 = vpop.f32.mrf.mxu0 }
  0xba   : > { %v4237_v24 = vadd.f32 %v3811_v22, %v747_v23 }
  0xbc   : > { %v783_v25 = vpack.c.bf16 %v4237_v24, %v4237_v24  ;;  %v767_v11 = vmul.f32 0.35355338, %v4237_v24 }
  0xbe   : > { %v862_v26 = vunpack.c.l.b16 %v783_v25  ;;  %v4327_v12 = vpack.c.bf16 %v767_v11, %v767_v11 }
  0xbf   : > { %v757_v27 = vpop.f32.mrf.mxu2 }
  0xc0   : > { %v4241_v28 = vpack.c.b16 %v862_v26, %v862_v26  ;;  %v4263_v42 = vadd.f32 %v3811_v22, %v757_v27 }
  0xc1   : > { %v749_v29 = vpop.f32.mrf.mxu0 }
  0xc2   : > { %864 = vrot.lane.b32.xlu1 %v4241_v28, %s4029_s21  ;;  %v4255_v39 = vadd.f32 %v3811_v22, %v749_v29  ;;  %v787_v50 = vpack.c.bf16 %v4263_v42, %v4263_v42 }
  0xc4   : > { %v784_v47 = vpack.c.bf16 %v4255_v39, %v4255_v39  ;;  %v958_v54 = vunpack.c.l.b16 %v787_v50  ;;  %v4304_v61 = vpack.c.bf16 %v4255_v39, %v4237_v24 }
  0xc6   : > { %v886_v53 = vunpack.c.l.b16 %v784_v47  ;;  %v4296_v58 = vpack.c.b16 %v958_v54, %v958_v54 }
  0xc7   : > { %v759_v30 = vpop.f32.mrf.mxu2 }
  0xc8   : > { %v4267_v45 = vadd.f32 %v3811_v22, %v759_v30  ;;  %v4292_v56 = vpack.c.b16 %v886_v53, %v886_v53  ;;  %v768_v30 = vmul.f32 0.35355338, %v4255_v39 }
  0xc9   : > { %v752_v31 = vpop.f32.mrf.mxu0 }
  0xca   : > { %v4245_v32 = vadd.f32 %v3811_v22, %v752_v31  ;;  %v4286_v52 = vpack.c.bf16 %v4267_v45, %v4263_v42  ;;  %v788_v62 = vpack.c.bf16 %v4267_v45, %v4267_v45  ;;  %v776_v31 = vpack.c.bf16 %v768_v30, %v768_v30 }
  0xcb   : > { %v772_v39 = vmul.f32 0.35355338, %v4267_v45 }
  0xcc   : > { %v785_v33 = vpack.c.bf16 %v4245_v32, %v4245_v32  ;;  %v982_v1 = vunpack.c.l.b16 %v788_v62  ;;  %v769_v15 = vmul.f32 0.35355338, %v4245_v32  ;;  %v1396_v4 = vunpack.c.l.b16 %v776_v31 }
  0xce   : > { %v910_v34 = vunpack.c.l.b16 %v785_v33  ;;  %v4317_v2 = vpack.c.b16 %v982_v1, %v982_v1  ;;  %v4334_v17 = vpack.c.bf16 %v769_v15, %v769_v15 }
  0xcf   : > { %v762_v35 = vpop.f32.mrf.mxu2 }
  0xd0   : > { %v4249_v36 = vpack.c.b16 %v910_v34, %v910_v34  ;;  %v4265_v43 = vadd.f32 %v3811_v22, %v762_v35 }
  0xd1   : > { %v754_v37 = vpop.f32.mrf.mxu0 }
  0xd2   : > { %v4251_v38 = vadd.f32 %v3811_v22, %v754_v37  ;;  %912 = vrot.lane.b32.xlu2 %v4249_v36, %s4029_s21  ;;  %v789_v57 = vpack.c.bf16 %v4265_v43, %v4265_v43 }
  0xd4   : > { %v786_v40 = vpack.c.bf16 %v4251_v38, %v4251_v38  ;;  %v4261_v41 = vpack.c.bf16 %v4251_v38, %v4245_v32  ;;  %v1006_v60 = vunpack.c.l.b16 %v789_v57  ;;  %v773_v32 = vmul.f32 0.35355338, %v4265_v43 }
  0xd5   : > { %v770_v34 = vmul.f32 0.35355338, %v4251_v38 }
  0xd6   : > { %v934_v44 = vunpack.c.l.b16 %v786_v40  ;;  %801 = vrot.lane.b32.xlu0 %v4261_v41, %s4030_s24  ;;  %v4311_v0 = vpack.c.b16 %v1006_v60, %v1006_v60  ;;  %v4352_v33 = vpack.c.bf16 %v773_v32, %v773_v32  ;;  %v1422_v32 = vunpack.c.l.b16 %v4334_v17 }
  0xd7   : > { %v764_v46 = vpop.f32.mrf.mxu2  ;;  %v4357_v37 = vpack.c.bf16 %v770_v34, %v770_v34 }
  0xd8   : > { %v4272_v48 = vpack.c.b16 %v934_v44, %v934_v44  ;;  %v4274_v49 = vadd.f32 %v3811_v22, %v764_v46  ;;  %v771_v22 = vmul.f32 0.35355338, %v4263_v42  ;;  %v4363_v42 = vpack.c.bf16 %v772_v39, %v772_v39 }
  0xda   : > { %v4280_v51 = vpack.c.bf16 %v4274_v49, %v4265_v43  ;;  %936 = vrot.lane.b32.xlu2 %v4272_v48, %s4029_s21  ;;  %v790_v55 = vpack.c.bf16 %v4274_v49, %v4274_v49  ;;  %v4342_v24 = vpack.c.bf16 %v771_v22, %v771_v22  ;;  %v774_v43 = vmul.f32 0.35355338, %v4274_v49 }
  0xdb   : > { %v1370_v22 = vunpack.c.l.b16 %v4327_v12 }
  0xdc   : > { %805 = vrot.lane.b32.xlu1 %v4280_v51, %s4030_s24  ;;  %v1030_v59 = vunpack.c.l.b16 %v790_v55  ;;  %v4368_v44 = vpack.c.bf16 %v774_v43, %v774_v43 }
  0xde   : > { %803 = vrot.lane.b32.xlu0 %v4286_v52, %s4030_s24  ;;  %v4308_v63 = vpack.c.b16 %v1030_v59, %v1030_v59 }
  0xe2   : > { %888 = vrot.lane.b32.xlu2 %v4292_v56, %s4029_s21 }
  0xe4   : > { %960 = vrot.lane.b32.xlu1 %v4296_v58, %s4029_s21 }
  0xe6   : > { %799 = vrot.lane.b32.xlu0 %v4304_v61, %s4030_s24 }
  0xea   : > { %1032 = vrot.lane.b32.xlu2 %v4308_v63, %s4029_s21 }
  0xec   : > { %1008 = vrot.lane.b32.xlu1 %v4311_v0, %s4029_s21 }
  0xee   : > { %984 = vrot.lane.b32.xlu0 %v4317_v2, %s4029_s21 }
 0x12c   : > { %v913_v5 = vpop.permute.xlu2 %912 }
 0x12d   : > { %v918_v6 = vsel %vm807_vm3, %v913_v5, 0 }
 0x134   : > { %v937_v7 = vpop.permute.xlu2 %936  ;;  %v865_v8 = vpop.permute.xlu1 %864 }
 0x135   : > { %v870_v9 = vsel %vm807_vm3, %v865_v8, 0  ;;  %v942_v10 = vsel %vm807_vm3, %v937_v7, 0 }
 0x136   : > { %879 = vmatpush.bf16.xpose.msrb.mxu2 %v870_v9  ;;  %951 = vmatpush.bf16.xpose.msrb.mxu3 %v942_v10  ;;  %v4386_v10 = vpack.c.b16 %v1396_v4, %v1396_v4 }
 0x13c   : > { %v889_v13 = vpop.permute.xlu2 %888 }
 0x13d   : > { %3634 = vmatmul.msk.bf16.vlgmr.msrb.gmra.mxu2 %vm807_vm3, %v4327_v12  ;;  %v894_v14 = vsel %vm807_vm3, %v889_v13, 0 }
 0x13e   : > { %927 = vmatpush.bf16.xpose.msra.mxu2 %v918_v6  ;;  %903 = vmatpush.bf16.xpose.msrb.mxu1 %v894_v14 }
 0x144   : > { %v1033_v35 = vpop.permute.xlu2 %1032 }
 0x145   : > { %v1038_v40 = vsel %vm807_vm3, %v1033_v35, 0  ;;  %v4414_v35 = vpack.c.b16 %v1422_v32, %v1422_v32 }
 0x148   : > { %v802_v16 = vpop.permute.xlu0 %801 }
 0x149   : > { %3631 = vmatmul.msk.bf16.vlgmr.msra.gmra.mxu3 %vm807_vm3, %v802_v16 }
 0x14d   : > { %3636 = vmatmul.msk.bf16.vlgmr.msra.gmra.mxu2 %vm807_vm3, %v4334_v17 }
 0x14e   : > { %v806_v18 = vpop.permute.xlu1 %805 }
 0x150   : > { %v804_v19 = vpop.permute.xlu0 %803 }
 0x156   : > { %v961_v20 = vpop.permute.xlu1 %960 }
 0x157   : > { %v966_v21 = vsel %vm807_vm3, %v961_v20, 0 }
 0x158   : > { %975 = vmatpush.bf16.xpose.msrb.mxu2 %v966_v21  ;;  %v800_v23 = vpop.permute.xlu0 %799 }
 0x159   : > { %3630 = vmatmul.msk.bf16.vlgmr.msra.gmra.mxu1 %vm807_vm3, %v800_v23  ;;  %3632 = vmatmul.msk.bf16.gmra.mxu3 %vm807_vm3, %v804_v19 }
 0x15e   : > { %v1009_v25 = vpop.permute.xlu1 %1008 }
 0x15f   : > { %3638 = vmatmul.msk.bf16.vlgmr.msrb.gmra.mxu2 %vm807_vm3, %v4342_v24  ;;  %v1014_v26 = vsel %vm807_vm3, %v1009_v25, 0 }
 0x160   : > { %1023 = vmatpush.bf16.xpose.msra.mxu2 %v1014_v26  ;;  %v985_v27 = vpop.permute.xlu0 %984 }
 0x161   : > { %v990_v29 = vsel %vm807_vm3, %v985_v27, 0  ;;  %v4404_v27 = vpack.c.b16 %v1370_v22, %v1370_v22 }
 0x162   : > { %999 = vmatpush.bf16.xpose.msra.mxu3 %v990_v29 }
 0x169   : > { %3633 = vmatmul.msk.bf16.gmra.mxu3 %vm807_vm3, %v806_v18  ;;  %3635 = vmatmul.msk.bf16.vlgmr.msrb.gmra.mxu1 %vm807_vm3, %v776_v31 }
 0x16f   : > { %3640 = vmatmul.msk.bf16.vlgmr.msra.gmra.mxu2 %vm807_vm3, %v4352_v33 }
 0x179   : > { %3637 = vmatmul.msk.bf16.vlgmr.msrb.gmra.mxu3 %vm807_vm3, %v4357_v37 }
 0x17a   : > { %1047 = vmatpush.bf16.xpose.msrb.mxu3 %v1038_v40 }
 0x189   : > { %3639 = vmatmul.msk.bf16.vlgmr.msra.gmra.mxu3 %vm807_vm3, %v4363_v42 }
 0x199   : > { %3641 = vmatmul.msk.bf16.vlgmr.msrb.gmra.mxu3 %vm807_vm3, %v4368_v44 }
 0x1c0   : > { %v4372_v38 = vpop.f32.mrf.mxu2 }
 0x1c1   : > { %v1053_v46 = vsel %vm807_vm3, %v4372_v38, -inf }
 0x1c2   : > { %1054 = vmax.xlane.f32.xlu2 %v1053_v46  ;;  %v1448_v46 = vunpack.c.l.b16 %v4357_v37 }
 0x1c4   : > { %v4425_v17 = vpack.c.b16 %v1448_v46, %v1448_v46 }
 0x1c8   : > { %v883_v47 = vpop.f32.mrf.mxu2 }
 0x1cc   : > { %v838_v45 = vpop.f32.mrf.mxu3 }
 0x1cd   : > { %v855_v50 = vpack.c.bf16 %v838_v45, %v838_v45 }
 0x1cf   : > { %v1183_v53 = vsel %vm820_vm2, %v855_v50, 0 }
 0x1d0   : > { %v4377_v54 = vpop.f32.mrf.mxu2  ;;  %1192 = vmatpush.bf16.msrb.mxu2 %v1183_v53 }
 0x1d1   : > { %v1059_v49 = vsel %vm807_vm3, %v4377_v54, -inf }
 0x1d2   : > { %1060 = vmax.xlane.f32.xlu1 %v1059_v49 }
 0x1d4   : > { %v840_v55 = vpop.f32.mrf.mxu3 }
 0x1d5   : > { %v856_v57 = vpack.c.bf16 %v840_v55, %v840_v55 }
 0x1d6   : > { %v833_v59 = vpop.f32.mrf.mxu1 }
 0x1d7   : > { %v853_v60 = vpack.c.bf16 %v833_v59, %v833_v59  ;;  %v1202_v1 = vsel %vm820_vm2, %v856_v57, 0 }
 0x1d8   : > { %v931_v62 = vpop.f32.mrf.mxu2  ;;  %1211 = vmatpush.bf16.msra.mxu3 %v1202_v1 }
 0x1d9   : > { %v1145_v3 = vsel %vm820_vm2, %v853_v60, 0  ;;  %v1474_v60 = vunpack.c.l.b16 %v4342_v24 }
 0x1da   : > { %1426 = vrot.lane.b32.xlu2 %v4249_v36, %s4031_s25  ;;  %1154 = vmatpush.bf16.msra.mxu1 %v1145_v3 }
 0x1db   : > { %v4445_v3 = vpack.c.b16 %v1474_v60, %v1474_v60 }
 0x1dc   : > { %v843_v5 = vpop.f32.mrf.mxu3 }
 0x1dd   : > { %v857_v6 = vpack.c.bf16 %v843_v5, %v843_v5 }
 0x1de   : > { %v835_v7 = vpop.f32.mrf.mxu1 }
 0x1df   : > { %v1221_v8 = vsel %vm820_vm2, %v857_v6, 0  ;;  %v854_v9 = vpack.c.bf16 %v835_v7, %v835_v7 }
 0x1e0   : > { %1230 = vmatpush.bf16.msrb.mxu1 %v1221_v8  ;;  %v1500_v8 = vunpack.c.l.b16 %v4363_v42  ;;  %v1552_v42 = vunpack.c.l.b16 %v4368_v44 }
 0x1e1   : > { %v1164_v11 = vsel %vm820_vm2, %v854_v9, 0 }
 0x1e2   : > { %1398 = vrot.lane.b32.xlu2 %v4386_v10, %s4032_s19  ;;  %v4391_v13 = vpop.f32.mrf.mxu2  ;;  %1173 = vmatpush.bf16.msrb.mxu0 %v1164_v11  ;;  %v4465_v11 = vpack.c.b16 %v1500_v8, %v1500_v8 }
 0x1e3   : > { %v1065_v55 = vsel %vm807_vm3, %v4391_v13, -inf }
 0x1e4   : > { %v845_v14 = vpop.f32.mrf.mxu3 }
 0x1e5   : > { %v858_v15 = vpack.c.bf16 %v845_v14, %v845_v14 }
 0x1e6   : > { %v4393_v16 = vpop.f32.mrf.mxu1 }
 0x1e7   : > { %v1056_v18 = vsel %vm807_vm3, %v4393_v16, -inf  ;;  %v1240_v19 = vsel %vm820_vm2, %v858_v15, 0  ;;  %v4478_v15 = vpack.c.b16 %v1552_v42, %v1552_v42 }
 0x1e8   : > { %1057 = vmax.xlane.f32.xlu0 %v1056_v18  ;;  %1249 = vmatpush.bf16.msra.mxu0 %v1240_v19 }
 0x1ea   : > { %1452 = vrot.lane.b32.xlu2 %v4272_v48, %s4031_s25  ;;  %v979_v20 = vpop.f32.mrf.mxu2 }
 0x1eb   : > { %1400 = vrot.lane.b32.xlu1 %v4292_v56, %s4031_s25 }
 0x1ec   : > { %v848_v21 = vpop.f32.mrf.mxu3 }
 0x1ed   : > { %v859_v23 = vpack.c.bf16 %v848_v21, %v848_v21 }
 0x1ee   : > { %v907_v25 = vpop.f32.mrf.mxu1 }
 0x1ef   : > { %v1259_v26 = vsel %vm820_vm2, %v859_v23, 0 }
 0x1f0   : > { %1268 = vmatpush.bf16.msra.mxu2 %v1259_v26 }
 0x1f2   : > { %v4406_v29 = vpop.f32.mrf.mxu2 }
 0x1f3   : > { %1372 = vrot.lane.b32.xlu1 %v4404_v27, %s4032_s19  ;;  %v1071_v30 = vsel %vm807_vm3, %v4406_v29, -inf }
 0x1f4   : > { %1072 = vmax.xlane.f32.xlu0 %v1071_v30  ;;  %v850_v31 = vpop.f32.mrf.mxu3 }
 0x1f5   : > { %v860_v12 = vpack.c.bf16 %v850_v31, %v850_v31 }
 0x1f7   : > { %v1278_v34 = vsel %vm820_vm2, %v860_v12, 0 }
 0x1f8   : > { %1287 = vmatpush.bf16.msrb.mxu3 %v1278_v34 }
 0x1fa   : > { %v1027_v40 = vpop.f32.mrf.mxu2 }
 0x1fb   : > { %1424 = vrot.lane.b32.xlu1 %v4414_v35, %s4032_s19 }
 0x1fc   : > { %v4418_v39 = vpop.f32.mrf.mxu3 }
 0x1fd   : > { %v1062_v45 = vsel %vm807_vm3, %v4418_v39, -inf }
 0x203   : > { %1478 = vrot.lane.b32.xlu1 %v4296_v58, %s4031_s25 }
 0x204   : > { %v955_v43 = vpop.f32.mrf.mxu3 }
 0x208   : > { %1374 = vrot.lane.b32.xlu0 %v4241_v28, %s4031_s25 }
 0x20b   : > { %1450 = vrot.lane.b32.xlu1 %v4425_v17, %s4032_s19 }
 0x20c   : > { %v4429_v47 = vpop.f32.mrf.mxu3 }
 0x20d   : > { %v1068_v53 = vsel %vm807_vm3, %v4429_v47, -inf }
 0x213   : > { %1063 = vmax.xlane.f32.xlu2 %v1062_v45 }
 0x214   : > { %v1003_v50 = vpop.f32.mrf.mxu3 }
 0x21b   : > { %1069 = vmax.xlane.f32.xlu2 %v1068_v53 }
 0x21c   : > { %v4435_v37 = vpop.f32.mrf.mxu3 }
 0x21d   : > { %v1074_v57 = vsel %vm807_vm3, %v4435_v37, -inf }
 0x224   : > { %v1051_v49 = vpop.f32.mrf.mxu3 }
 0x232   : > { %1066 = vmax.xlane.f32.xlu0 %v1065_v55 }
 0x233   : > { %1504 = vrot.lane.b32.xlu2 %v4317_v2, %s4031_s25 }
 0x235   : > { %v1055_v59 = vpop.xlane.xlu2 %1054  ;;  %1075 = vmax.xlane.f32.xlu1 %v1074_v57 }
 0x236   : > { %v1077_v62 = vsub.f32 %v4372_v38, %v1055_v59  ;;  %v1526_v38 = vunpack.c.l.b16 %v4352_v33 }
 0x238   : > { %v1085_v1 = vmul.f32 1.442695, %v1077_v62  ;;  %v4461_v9 = vpack.c.b16 %v1526_v38, %v1526_v38 }
 0x23a   : > { %3819 = vpow2.f32 %v1085_v1 }
 0x23b   : > { %1476 = vrot.lane.b32.xlu2 %v4445_v3, %s4032_s19 }
 0x23d   : > { %v1427_v26 = vpop.permute.xlu2 %1426 }
 0x23e   : > { %v1432_v1 = vsel %vm807_vm3, %v1427_v26, 0 }
 0x240   : > { %v4449_v4 = vpop.eup %3819 }
 0x241   : > { %v1133_v5 = vpack.c.bf16 %v4449_v4, %v4449_v4 }
 0x243   : > { %1556 = vrot.lane.b32.xlu2 %v4308_v63, %s4031_s25  ;;  %3642 = vmatmul.msk.bf16.vlgmr.msra.gmra.mxu1 %vm807_vm3, %v1133_v5 }
 0x245   : > { %v1061_v24 = vpop.xlane.xlu1 %1060 }
 0x246   : > { %v1079_v6 = vsub.f32 %v4377_v54, %v1061_v24  ;;  %1530 = vrot.lane.b32.xlu0 %v4311_v0, %s4031_s25  ;;  %s5434_s25 = scalar_lea.vmem %s5395_s6, %s4145_s16 }
 0x248   : > { %v1089_v7 = vmul.f32 1.442695, %v1079_v6 }
 0x24a   : > { %3821 = vpow2.f32 %v1089_v7  ;;  %v684_v7 = vld [vmem:[%s4163_s29 + $0x4] sm:$0xf] }
 0x24b   : > { %1528 = vrot.lane.b32.xlu2 %v4461_v9, %s4032_s19  ;;  %v1330_v8 = vsel %vm820_vm2, %v684_v7, 0 }
 0x24c   : > { %1339 = vmatpush.bf16.msra.mxu1 %v1330_v8 }
 0x24e   : > { %1502 = vrot.lane.b32.xlu1 %v4465_v11, %s4032_s19  ;;  %1315 = vrot.lane.b32.xlu0 %v4280_v51, %s4033_s15 }
 0x250   : > { %v4470_v33 = vpop.eup %3821 }
 0x251   : > { %v1135_v54 = vpack.c.bf16 %v4470_v33, %v4470_v33 }
 0x253   : > { %1311 = vrot.lane.b32.xlu2 %v4261_v41, %s4033_s15  ;;  %3644 = vmatmul.msk.bf16.vlgmr.msrb.gmra.mxu2 %vm807_vm3, %v1135_v54 }
 0x256   : > { %1309 = vrot.lane.b32.xlu1 %v4304_v61, %s4033_s15 }
 0x25b   : > { %v1058_v14 = vpop.xlane.xlu0 %1057 }
 0x25c   : > { %v1078_v18 = vsub.f32 %v4393_v16, %v1058_v14 }
 0x25d   : > { %v1401_v19 = vpop.permute.xlu1 %1400 }
 0x25e   : > { %v1406_v20 = vsel %vm807_vm3, %v1401_v19, 0  ;;  %1554 = vrot.lane.b32.xlu1 %v4478_v15, %s4032_s19  ;;  %v1087_v21 = vmul.f32 1.442695, %v1078_v18 }
 0x25f   : > { %1415 = vmatpush.bf16.xpose.msrb.mxu2 %v1406_v20 }
 0x260   : > { %3823 = vpow2.f32 %v1087_v21 }
 0x265   : > { %v1373_v22 = vpop.permute.xlu1 %1372 }
 0x266   : > { %1313 = vrot.lane.b32.xlu1 %v4286_v52, %s4033_s15  ;;  %v4485_v23 = vpop.eup %3823  ;;  %s5435_s15 = scalar_lea.vmem %s5397_s8, %s4145_s16 }
 0x267   : > { %v1073_v44 = vpop.xlane.xlu0 %1072  ;;  %v1134_v16 = vpack.c.bf16 %v4485_v23, %v4485_v23 }
 0x268   : > { %v1083_v25 = vsub.f32 %v4406_v29, %v1073_v44  ;;  %v1399_v29 = vpop.permute.xlu2 %1398 }
 0x269   : > { %3643 = vmatmul.msk.bf16.vlgmr.msrb.gmra.mxu0 %vm807_vm3, %v1134_v16 }
 0x26a   : > { %v1097_v30 = vmul.f32 1.442695, %v1083_v25 }
 0x26c   : > { %3825 = vpow2.f32 %v1097_v30 }
 0x26d   : > { %v4491_v31 = vpop.permute.xlu1 %1424 }
 0x26e   : > { %1895 = vrot.lane.b32.xlu1 %v4241_v28, %s4034_s23 }
 0x270   : > { %v1453_v45 = vpop.permute.xlu2 %1452 }
 0x272   : > { %v4495_v32 = vpop.eup %3825 }
 0x273   : > { %v1139_v12 = vpack.c.bf16 %v4495_v32, %v4495_v32 }
 0x275   : > { %v1479_v34 = vpop.permute.xlu1 %1478  ;;  %3648 = vmatmul.msk.bf16.vlgmr.msra.gmra.mxu2 %vm807_vm3, %v1139_v12 }
 0x276   : > { %v1484_v40 = vsel %vm807_vm3, %v1479_v34, 0 }
 0x277   : > { %1493 = vmatpush.bf16.xpose.msra.mxu2 %v1484_v40 }
 0x27a   : > { %v1375_v43 = vpop.permute.xlu0 %1374 }
 0x27b   : > { %v1380_v46 = vsel %vm807_vm3, %v1375_v43, 0 }
 0x27c   : > { %1389 = vmatpush.bf16.xpose.msrb.mxu0 %v1380_v46 }
 0x27d   : > { %v1451_v6 = vpop.permute.xlu1 %1450 }
 0x285   : > { %3655 = vmatmul.msk.bf16.vlgmr.msrb.gmra.mxu2 %vm807_vm3, %v1399_v29 }
 0x286   : > { %v1064_v50 = vpop.xlane.xlu2 %1063 }
 0x287   : > { %v1080_v53 = vsub.f32 %v4418_v39, %v1064_v50 }
 0x289   : > { %v1091_v49 = vmul.f32 1.442695, %v1080_v53 }
 0x28b   : > { %3827 = vpow2.f32 %v1091_v49 }
 0x28e   : > { %v1070_v55 = vpop.xlane.xlu2 %1069 }
 0x28f   : > { %v1082_v57 = vsub.f32 %v4429_v47, %v1070_v55  ;;  %v1458_v47 = vsel %vm807_vm3, %v1453_v45, 0 }
 0x291   : > { %v4505_v59 = vpop.eup %3827  ;;  %v1095_v60 = vmul.f32 1.442695, %v1082_v57 }
 0x292   : > { %v1136_v62 = vpack.c.bf16 %v4505_v59, %v4505_v59 }
 0x293   : > { %3829 = vpow2.f32 %v1095_v60 }
 0x294   : > { %3645 = vmatmul.msk.bf16.vlgmr.msra.gmra.mxu3 %vm807_vm3, %v1136_v62 }
 0x295   : > { %1441 = vmatpush.bf16.xpose.msra.mxu3 %v1432_v1 }
 0x296   : > { %v1505_v5 = vpop.permute.xlu2 %1504 }
 0x297   : > { %v1510_v30 = vsel %vm807_vm3, %v1505_v5, 0 }
 0x299   : > { %v4511_v39 = vpop.eup %3829 }
 0x29a   : > { %v1138_v24 = vpack.c.bf16 %v4511_v39, %v4511_v39 }
 0x29c   : > { %3647 = vmatmul.msk.bf16.vlgmr.msra.gmra.mxu0 %vm807_vm3, %v1138_v24 }
 0x29d   : > { %1467 = vmatpush.bf16.xpose.msra.mxu0 %v1458_v47 }
 0x29e   : > { %v1477_v38 = vpop.permute.xlu2 %1476 }
 0x29f   : > { %3658 = vmatmul.msk.bf16.vlgmr.msra.gmra.mxu2 %vm807_vm3, %v1477_v38 }
 0x2a5   : > { %v1067_v54 = vpop.xlane.xlu0 %1066 }
 0x2a6   : > { %v1081_v42 = vsub.f32 %v4391_v13, %v1067_v54  ;;  %v1557_v14 = vpop.permute.xlu2 %1556 }
 0x2a7   : > { %v1562_v18 = vsel %vm807_vm3, %v1557_v14, 0 }
 0x2a8   : > { %v1093_v19 = vmul.f32 1.442695, %v1081_v42  ;;  %v1076_v20 = vpop.xlane.xlu1 %1075  ;;  %1571 = vmatpush.bf16.xpose.msrb.mxu2 %v1562_v18 }
 0x2a9   : > { %v1084_v21 = vsub.f32 %v4435_v37, %v1076_v20 }
 0x2aa   : > { %3831 = vpow2.f32 %v1093_v19 }
 0x2ab   : > { %v1099_v44 = vmul.f32 1.442695, %v1084_v21 }
 0x2ac   : > { %3654 = vmatmul.msk.bf16.vlgmr.msrb.gmra.mxu0 %vm807_vm3, %v1373_v22 }
 0x2ad   : > { %3833 = vpow2.f32 %v1099_v44 }
 0x2ae   : > { %v1529_v43 = vpop.permute.xlu2 %1528 }
 0x2b0   : > { %v4524_v25 = vpop.eup %3831 }
 0x2b1   : > { %v1137_v16 = vpack.c.bf16 %v4524_v25, %v4524_v25 }
 0x2b3   : > { %v4528_v26 = vpop.eup %3833  ;;  %3646 = vmatmul.msk.bf16.vlgmr.msrb.gmra.mxu1 %vm807_vm3, %v1137_v16 }
 0x2b4   : > { %v1140_v13 = vpack.c.bf16 %v4528_v26, %v4528_v26 }
 0x2b6   : > { %3649 = vmatmul.msk.bf16.vlgmr.msrb.gmra.mxu3 %vm807_vm3, %v1140_v13  ;;  %v1312_v50 = vpop.permute.xlu2 %1311 }
 0x2b7   : > { %1519 = vmatpush.bf16.xpose.msrb.mxu3 %v1510_v30 }
 0x2b8   : > { %v1531_v37 = vpop.permute.xlu0 %1530 }
 0x2b9   : > { %v1536_v22 = vsel %vm807_vm3, %v1531_v37, 0 }
 0x2ba   : > { %1545 = vmatpush.bf16.xpose.msrb.mxu0 %v1536_v22 }
 0x2bc   : > { %3657 = vmatmul.msk.bf16.vlgmr.msra.gmra.mxu0 %vm807_vm3, %v1451_v6 }
 0x2c0   : > { %v4537_v12 = vpop.f32.mrf.mxu1  ;;  %v1503_v29 = vpop.permute.xlu1 %1502 }
 0x2c1   : > { %v1316_v57 = vpop.permute.xlu0 %1315 }
 0x2c6   : > { %3656 = vmatmul.msk.bf16.vlgmr.msra.gmra.mxu3 %vm807_vm3, %v4491_v31 }
 0x2c8   : > { %v1158_v34 = vpop.f32.mrf.mxu1  ;;  %v1310_v40 = vpop.permute.xlu1 %1309 }
 0x2c9   : > { %3650 = vmatmul.msk.bf16.vlgmr.msra.gmra.mxu1 %vm807_vm3, %v1310_v40 }
 0x2cc   : > { %3660 = vmatmul.msk.bf16.vlgmr.msrb.gmra.mxu0 %vm807_vm3, %v1529_v43 }
 0x2d0   : > { %v1555_v46 = vpop.permute.xlu1 %1554 }
 0x2d1   : > { %3661 = vmatmul.msk.bf16.vlgmr.msrb.gmra.mxu2 %vm807_vm3, %v1555_v46 }
 0x2d6   : > { %v4544_v45 = vpop.f32.mrf.mxu2  ;;  %3659 = vmatmul.msk.bf16.vlgmr.msrb.gmra.mxu3 %vm807_vm3, %v1503_v29 }
 0x2d8   : > { %v1314_v31 = vpop.permute.xlu1 %1313 }
 0x2d9   : > { %3651 = vmatmul.msk.bf16.gmra.mxu1 %vm807_vm3, %v1312_v50 }
 0x2de   : > { %v1196_v53 = vpop.f32.mrf.mxu2 }
 0x2e6   : > { %v4548_v49 = vpop.f32.mrf.mxu0 }
 0x2e9   : > { %3652 = vmatmul.msk.bf16.gmra.mxu1 %vm807_vm3, %v1314_v31 }
 0x2ee   : > { %v1177_v55 = vpop.f32.mrf.mxu0 }
 0x2f8   : > { %v4551_v60 = vpop.f32.mrf.mxu2 }
 0x2f9   : > { %3653 = vmatmul.msk.bf16.gmra.mxu1 %vm807_vm3, %v1316_v57 }
 0x300   : > { %v1272_v62 = vpop.f32.mrf.mxu2 }
 0x308   : > { %v4554_v1 = vpop.f32.mrf.mxu2 }
 0x309   : > { %v1580_v5 = vsel %vm807_vm3, %v4554_v1, -inf }
 0x30a   : > { %1581 = vmax.xlane.f32.xlu1 %v1580_v5 }
 0x310   : > { %v1419_v24 = vpop.f32.mrf.mxu2 }
 0x317   : > { %v4558_v47 = vpop.f32.mrf.mxu3 }
 0x319   : > { %v4560_v38 = vpop.f32.mrf.mxu0 }
 0x31f   : > { %v1215_v6 = vpop.f32.mrf.mxu3 }
 0x321   : > { %v1253_v7 = vpop.f32.mrf.mxu0 }
 0x322   : > { %v4562_v8 = vpop.f32.mrf.mxu2 }
 0x323   : > { %1941 = vrot.lane.b32.xlu1 %v4249_v36, %s4034_s23 }
 0x329   : > { %v4566_v54 = vpop.f32.mrf.mxu0 }
 0x32a   : > { %v1497_v42 = vpop.f32.mrf.mxu2  ;;  %v1577_v14 = vsel %vm807_vm3, %v4566_v54, -inf }
 0x32b   : > { %1578 = vmax.xlane.f32.xlu2 %v1577_v14  ;;  %1964 = vrot.lane.b32.xlu1 %v4272_v48, %s4034_s23 }
 0x330   : > { %v4572_v18 = vpop.f32.mrf.mxu1 }
 0x331   : > { %v1393_v19 = vpop.f32.mrf.mxu0 }
 0x333   : > { %1987 = vrot.lane.b32.xlu1 %v4296_v58, %s4034_s23 }
 0x338   : > { %v1234_v20 = vpop.f32.mrf.mxu1 }
 0x339   : > { %v4576_v21 = vpop.f32.mrf.mxu3  ;;  %v4578_v44 = vpop.f32.mrf.mxu0 }
 0x33a   : > { %5428 = vst [vmem:[#allocation8_spill] sm:$0xff] %v4576_v21  ;;  %v1586_v19 = vsel %vm807_vm3, %v4578_v44, -inf }
 0x341   : > { %v1291_v16 = vpop.f32.mrf.mxu3  ;;  %v1471_v13 = vpop.f32.mrf.mxu0 }
 0x346   : > { %v1341_v30 = vpop.f32.mrf.mxu1 }
 0x347   : > { %v1361_v37 = vpack.c.bf16 %v1341_v30, %v1341_v30 }
 0x349   : > { %v1669_v22 = vsel %vm820_vm2, %v1361_v37, 0  ;;  %v4581_v29 = vpop.f32.mrf.mxu3  ;;  %v4583_v34 = vpop.f32.mrf.mxu0 }
 0x34a   : > { %1678 = vmatpush.bf16.msra.mxu3 %v1669_v22  ;;  %v1583_v40 = vsel %vm807_vm3, %v4581_v29, -inf  ;;  %v1595_v55 = vsel %vm807_vm3, %v4583_v34, -inf }
 0x34b   : > { %1584 = vmax.xlane.f32.xlu0 %v1583_v40 }
 0x34e   : > { %v1343_v43 = vpop.f32.mrf.mxu1 }
 0x34f   : > { %v1362_v46 = vpack.c.bf16 %v1343_v43, %v1343_v43 }
 0x351   : > { %v1445_v50 = vpop.f32.mrf.mxu3  ;;  %v1549_v53 = vpop.f32.mrf.mxu0  ;;  %v1688_v31 = vsel %vm820_vm2, %v1362_v46, 0 }
 0x352   : > { %1697 = vmatpush.bf16.msra.mxu0 %v1688_v31  ;;  %v1896_v53 = vpop.permute.xlu1 %1895 }
 0x353   : > { %1596 = vmax.xlane.f32.xlu0 %v1595_v55 }
 0x354   : > { %v4590_v57 = vpop.f32.mrf.mxu2 }
 0x355   : > { %v1598_v62 = vsel %vm807_vm3, %v4590_v57, -inf }
 0x356   : > { %v1346_v5 = vpop.f32.mrf.mxu1  ;;  %1599 = vmax.xlane.f32.xlu2 %v1598_v62 }
 0x357   : > { %v1363_v24 = vpack.c.bf16 %v1346_v5, %v1346_v5 }
 0x359   : > { %v1707_v6 = vsel %vm820_vm2, %v1363_v24, 0  ;;  %v4595_v7 = vpop.f32.mrf.mxu3 }
 0x35a   : > { %1716 = vmatpush.bf16.msra.mxu2 %v1707_v6  ;;  %v1592_v14 = vsel %vm807_vm3, %v4595_v7, -inf }
 0x35c   : > { %v1575_v42 = vpop.f32.mrf.mxu2 }
 0x35d   : > { %1593 = vmax.xlane.f32.xlu1 %v1592_v14  ;;  %v1901_v14 = vsel %vm807_vm3, %v1896_v53, 0 }
 0x35e   : > { %v1348_v20 = vpop.f32.mrf.mxu1  ;;  %1587 = vmax.xlane.f32.xlu2 %v1586_v19  ;;  %v1589_v19 = vsel %vm807_vm3, %v4562_v8, -inf }
 0x35f   : > { %v1364_v16 = vpack.c.bf16 %v1348_v20, %v1348_v20 }
 0x361   : > { %v1523_v13 = vpop.f32.mrf.mxu3  ;;  %v1726_v30 = vsel %vm820_vm2, %v1364_v16, 0 }
 0x362   : > { %1735 = vmatpush.bf16.msrb.mxu3 %v1726_v30 }
 0x366   : > { %v1351_v37 = vpop.f32.mrf.mxu1 }
 0x367   : > { %v1365_v22 = vpack.c.bf16 %v1351_v37, %v1351_v37  ;;  %1918 = vrot.lane.b32.xlu0 %v4292_v56, %s4034_s23 }
 0x369   : > { %v1745_v40 = vsel %vm820_vm2, %v1365_v22, 0 }
 0x36a   : > { %1754 = vmatpush.bf16.msrb.mxu1 %v1745_v40 }
 0x36e   : > { %v1353_v43 = vpop.f32.mrf.mxu1 }
 0x36f   : > { %v1366_v46 = vpack.c.bf16 %v1353_v43, %v1353_v43 }
 0x371   : > { %v1764_v50 = vsel %vm820_vm2, %v1366_v46, 0 }
 0x372   : > { %1773 = vmatpush.bf16.msrb.mxu0 %v1764_v50 }
 0x376   : > { %v1356_v31 = vpop.f32.mrf.mxu1  ;;  %2010 = vrot.lane.b32.xlu1 %v4317_v2, %s4034_s23  ;;  %1893 = vrot.lane.b32.xlu2 %v4404_v27, %s4035_s17 }
 0x377   : > { %v1367_v55 = vpack.c.bf16 %v1356_v31, %v1356_v31 }
 0x379   : > { %v1783_v62 = vsel %vm820_vm2, %v1367_v55, 0 }
 0x37a   : > { %1792 = vmatpush.bf16.msrb.mxu2 %v1783_v62 }
 0x37d   : > { %v1582_v5 = vpop.xlane.xlu1 %1581 }
 0x37e   : > { %v1602_v24 = vsub.f32 %v4554_v1, %v1582_v5  ;;  %2033 = vrot.lane.b32.xlu1 %v4311_v0, %s4034_s23  ;;  %1916 = vrot.lane.b32.xlu2 %v4386_v10, %s4035_s17  ;;  %v1358_v30 = vpop.f32.mrf.mxu1 }
 0x37f   : > { %v1368_v37 = vpack.c.bf16 %v1358_v30, %v1358_v30 }
 0x380   : > { %v1611_v6 = vmul.f32 1.442695, %v1602_v24 }
 0x381   : > { %v1802_v40 = vsel %vm820_vm2, %v1368_v37, 0 }
 0x382   : > { %3835 = vpow2.f32 %v1611_v6 }
 0x386   : > { %1833 = vrot.lane.b32.xlu1 %v4304_v61, %s4036_s14  ;;  %1939 = vrot.lane.b32.xlu2 %v4414_v35, %s4035_s17 }
 0x388   : > { %v4620_v42 = vpop.eup %3835 }
 0x389   : > { %v1658_v1 = vpack.c.bf16 %v4620_v42, %v4620_v42 }
 0x38b   : > { %3663 = vmatmul.msk.bf16.vlgmr.msra.gmra.mxu0 %vm807_vm3, %v1658_v1 }
 0x38c   : > { %1910 = vmatpush.bf16.xpose.msra.mxu0 %v1901_v14 }
 0x38e   : > { %2054 = vrot.lane.b32.xlu1 %v4478_v15, %s4035_s17  ;;  %1962 = vrot.lane.b32.xlu2 %v4425_v17, %s4035_s17 }
 0x391   : > { %1590 = vmax.xlane.f32.xlu0 %v1589_v19 }
 0x396   : > { %1837 = vrot.lane.b32.xlu1 %v4286_v52, %s4036_s14  ;;  %1985 = vrot.lane.b32.xlu2 %v4445_v3, %s4035_s17 }
 0x39e   : > { %v1579_v20 = vpop.xlane.xlu2 %1578  ;;  %2395 = vrot.lane.b32.xlu1 %v4241_v28, %s4037_s27  ;;  %2008 = vrot.lane.b32.xlu2 %v4465_v11, %s4035_s17 }
 0x39f   : > { %v1601_v16 = vsub.f32 %v4566_v54, %v1579_v20  ;;  %v1942_v54 = vpop.permute.xlu1 %1941 }
 0x3a1   : > { %v1609_v13 = vmul.f32 1.442695, %v1601_v16 }
 0x3a3   : > { %3837 = vpow2.f32 %v1609_v13 }
 0x3a5   : > { %2056 = vrot.lane.b32.xlu0 %v4308_v63, %s4034_s23 }
 0x3a6   : > { %2031 = vrot.lane.b32.xlu2 %v4461_v9, %s4035_s17 }
 0x3a7   : > { %v1965_v43 = vpop.permute.xlu1 %1964 }
 0x3a9   : > { %v4645_v22 = vpop.eup %3837 }
 0x3aa   : > { %v1657_v28 = vpack.c.bf16 %v4645_v22, %v4645_v22 }
 0x3ac   : > { %3662 = vmatmul.msk.bf16.vlgmr.msra.gmra.mxu3 %vm807_vm3, %v1657_v28 }
 0x3ad   : > { %1811 = vmatpush.bf16.msra.mxu3 %v1802_v40  ;;  %1839 = vrot.lane.b32.xlu0 %v4280_v51, %s4036_s14 }
 0x3ae   : > { %1835 = vrot.lane.b32.xlu2 %v4261_v41, %s4036_s14 }
 0x3af   : > { %v1988_v55 = vpop.permute.xlu1 %1987 }
 0x3b5   : > { %2418 = vrot.lane.b32.xlu0 %v4292_v56, %s4037_s27 }
 0x3b6   : > { %2393 = vrot.lane.b32.xlu2 %v4404_v27, %s4038_s28 }
 0x3be   : > { %v1585_v46 = vpop.xlane.xlu0 %1584 }
 0x3bf   : > { %v1603_v50 = vsub.f32 %v4581_v29, %v1585_v46 }
 0x3c1   : > { %v1613_v53 = vmul.f32 1.442695, %v1603_v50 }
 0x3c3   : > { %3839 = vpow2.f32 %v1613_v53  ;;  %v1970_v53 = vsel %vm807_vm3, %v1965_v43, 0 }
 0x3c6   : > { %v1597_v31 = vpop.xlane.xlu0 %1596 }
 0x3c7   : > { %v1607_v5 = vsub.f32 %v4583_v34, %v1597_v31  ;;  %v1947_v31 = vsel %vm807_vm3, %v1942_v54, 0 }
 0x3c9   : > { %v4660_v62 = vpop.eup %3839  ;;  %v1600_v24 = vpop.xlane.xlu2 %1599  ;;  %v1621_v6 = vmul.f32 1.442695, %v1607_v5 }
 0x3ca   : > { %v1659_v56 = vpack.c.bf16 %v4660_v62, %v4660_v62  ;;  %v1608_v40 = vsub.f32 %v4590_v57, %v1600_v24 }
 0x3cb   : > { %3841 = vpow2.f32 %v1621_v6 }
 0x3cc   : > { %3664 = vmatmul.msk.bf16.vlgmr.msra.gmra.mxu2 %vm807_vm3, %v1659_v56 }
 0x3d0   : > { %v1594_v27 = vpop.xlane.xlu1 %1593 }
 0x3d1   : > { %v1606_v1 = vsub.f32 %v4595_v7, %v1594_v27  ;;  %v1588_v29 = vpop.xlane.xlu2 %1587  ;;  %v4668_v16 = vpop.eup %3841 }
 0x3d2   : > { %v1604_v14 = vsub.f32 %v4578_v44, %v1588_v29  ;;  %v1663_v30 = vpack.c.bf16 %v4668_v16, %v4668_v16  ;;  %v1993_v44 = vsel %vm807_vm3, %v1988_v55, 0  ;;  %v1623_v55 = vmul.f32 1.442695, %v1608_v40 }
 0x3d3   : > { %v1619_v19 = vmul.f32 1.442695, %v1606_v1 }
 0x3d4   : > { %v1615_v20 = vmul.f32 1.442695, %v1604_v14  ;;  %v685_v14 = vld [vmem:[%s4163_s29 + $0x8] sm:$0xf] }
 0x3d5   : > { %3843 = vpow2.f32 %v1619_v19  ;;  %v1854_v19 = vsel %vm820_vm2, %v685_v14, 0 }
 0x3d6   : > { %3845 = vpow2.f32 %v1615_v20  ;;  %1863 = vmatpush.bf16.msra.mxu1 %v1854_v19 }
 0x3d7   : > { %3847 = vpow2.f32 %v1623_v55 }
 0x3d9   : > { %v1919_v34 = vpop.permute.xlu0 %1918  ;;  %v1894_v13 = vpop.permute.xlu2 %1893 }
 0x3da   : > { %v1924_v37 = vsel %vm807_vm3, %v1919_v34, 0 }
 0x3db   : > { %v4673_v28 = vpop.eup %3843  ;;  %1933 = vmatpush.bf16.xpose.msra.mxu2 %v1924_v37 }
 0x3dc   : > { %v4675_v7 = vpop.eup %3845  ;;  %v1662_v46 = vpack.c.bf16 %v4673_v28, %v4673_v28  ;;  %3668 = vmatmul.msk.bf16.vlgmr.msrb.gmra.mxu2 %vm807_vm3, %v1663_v30 }
 0x3dd   : > { %v1660_v50 = vpack.c.bf16 %v4675_v7, %v4675_v7  ;;  %v4688_v56 = vpop.eup %3847 }
 0x3de   : > { %3667 = vmatmul.msk.bf16.vlgmr.msrb.gmra.mxu0 %vm807_vm3, %v1662_v46  ;;  %v1664_v43 = vpack.c.bf16 %v4688_v56, %v4688_v56 }
 0x3df   : > { %1979 = vmatpush.bf16.xpose.msrb.mxu0 %v1970_v53  ;;  %3665 = vmatmul.msk.bf16.vlgmr.msrb.gmra.mxu3 %vm807_vm3, %v1660_v50 }
 0x3e0   : > { %1956 = vmatpush.bf16.xpose.msrb.mxu3 %v1947_v31 }
 0x3e1   : > { %v1917_v57 = vpop.permute.xlu2 %1916 }
 0x3e3   : > { %2002 = vmatpush.bf16.xpose.msrb.mxu2 %v1993_v44 }
 0x3e8   : > { %v2011_v5 = vpop.permute.xlu1 %2010 }
 0x3e9   : > { %v1940_v24 = vpop.permute.xlu2 %1939  ;;  %v2016_v54 = vsel %vm807_vm3, %v2011_v5, 0 }
 0x3ec   : > { %3675 = vmatmul.msk.bf16.vlgmr.msra.gmra.mxu2 %vm807_vm3, %v1917_v57 }
 0x3ee   : > { %3674 = vmatmul.msk.bf16.vlgmr.msra.gmra.mxu0 %vm807_vm3, %v1894_v13 }
 0x3ef   : > { %3669 = vmatmul.msk.bf16.vlgmr.msra.gmra.mxu3 %vm807_vm3, %v1664_v43 }
 0x3f0   : > { %2025 = vmatpush.bf16.xpose.msra.mxu3 %v2016_v54  ;;  %v2034_v6 = vpop.permute.xlu1 %2033 }
 0x3f1   : > { %v2039_v27 = vsel %vm807_vm3, %v2034_v6, 0  ;;  %v1963_v1 = vpop.permute.xlu2 %1962 }
 0x3f2   : > { %2048 = vmatpush.bf16.xpose.msra.mxu0 %v2039_v27 }
 0x3f8   : > { %v1834_v53 = vpop.permute.xlu1 %1833 }
 0x3f9   : > { %v1986_v29 = vpop.permute.xlu2 %1985 }
 0x3fc   : > { %3678 = vmatmul.msk.bf16.vlgmr.msrb.gmra.mxu2 %vm807_vm3, %v1986_v29 }
 0x3fe   : > { %3677 = vmatmul.msk.bf16.vlgmr.msrb.gmra.mxu0 %vm807_vm3, %v1963_v1 }
 0x3ff   : > { %3676 = vmatmul.msk.bf16.vlgmr.msrb.gmra.mxu3 %vm807_vm3, %v1940_v24 }
 0x400   : > { %v2055_v55 = vpop.permute.xlu1 %2054 }
 0x401   : > { %v2009_v20 = vpop.permute.xlu2 %2008 }
 0x404   : > { %v1591_v34 = vpop.xlane.xlu0 %1590 }
 0x405   : > { %v1605_v13 = vsub.f32 %v4562_v8, %v1591_v34 }
 0x407   : > { %v1617_v30 = vmul.f32 1.442695, %v1605_v13 }
 0x408   : > { %v4703_v37 = vpop.f32.mrf.mxu0  ;;  %v1838_v43 = vpop.permute.xlu1 %1837 }
 0x409   : > { %3849 = vpow2.f32 %v1617_v30  ;;  %v2032_v44 = vpop.permute.xlu2 %2031 }
 0x40e   : > { %3680 = vmatmul.msk.bf16.vlgmr.msra.gmra.mxu0 %vm807_vm3, %v2032_v44 }
 0x40f   : > { %v4706_v40 = vpop.eup %3849  ;;  %3679 = vmatmul.msk.bf16.vlgmr.msra.gmra.mxu3 %vm807_vm3, %v2009_v20 }
 0x410   : > { %v1661_v46 = vpack.c.bf16 %v4706_v40, %v4706_v40  ;;  %v1701_v50 = vpop.f32.mrf.mxu0 }
 0x411   : > { %v1836_v5 = vpop.permute.xlu2 %1835 }
 0x412   : > { %3666 = vmatmul.msk.bf16.vlgmr.msrb.gmra.mxu1 %vm807_vm3, %v1661_v46 }
 0x417   : > { %v2057_v31 = vpop.permute.xlu0 %2056 }
 0x418   : > { %v2062_v8 = vsel %vm807_vm3, %v2057_v31, 0 }
 0x419   : > { %2071 = vmatpush.bf16.xpose.msra.mxu2 %v2062_v8 }
 0x41f   : > { %v1840_v6 = vpop.permute.xlu0 %1839 }
 0x420   : > { %3681 = vmatmul.msk.bf16.vlgmr.msra.gmra.mxu2 %vm807_vm3, %v2055_v55 }
 0x422   : > { %3670 = vmatmul.msk.bf16.vlgmr.msra.gmra.mxu1 %vm807_vm3, %v1834_v53 }
 0x42f   : > { %v4715_v57 = vpop.f32.mrf.mxu3 }
 0x432   : > { %3671 = vmatmul.msk.bf16.gmra.mxu1 %vm807_vm3, %v1836_v5 }
 0x437   : > { %v1682_v24 = vpop.f32.mrf.mxu3 }
 0x442   : > { %3672 = vmatmul.msk.bf16.gmra.mxu1 %vm807_vm3, %v1838_v43 }
 0x44f   : > { %v4719_v54 = vpop.f32.mrf.mxu2 }
 0x452   : > { %3673 = vmatmul.msk.bf16.gmra.mxu1 %vm807_vm3, %v1840_v6 }
 0x457   : > { %v1720_v27 = vpop.f32.mrf.mxu2 }
 0x45b   : > { %v4722_v1 = vpop.f32.mrf.mxu0 }
 0x45f   : > { %v4724_v29 = vpop.f32.mrf.mxu2 }
 0x462   : > { %v4726_v14 = vpop.f32.mrf.mxu3 }
 0x463   : > { %v1777_v19 = vpop.f32.mrf.mxu0 }
 0x467   : > { %v1796_v20 = vpop.f32.mrf.mxu2 }
 0x46a   : > { %v1739_v34 = vpop.f32.mrf.mxu3 }
 0x46b   : > { %v4728_v13 = vpop.f32.mrf.mxu0 }
 0x46c   : > { %v2077_v30 = vsel %vm807_vm3, %v4728_v13, -inf }
 0x46d   : > { %2078 = vmax.xlane.f32.xlu2 %v2077_v30 }
 0x46f   : > { %v4732_v44 = vpop.f32.mrf.mxu2 }
 0x470   : > { %v2080_v46 = vsel %vm807_vm3, %v4732_v44, -inf }
 0x471   : > { %2081 = vmax.xlane.f32.xlu1 %v2080_v46 }
 0x472   : > { %v4736_v50 = vpop.f32.mrf.mxu3 }
 0x473   : > { %v1914_v53 = vpop.f32.mrf.mxu0 }
 0x477   : > { %v1937_v31 = vpop.f32.mrf.mxu2 }
 0x47a   : > { %v1815_v8 = vpop.f32.mrf.mxu3 }
 0x47b   : > { %v4738_v55 = vpop.f32.mrf.mxu0 }
 0x47c   : > { %v2086_v5 = vsel %vm807_vm3, %v4738_v55, -inf }
 0x47d   : > { %2087 = vmax.xlane.f32.xlu2 %v2086_v5 }
 0x47f   : > { %v4742_v24 = vpop.f32.mrf.mxu2 }
 0x482   : > { %v4744_v43 = vpop.f32.mrf.mxu3 }
 0x483   : > { %v1983_v6 = vpop.f32.mrf.mxu0  ;;  %v2083_v27 = vsel %vm807_vm3, %v4744_v43, -inf }
 0x484   : > { %2084 = vmax.xlane.f32.xlu0 %v2083_v27 }
 0x487   : > { %v2006_v19 = vpop.f32.mrf.mxu2 }
 0x48a   : > { %v1960_v20 = vpop.f32.mrf.mxu3 }
 0x48b   : > { %v4748_v34 = vpop.f32.mrf.mxu0 }
 0x48c   : > { %v2095_v30 = vsel %vm807_vm3, %v4748_v34, -inf }
 0x48d   : > { %2096 = vmax.xlane.f32.xlu0 %v2095_v30 }
 0x48f   : > { %v4752_v46 = vpop.f32.mrf.mxu1 }
 0x492   : > { %v4754_v53 = vpop.f32.mrf.mxu3 }
 0x493   : > { %v2052_v31 = vpop.f32.mrf.mxu0  ;;  %v2092_v8 = vsel %vm807_vm3, %v4754_v53, -inf }
 0x494   : > { %2093 = vmax.xlane.f32.xlu1 %v2092_v8 }
 0x495   : > { %2464 = vrot.lane.b32.xlu2 %v4272_v48, %s4037_s27 }
 0x497   : > { %v1758_v5 = vpop.f32.mrf.mxu1 }
 0x49a   : > { %v2029_v6 = vpop.f32.mrf.mxu3 }
 0x49d   : > { %2462 = vrot.lane.b32.xlu2 %v4425_v17, %s4038_s28 }
 0x49f   : > { %v1865_v27 = vpop.f32.mrf.mxu1 }
 0x4a0   : > { %v1885_v19 = vpack.c.bf16 %v1865_v27, %v1865_v27 }
 0x4a1   : > { %2416 = vrot.lane.b32.xlu0 %v4386_v10, %s4038_s28 }
 0x4a2   : > { %v2169_v20 = vsel %vm820_vm2, %v1885_v19, 0 }
 0x4a3   : > { %v4765_v30 = vpop.f32.mrf.mxu2  ;;  %2178 = vmatpush.bf16.msrb.mxu3 %v2169_v20 }
 0x4a7   : > { %v1867_v31 = vpop.f32.mrf.mxu1 }
 0x4a8   : > { %v1886_v8 = vpack.c.bf16 %v1867_v31, %v1867_v31  ;;  %v2098_v31 = vsel %vm807_vm3, %v4765_v30, -inf }
 0x4aa   : > { %v2188_v21 = vsel %vm820_vm2, %v1886_v8, 0 }
 0x4ab   : > { %v2075_v48 = vpop.f32.mrf.mxu2  ;;  %2197 = vmatpush.bf16.msrb.mxu0 %v2188_v21 }
 0x4ad   : > { %2441 = vrot.lane.b32.xlu1 %v4249_v36, %s4037_s27 }
 0x4af   : > { %v1870_v17 = vpop.f32.mrf.mxu1 }
 0x4b0   : > { %v1887_v5 = vpack.c.bf16 %v1870_v17, %v1870_v17  ;;  %v2089_v17 = vsel %vm807_vm3, %v4742_v24, -inf }
 0x4b2   : > { %v2207_v6 = vsel %vm820_vm2, %v1887_v5, 0 }
 0x4b3   : > { %2216 = vmatpush.bf16.msrb.mxu2 %v2207_v6  ;;  %v4789_v6 = vpop.permute.xlu2 %2393 }
 0x4b5   : > { %2439 = vrot.lane.b32.xlu1 %v4414_v35, %s4038_s28 }
 0x4b7   : > { %v1872_v10 = vpop.f32.mrf.mxu1 }
 0x4b8   : > { %v1888_v27 = vpack.c.bf16 %v1872_v10, %v1872_v10  ;;  %v2396_v10 = vpop.permute.xlu1 %2395 }
 0x4ba   : > { %v2226_v19 = vsel %vm820_vm2, %v1888_v27, 0 }
 0x4bb   : > { %2235 = vmatpush.bf16.msra.mxu3 %v2226_v19 }
 0x4bd   : > { %2487 = vrot.lane.b32.xlu1 %v4296_v58, %s4037_s27 }
 0x4bf   : > { %v1875_v21 = vpop.f32.mrf.mxu1 }
 0x4c0   : > { %v1889_v20 = vpack.c.bf16 %v1875_v21, %v1875_v21 }
 0x4c2   : > { %v2245_v36 = vsel %vm820_vm2, %v1889_v20, 0 }
 0x4c3   : > { %2254 = vmatpush.bf16.msrb.mxu1 %v2245_v36 }
 0x4c5   : > { %2485 = vrot.lane.b32.xlu1 %v4445_v3, %s4038_s28 }
 0x4c6   : > { %2099 = vmax.xlane.f32.xlu2 %v2098_v31 }
 0x4c7   : > { %v1877_v35 = vpop.f32.mrf.mxu1 }
 0x4c8   : > { %v1890_v8 = vpack.c.bf16 %v1877_v35, %v1877_v35 }
 0x4ca   : > { %v2264_v48 = vsel %vm820_vm2, %v1890_v8, 0  ;;  %v2401_v8 = vsel %vm807_vm3, %v2396_v10, 0 }
 0x4cb   : > { %2273 = vmatpush.bf16.msra.mxu0 %v2264_v48  ;;  %2090 = vmax.xlane.f32.xlu0 %v2089_v17 }
 0x4cd   : > { %2556 = vrot.lane.b32.xlu1 %v4308_v63, %s4037_s27 }
 0x4cf   : > { %v1880_v58 = vpop.f32.mrf.mxu1 }
 0x4d0   : > { %v1891_v5 = vpack.c.bf16 %v1880_v58, %v1880_v58 }
 0x4d2   : > { %v2283_v3 = vsel %vm820_vm2, %v1891_v5, 0 }
 0x4d3   : > { %2292 = vmatpush.bf16.msra.mxu2 %v2283_v3 }
 0x4d5   : > { %2533 = vrot.lane.b32.xlu1 %v4311_v0, %s4037_s27 }
 0x4dd   : > { %2335 = vrot.lane.b32.xlu1 %v4261_v41, %s4039_s13  ;;  %v1882_v41 = vpop.f32.mrf.mxu1 }
 0x4de   : > { %2510 = vrot.lane.b32.xlu2 %v4317_v2, %s4037_s27  ;;  %v1892_v2 = vpack.c.bf16 %v1882_v41, %v1882_v41 }
 0x4df   : > { %2531 = vrot.lane.b32.xlu0 %v4461_v9, %s4038_s28 }
 0x4e0   : > { %v2079_v63 = vpop.xlane.xlu2 %2078 }
 0x4e1   : > { %v2101_v27 = vsub.f32 %v4728_v13, %v2079_v63  ;;  %v2302_v13 = vsel %vm820_vm2, %v1892_v2, 0 }
 0x4e3   : > { %v2109_v19 = vmul.f32 1.442695, %v2101_v27 }
 0x4e4   : > { %v2082_v21 = vpop.xlane.xlu1 %2081 }
 0x4e5   : > { %3851 = vpow2.f32 %v2109_v19  ;;  %v2102_v0 = vsub.f32 %v4732_v44, %v2082_v21  ;;  %2339 = vrot.lane.b32.xlu1 %v4280_v51, %s4039_s13  ;;  %v2419_v44 = vpop.permute.xlu0 %2418 }
 0x4e6   : > { %2508 = vrot.lane.b32.xlu2 %v4465_v11, %s4038_s28  ;;  %v2424_v63 = vsel %vm807_vm3, %v2419_v44, 0 }
 0x4e7   : > { %v2111_v20 = vmul.f32 1.442695, %v2102_v0 }
 0x4e9   : > { %3853 = vpow2.f32 %v2111_v20 }
 0x4eb   : > { %v4803_v36 = vpop.eup %3851 }
 0x4ec   : > { %v2157_v9 = vpack.c.bf16 %v4803_v36, %v4803_v36 }
 0x4ee   : > { %3682 = vmatmul.msk.bf16.vlgmr.msrb.gmra.mxu3 %vm807_vm3, %v2157_v9  ;;  %2333 = vrot.lane.b32.xlu2 %v4304_v61, %s4039_s13 }
 0x4ef   : > { %v4811_v51 = vpop.eup %3853  ;;  %2311 = vmatpush.bf16.msrb.mxu3 %v2302_v13 }
 0x4f0   : > { %v2158_v11 = vpack.c.bf16 %v4811_v51, %v4811_v51  ;;  %v2088_v31 = vpop.xlane.xlu2 %2087 }
 0x4f1   : > { %v2104_v35 = vsub.f32 %v4738_v55, %v2088_v31 }
 0x4f2   : > { %3683 = vmatmul.msk.bf16.vlgmr.msrb.gmra.mxu0 %vm807_vm3, %v2158_v11 }
 0x4f3   : > { %v2115_v48 = vmul.f32 1.442695, %v2104_v35  ;;  %2410 = vmatpush.bf16.xpose.msrb.mxu0 %v2401_v8 }
 0x4f5   : > { %3855 = vpow2.f32 %v2115_v48 }
 0x4f6   : > { %2554 = vrot.lane.b32.xlu2 %v4478_v15, %s4038_s28 }
 0x4f7   : > { %v2085_v61 = vpop.xlane.xlu0 %2084 }
 0x4f8   : > { %v2103_v17 = vsub.f32 %v4744_v43, %v2085_v61  ;;  %v686_v61 = vld [vmem:[%s4163_s29 + $0xc] sm:$0xf] }
 0x4fa   : > { %v2113_v58 = vmul.f32 1.442695, %v2103_v17  ;;  %v2354_v17 = vsel %vm820_vm2, %v686_v61, 0 }
 0x4fb   : > { %v4821_v5 = vpop.eup %3855  ;;  %2363 = vmatpush.bf16.msra.mxu1 %v2354_v17 }
 0x4fc   : > { %v2160_v3 = vpack.c.bf16 %v4821_v5, %v4821_v5  ;;  %3857 = vpow2.f32 %v2113_v58 }
 0x4fe   : > { %3685 = vmatmul.msk.bf16.vlgmr.msra.gmra.mxu3 %vm807_vm3, %v2160_v3  ;;  %2337 = vrot.lane.b32.xlu2 %v4286_v52, %s4039_s13 }
 0x500   : > { %v2097_v55 = vpop.xlane.xlu0 %2096 }
 0x501   : > { %v2107_v15 = vsub.f32 %v4748_v34, %v2097_v55  ;;  %v2465_v34 = vpop.permute.xlu2 %2464 }
 0x502   : > { %v4828_v10 = vpop.eup %3857  ;;  %v2470_v9 = vsel %vm807_vm3, %v2465_v34, 0 }
 0x503   : > { %v2159_v43 = vpack.c.bf16 %v4828_v10, %v4828_v10  ;;  %v2121_v27 = vmul.f32 1.442695, %v2107_v15 }
 0x505   : > { %3684 = vmatmul.msk.bf16.vlgmr.msrb.gmra.mxu2 %vm807_vm3, %v2159_v43  ;;  %3859 = vpow2.f32 %v2121_v27 }
 0x506   : > { %2433 = vmatpush.bf16.xpose.msrb.mxu2 %v2424_v63 }
 0x507   : > { %v2094_v19 = vpop.xlane.xlu1 %2093 }
 0x508   : > { %v2106_v21 = vsub.f32 %v4754_v53, %v2094_v19 }
 0x509   : > { %v2463_v8 = vpop.permute.xlu2 %2462 }
 0x50a   : > { %v2119_v0 = vmul.f32 1.442695, %v2106_v21 }
 0x50b   : > { %v4836_v52 = vpop.eup %3859 }
 0x50c   : > { %3861 = vpow2.f32 %v2119_v0  ;;  %v2163_v20 = vpack.c.bf16 %v4836_v52, %v4836_v52 }
 0x512   : > { %v4838_v41 = vpop.eup %3861 }
 0x513   : > { %v2162_v2 = vpack.c.bf16 %v4838_v41, %v4838_v41  ;;  %v2417_v44 = vpop.permute.xlu0 %2416 }
 0x515   : > { %3687 = vmatmul.msk.bf16.vlgmr.msra.gmra.mxu0 %vm807_vm3, %v2162_v2  ;;  %3688 = vmatmul.msk.bf16.vlgmr.msra.gmra.mxu2 %vm807_vm3, %v2163_v20 }
 0x516   : > { %2479 = vmatpush.bf16.xpose.msra.mxu0 %v2470_v9 }
 0x51f   : > { %v2442_v53 = vpop.permute.xlu1 %2441 }
 0x520   : > { %v2447_v13 = vsel %vm807_vm3, %v2442_v53, 0 }
 0x521   : > { %2456 = vmatpush.bf16.xpose.msra.mxu3 %v2447_v13 }
 0x525   : > { %3694 = vmatmul.msk.bf16.vlgmr.msrb.gmra.mxu0 %vm807_vm3, %v4789_v6  ;;  %3695 = vmatmul.msk.bf16.vlgmr.msrb.gmra.mxu2 %vm807_vm3, %v2417_v44 }
 0x527   : > { %v2440_v11 = vpop.permute.xlu1 %2439 }
 0x52f   : > { %v2488_v31 = vpop.permute.xlu1 %2487 }
 0x530   : > { %v2493_v35 = vsel %vm807_vm3, %v2488_v31, 0 }
 0x531   : > { %2502 = vmatpush.bf16.xpose.msra.mxu2 %v2493_v35 }
 0x535   : > { %3697 = vmatmul.msk.bf16.vlgmr.msra.gmra.mxu0 %vm807_vm3, %v2463_v8 }
 0x537   : > { %v2486_v48 = vpop.permute.xlu1 %2485 }
 0x538   : > { %3698 = vmatmul.msk.bf16.vlgmr.msra.gmra.mxu2 %vm807_vm3, %v2486_v48 }
 0x539   : > { %v2100_v58 = vpop.xlane.xlu2 %2099 }
 0x53a   : > { %v2108_v6 = vsub.f32 %v4765_v30, %v2100_v58 }
 0x53c   : > { %v2123_v3 = vmul.f32 1.442695, %v2108_v6 }
 0x53e   : > { %3863 = vpow2.f32 %v2123_v3  ;;  %v2091_v55 = vpop.xlane.xlu0 %2090 }
 0x53f   : > { %v2105_v15 = vsub.f32 %v4742_v24, %v2091_v55  ;;  %v2557_v43 = vpop.permute.xlu1 %2556 }
 0x540   : > { %v2562_v63 = vsel %vm807_vm3, %v2557_v43, 0 }
 0x541   : > { %v2117_v27 = vmul.f32 1.442695, %v2105_v15  ;;  %2571 = vmatpush.bf16.xpose.msrb.mxu2 %v2562_v63  ;;  %v2511_v19 = vpop.permute.xlu2 %2510 }
 0x542   : > { %v2516_v34 = vsel %vm807_vm3, %v2511_v19, 0 }
 0x543   : > { %3865 = vpow2.f32 %v2117_v27 }
 0x544   : > { %v4859_v21 = vpop.eup %3863 }
 0x545   : > { %v2164_v0 = vpack.c.bf16 %v4859_v21, %v4859_v21 }
 0x547   : > { %v2534_v30 = vpop.permute.xlu1 %2533  ;;  %3689 = vmatmul.msk.bf16.vlgmr.msrb.gmra.mxu3 %vm807_vm3, %v2164_v0 }
 0x548   : > { %v2539_v20 = vsel %vm807_vm3, %v2534_v30, 0  ;;  %2525 = vmatpush.bf16.xpose.msrb.mxu3 %v2516_v34 }
 0x549   : > { %v4866_v24 = vpop.eup %3865  ;;  %2548 = vmatpush.bf16.xpose.msrb.mxu0 %v2539_v20  ;;  %v2509_v2 = vpop.permute.xlu2 %2508 }
 0x54a   : > { %v2161_v9 = vpack.c.bf16 %v4866_v24, %v4866_v24 }
 0x54c   : > { %3686 = vmatmul.msk.bf16.vlgmr.msrb.gmra.mxu1 %vm807_vm3, %v2161_v9 }
 0x54f   : > { %v2336_v31 = vpop.permute.xlu1 %2335 }
 0x551   : > { %v2532_v53 = vpop.permute.xlu0 %2531  ;;  %v2334_v13 = vpop.permute.xlu2 %2333 }
 0x552   : > { %3700 = vmatmul.msk.bf16.vlgmr.msrb.gmra.mxu0 %vm807_vm3, %v2532_v53 }
 0x557   : > { %3696 = vmatmul.msk.bf16.vlgmr.msra.gmra.mxu3 %vm807_vm3, %v2440_v11  ;;  %v2340_v3 = vpop.permute.xlu1 %2339 }
 0x559   : > { %v2555_v44 = vpop.permute.xlu2 %2554 }
 0x55a   : > { %3701 = vmatmul.msk.bf16.vlgmr.msrb.gmra.mxu2 %vm807_vm3, %v2555_v44 }
 0x55c   : > { %3690 = vmatmul.msk.bf16.vlgmr.msra.gmra.mxu1 %vm807_vm3, %v2334_v13 }
 0x561   : > { %v2338_v17 = vpop.permute.xlu2 %2337 }
 0x567   : > { %3699 = vmatmul.msk.bf16.vlgmr.msrb.gmra.mxu3 %vm807_vm3, %v2509_v2 }
 0x56c   : > { %3691 = vmatmul.msk.bf16.gmra.mxu1 %vm807_vm3, %v2336_v31 }
 0x56f   : > { %v4877_v35 = vpop.f32.mrf.mxu0 }
 0x571   : > { %v4879_v8 = vpop.f32.mrf.mxu3 }
 0x577   : > { %v2201_v48 = vpop.f32.mrf.mxu0 }
 0x579   : > { %v2182_v61 = vpop.f32.mrf.mxu3 }
 0x57c   : > { %3692 = vmatmul.msk.bf16.gmra.mxu1 %vm807_vm3, %v2338_v17 }
 0x581   : > { %v4882_v11 = vpop.f32.mrf.mxu3 }
 0x588   : > { %v4884_v58 = vpop.f32.mrf.mxu2 }
 0x589   : > { %v2239_v6 = vpop.f32.mrf.mxu3 }
 0x58c   : > { %3693 = vmatmul.msk.bf16.gmra.mxu1 %vm807_vm3, %v2340_v3 }
 0x590   : > { %v2220_v55 = vpop.f32.mrf.mxu2 }
 0x592   : > { %v4887_v15 = vpop.f32.mrf.mxu0 }
 0x598   : > { %v4889_v43 = vpop.f32.mrf.mxu2 }
 0x59a   : > { %v2277_v63 = vpop.f32.mrf.mxu0 }
 0x5a0   : > { %v2296_v27 = vpop.f32.mrf.mxu2 }
 0x5a2   : > { %v4891_v19 = vpop.f32.mrf.mxu0 }
 0x5a3   : > { %v2577_v0 = vsel %vm807_vm3, %v4891_v19, -inf }
 0x5a4   : > { %2578 = vmax.xlane.f32.xlu2 %v2577_v0 }
 0x5a8   : > { %v4895_v34 = vpop.f32.mrf.mxu2 }
 0x5a9   : > { %v2580_v30 = vsel %vm807_vm3, %v4895_v34, -inf }
 0x5aa   : > { %v2414_v20 = vpop.f32.mrf.mxu0  ;;  %2581 = vmax.xlane.f32.xlu1 %v2580_v30 }
 0x5b0   : > { %v2437_v2 = vpop.f32.mrf.mxu2 }
 0x5b2   : > { %v4899_v9 = vpop.f32.mrf.mxu0 }
 0x5b3   : > { %v2586_v53 = vsel %vm807_vm3, %v4899_v9, -inf }
 0x5b4   : > { %2587 = vmax.xlane.f32.xlu2 %v2586_v53 }
 0x5ba   : > { %v2483_v13 = vpop.f32.mrf.mxu0 }
 0x5bb   : > { %v4903_v44 = vpop.f32.mrf.mxu2 }
 0x5bc   : > { %v2589_v31 = vsel %vm807_vm3, %v4903_v44, -inf }
 0x5bd   : > { %2590 = vmax.xlane.f32.xlu1 %v2589_v31 }
 0x5c3   : > { %v2506_v48 = vpop.f32.mrf.mxu2 }
 0x5c9   : > { %v4907_v61 = vpop.f32.mrf.mxu1 }
 0x5ca   : > { %v4909_v17 = vpop.f32.mrf.mxu3 }
 0x5cb   : > { %5429 = vst [vmem:[#allocation9_spill] sm:$0xff] %v4909_v17 }
 0x5cf   : > { %v4911_v6 = vpop.f32.mrf.mxu0 }
 0x5d1   : > { %v2258_v3 = vpop.f32.mrf.mxu1 }
 0x5d2   : > { %v2315_v55 = vpop.f32.mrf.mxu3 }
 0x5d3   : > { %v2595_v55 = vsel %vm807_vm3, %v4911_v6, -inf }
 0x5d7   : > { %v2552_v63 = vpop.f32.mrf.mxu0 }
 0x5d9   : > { %v2365_v27 = vpop.f32.mrf.mxu1 }
 0x5da   : > { %v2385_v0 = vpack.c.bf16 %v2365_v27, %v2365_v27  ;;  %v4913_v30 = vpop.f32.mrf.mxu3 }
 0x5db   : > { %v2583_v20 = vsel %vm807_vm3, %v4913_v30, -inf }
 0x5dc   : > { %v2669_v2 = vsel %vm820_vm2, %v2385_v0, 0  ;;  %2584 = vmax.xlane.f32.xlu0 %v2583_v20  ;;  %v1625_v0 = vsel %vm807_vm3, %v4645_v22, 0.0 }
 0x5dd   : > { %v4918_v53 = vpop.f32.mrf.mxu2  ;;  %2678 = vmatpush.bf16.msra.mxu3 %v2669_v2 }
 0x5de   : > { %v2598_v13 = vsel %vm807_vm3, %v4918_v53, -inf }
 0x5df   : > { %2599 = vmax.xlane.f32.xlu1 %v2598_v13  ;;  %v1104_v13 = vsel %vm807_vm3, %v4485_v23, 0.0  ;;  %v1101_v23 = vsel %vm807_vm3, %v4449_v4, 0.0  ;;  %v1634_v4 = vsel %vm807_vm3, %v4675_v7, 0.0 }
 0x5e1   : > { %v2367_v31 = vpop.f32.mrf.mxu1 }
 0x5e2   : > { %v2386_v48 = vpack.c.bf16 %v2367_v31, %v2367_v31  ;;  %v2460_v3 = vpop.f32.mrf.mxu3 }
 0x5e4   : > { %v2688_v63 = vsel %vm820_vm2, %v2386_v48, 0  ;;  %2596 = vmax.xlane.f32.xlu0 %v2595_v55  ;;  %v2128_v48 = vsel %vm807_vm3, %v4811_v51, 0.0 }
 0x5e5   : > { %v2575_v27 = vpop.f32.mrf.mxu2  ;;  %2697 = vmatpush.bf16.msra.mxu0 %v2688_v63 }
 0x5e6   : > { %v2125_v27 = vsel %vm807_vm3, %v4803_v36, 0.0  ;;  %v1628_v36 = vsel %vm807_vm3, %v4620_v42, 0.0  ;;  %v1116_v42 = vsel %vm807_vm3, %v4511_v39, 0.0 }
 0x5e7   : > { %1626 = vadd.xlane.f32.xlu1 %v1625_v0 }
 0x5e9   : > { %v2370_v20 = vpop.f32.mrf.mxu1 }
 0x5ea   : > { %v2387_v2 = vpack.c.bf16 %v2370_v20, %v2370_v20  ;;  %v4927_v17 = vpop.f32.mrf.mxu3  ;;  %v1107_v20 = vsel %vm807_vm3, %v4470_v33, 0.0 }
 0x5eb   : > { %v2592_v31 = vsel %vm807_vm3, %v4927_v17, -inf }
 0x5ec   : > { %v2707_v3 = vsel %vm820_vm2, %v2387_v2, 0  ;;  %1105 = vadd.xlane.f32.xlu0 %v1104_v13  ;;  %2593 = vmax.xlane.f32.xlu2 %v2592_v31  ;;  %v1631_v13 = vsel %vm807_vm3, %v4660_v62, 0.0  ;;  %v1110_v62 = vsel %vm807_vm3, %v4505_v59, 0.0 }
 0x5ed   : > { %2716 = vmatpush.bf16.msra.mxu2 %v2707_v3 }
 0x5ef   : > { %2129 = vadd.xlane.f32.xlu1 %v2128_v48  ;;  %v2134_v48 = vsel %vm807_vm3, %v4821_v5, 0.0 }
 0x5f1   : > { %v2372_v22 = vpop.f32.mrf.mxu1 }
 0x5f2   : > { %v2388_v55 = vpack.c.bf16 %v2372_v22, %v2372_v22  ;;  %v2529_v63 = vpop.f32.mrf.mxu3 }
 0x5f3   : > { %v2131_v63 = vsel %vm807_vm3, %v4828_v10, 0.0 }
 0x5f4   : > { %v2726_v0 = vsel %vm820_vm2, %v2388_v55, 0  ;;  %2126 = vadd.xlane.f32.xlu0 %v2125_v27  ;;  %1102 = vadd.xlane.f32.xlu2 %v1101_v23 }
 0x5f5   : > { %2735 = vmatpush.bf16.msrb.mxu3 %v2726_v0 }
 0x5f7   : > { %1108 = vadd.xlane.f32.xlu1 %v1107_v20 }
 0x5f9   : > { %v2375_v51 = vpop.f32.mrf.mxu1 }
 0x5fa   : > { %v2389_v2 = vpack.c.bf16 %v2375_v51, %v2375_v51 }
 0x5fc   : > { %v2745_v31 = vsel %vm820_vm2, %v2389_v2, 0  ;;  %1632 = vadd.xlane.f32.xlu0 %v1631_v13  ;;  %1629 = vadd.xlane.f32.xlu2 %v1628_v36 }
 0x5fd   : > { %2754 = vmatpush.bf16.msrb.mxu1 %v2745_v31 }
 0x5ff   : > { %1635 = vadd.xlane.f32.xlu1 %v1634_v4 }
 0x601   : > { %v2377_v3 = vpop.f32.mrf.mxu1 }
 0x602   : > { %v2390_v33 = vpack.c.bf16 %v2377_v3, %v2377_v3 }
 0x604   : > { %v2764_v22 = vsel %vm820_vm2, %v2390_v33, 0  ;;  %2135 = vadd.xlane.f32.xlu0 %v2134_v48  ;;  %1111 = vadd.xlane.f32.xlu2 %v1110_v62  ;;  %v1637_v62 = vsel %vm807_vm3, %v4706_v40, 0.0  ;;  %v1640_v40 = vsel %vm807_vm3, %v4673_v28, 0.0  ;;  %v1646_v28 = vsel %vm807_vm3, %v4688_v56, 0.0 }
 0x605   : > { %2773 = vmatpush.bf16.msrb.mxu0 %v2764_v22 }
 0x607   : > { %1117 = vadd.xlane.f32.xlu1 %v1116_v42 }
 0x609   : > { %v2380_v55 = vpop.f32.mrf.mxu1 }
 0x60a   : > { %v2391_v7 = vpack.c.bf16 %v2380_v55, %v2380_v55  ;;  %v1113_v55 = vsel %vm807_vm3, %v4524_v25, 0.0  ;;  %v1122_v25 = vsel %vm807_vm3, %v4528_v26, 0.0 }
 0x60c   : > { %v2783_v27 = vsel %vm820_vm2, %v2391_v7, 0  ;;  %2132 = vadd.xlane.f32.xlu2 %v2131_v63 }
 0x60d   : > { %2792 = vmatpush.bf16.msrb.mxu2 %v2783_v27 }
 0x611   : > { %v2382_v20 = vpop.f32.mrf.mxu1 }
 0x612   : > { %v2392_v2 = vpack.c.bf16 %v2382_v20, %v2382_v20 }
 0x614   : > { %v2802_v31 = vsel %vm820_vm2, %v2392_v2, 0 }
 0x617   : > { %v2579_v5 = vpop.xlane.xlu2 %2578 }
 0x618   : > { %v2601_v59 = vsub.f32 %v4891_v19, %v2579_v5 }
 0x61a   : > { %v2609_v23 = vmul.f32 1.442695, %v2601_v59 }
 0x61c   : > { %3867 = vpow2.f32 %v2609_v23  ;;  %v1119_v23 = vsel %vm807_vm3, %v4495_v32, 0.0 }
 0x61d   : > { %v2582_v0 = vpop.xlane.xlu1 %2581 }
 0x61e   : > { %v2602_v51 = vsub.f32 %v4895_v34, %v2582_v0 }
 0x620   : > { %v2611_v39 = vmul.f32 1.442695, %v2602_v51  ;;  %v2143_v51 = vsel %vm807_vm3, %v4836_v52, 0.0 }
 0x622   : > { %v3868_v13 = vpop.eup %3867  ;;  %3869 = vpow2.f32 %v2611_v39 }
 0x623   : > { %v2657_v36 = vpack.c.bf16 %v3868_v13, %v3868_v13  ;;  %v2625_v10 = vsel %vm807_vm3, %v3868_v13, 0.0 }
 0x624   : > { %2626 = vadd.xlane.f32.xlu2 %v2625_v10 }
 0x625   : > { %3702 = vmatmul.msk.bf16.vlgmr.msra.gmra.mxu3 %vm807_vm3, %v2657_v36 }
 0x626   : > { %2811 = vmatpush.bf16.msra.mxu3 %v2802_v31 }
 0x627   : > { %v2588_v19 = vpop.xlane.xlu2 %2587 }
 0x628   : > { %v3870_v4 = vpop.eup %3869  ;;  %v2604_v3 = vsub.f32 %v4899_v9, %v2588_v19 }
 0x629   : > { %v2658_v33 = vpack.c.bf16 %v3870_v4, %v3870_v4  ;;  %v2628_v34 = vsel %vm807_vm3, %v3870_v4, 0.0 }
 0x62a   : > { %v2615_v48 = vmul.f32 1.442695, %v2604_v3  ;;  %2629 = vadd.xlane.f32.xlu0 %v2628_v34 }
 0x62b   : > { %3703 = vmatmul.msk.bf16.vlgmr.msra.gmra.mxu0 %vm807_vm3, %v2658_v33 }
 0x62c   : > { %3871 = vpow2.f32 %v2615_v48  ;;  %1638 = vadd.xlane.f32.xlu2 %v1637_v62  ;;  %v2137_v48 = vsel %vm807_vm3, %v4866_v24, 0.0  ;;  %v2146_v24 = vsel %vm807_vm3, %v4859_v21, 0.0 }
 0x630   : > { %v2591_v22 = vpop.xlane.xlu1 %2590 }
 0x631   : > { %v2605_v42 = vsub.f32 %v4903_v44, %v2591_v22  ;;  %v2140_v44 = vsel %vm807_vm3, %v4838_v41, 0.0 }
 0x632   : > { %v3872_v7 = vpop.eup %3871  ;;  %1114 = vadd.xlane.f32.xlu0 %v1113_v55 }
 0x633   : > { %v2660_v9 = vpack.c.bf16 %v3872_v7, %v3872_v7  ;;  %v2617_v63 = vmul.f32 1.442695, %v2605_v42  ;;  %v2634_v27 = vsel %vm807_vm3, %v3872_v7, 0.0 }
 0x634   : > { %2635 = vadd.xlane.f32.xlu2 %v2634_v27 }
 0x635   : > { %3873 = vpow2.f32 %v2617_v63  ;;  %3705 = vmatmul.msk.bf16.vlgmr.msrb.gmra.mxu3 %vm807_vm3, %v2660_v9 }
 0x63a   : > { %1641 = vadd.xlane.f32.xlu0 %v1640_v40 }
 0x63b   : > { %v3874_v5 = vpop.eup %3873 }
 0x63c   : > { %v2661_v59 = vpack.c.bf16 %v3874_v5, %v3874_v5  ;;  %2141 = vadd.xlane.f32.xlu2 %v2140_v44  ;;  %v2637_v0 = vsel %vm807_vm3, %v3874_v5, 0.0 }
 0x63e   : > { %3706 = vmatmul.msk.bf16.vlgmr.msrb.gmra.mxu1 %vm807_vm3, %v2661_v59 }
 0x642   : > { %1123 = vadd.xlane.f32.xlu0 %v1122_v25 }
 0x644   : > { %1120 = vadd.xlane.f32.xlu2 %v1119_v23 }
 0x64a   : > { %2638 = vadd.xlane.f32.xlu0 %v2637_v0 }
 0x64c   : > { %1647 = vadd.xlane.f32.xlu2 %v1646_v28 }
 0x64f   : > { %v2585_v41 = vpop.xlane.xlu0 %2584 }
 0x650   : > { %v2603_v20 = vsub.f32 %v4913_v30, %v2585_v41 }
 0x652   : > { %v2613_v39 = vmul.f32 1.442695, %v2603_v20  ;;  %2144 = vadd.xlane.f32.xlu0 %v2143_v51  ;;  %v2600_v26 = vpop.xlane.xlu1 %2599 }
 0x653   : > { %v2608_v2 = vsub.f32 %v4918_v53, %v2600_v26 }
 0x654   : > { %3875 = vpow2.f32 %v2613_v39 }
 0x655   : > { %v2623_v32 = vmul.f32 1.442695, %v2608_v2 }
 0x657   : > { %3877 = vpow2.f32 %v2623_v32  ;;  %v2597_v13 = vpop.xlane.xlu0 %2596 }
 0x658   : > { %v2607_v36 = vsub.f32 %v4911_v6, %v2597_v13 }
 0x65a   : > { %v3876_v10 = vpop.eup %3875  ;;  %v2621_v56 = vmul.f32 1.442695, %v2607_v36  ;;  %v1627_v40 = vpop.xlane.xlu1 %1626 }
 0x65b   : > { %v2659_v31 = vpack.c.bf16 %v3876_v10, %v3876_v10  ;;  %v2631_v19 = vsel %vm807_vm3, %v3876_v10, 0.0 }
 0x65c   : > { %3879 = vpow2.f32 %v2621_v56  ;;  %2632 = vadd.xlane.f32.xlu1 %v2631_v19 }
 0x65d   : > { %v3878_v30 = vpop.eup %3877  ;;  %3704 = vmatmul.msk.bf16.vlgmr.msra.gmra.mxu2 %vm807_vm3, %v2659_v31 }
 0x65e   : > { %v2664_v52 = vpack.c.bf16 %v3878_v30, %v3878_v30  ;;  %v2646_v4 = vsel %vm807_vm3, %v3878_v30, 0.0 }
 0x65f   : > { %v2594_v53 = vpop.xlane.xlu2 %2593  ;;  %2647 = vadd.xlane.f32.xlu0 %v2646_v4  ;;  %v1106_v9 = vpop.xlane.xlu0 %1105 }
 0x660   : > { %v2606_v3 = vsub.f32 %v4927_v17, %v2594_v53  ;;  %3709 = vmatmul.msk.bf16.vlgmr.msra.gmra.mxu3 %vm807_vm3, %v2664_v52  ;;  %v1643_v17 = vsel %vm807_vm3, %v4668_v16, 0.0 }
 0x662   : > { %v3880_v6 = vpop.eup %3879  ;;  %v2619_v33 = vmul.f32 1.442695, %v2606_v3  ;;  %v2130_v59 = vpop.xlane.xlu1 %2129 }
 0x663   : > { %v2643_v34 = vsel %vm807_vm3, %v3880_v6, 0.0  ;;  %v2663_v22 = vpack.c.bf16 %v3880_v6, %v3880_v6 }
 0x664   : > { %3881 = vpow2.f32 %v2619_v33  ;;  %2644 = vadd.xlane.f32.xlu2 %v2643_v34  ;;  %2138 = vadd.xlane.f32.xlu1 %v2137_v48 }
 0x667   : > { %v1103_v7 = vpop.xlane.xlu2 %1102  ;;  %v2127_v27 = vpop.xlane.xlu0 %2126 }
 0x668   : > { %3883 = vrcp.f32 %v1103_v7 }
 0x66a   : > { %v3882_v62 = vpop.eup %3881  ;;  %v5011_v28 = vpop.xlane.xlu1 %1108 }
 0x66b   : > { %v2662_v42 = vpack.c.bf16 %v3882_v62, %v3882_v62  ;;  %v2640_v55 = vsel %vm807_vm3, %v3882_v62, 0.0 }
 0x66c   : > { %2641 = vadd.xlane.f32.xlu1 %v2640_v55 }
 0x66d   : > { %3707 = vmatmul.msk.bf16.vlgmr.msrb.gmra.mxu0 %vm807_vm3, %v2662_v42  ;;  %3708 = vmatmul.msk.bf16.vlgmr.msrb.gmra.mxu2 %vm807_vm3, %v2663_v22  ;;  %v3981_v42 = vld [vmem:[%s4207_s7] sm:$0xff] }
 0x66e   : > { %v3884_v0 = vpop.eup %3883 }
 0x66f   : > { %v1630_v63 = vpop.xlane.xlu2 %1629  ;;  %v5007_v44 = vpop.xlane.xlu0 %1632  ;;  %v1293_v39 = vmul.f32 %v3884_v0, %v4537_v12 }
 0x670   : > { %3885 = vrcp.f32 %v1630_v63 }
 0x671   : > { %3887 = vrcp.f32 %v1627_v40 }
 0x672   : > { %3889 = vrcp.f32 %v1106_v9  ;;  %v1636_v30 = vpop.xlane.xlu1 %1635 }
 0x673   : > { %3891 = vrcp.f32 %v2130_v59 }
 0x674   : > { %1644 = vadd.xlane.f32.xlu1 %v1643_v17  ;;  %3893 = vrcp.f32 %v2127_v27  ;;  %v3982_v17 = vld [vmem:[%s4207_s7 + $0x8] sm:$0xff] }
 0x676   : > { %v3886_v21 = vpop.eup %3885 }
 0x677   : > { %v1112_v5 = vpop.xlane.xlu2 %1111  ;;  %v2136_v23 = vpop.xlane.xlu0 %2135  ;;  %v1818_v26 = vmul.f32 %v3886_v21, %v4703_v37 }
 0x678   : > { %v3888_v41 = vpop.eup %3887 }
 0x679   : > { %v3890_v51 = vpop.eup %3889  ;;  %v1817_v32 = vmul.f32 %v3888_v41, %v4715_v57 }
 0x67a   : > { %v3892_v2 = vpop.eup %3891  ;;  %v1294_v13 = vmul.f32 %v3890_v51, %v4548_v49  ;;  %v5026_v49 = vld [vmem:[%s5430_s1] ss:$0 sm:$0xff] }
 0x67b   : > { %v3894_v36 = vpop.eup %3893  ;;  %v1825_v56 = vadd.f32 %v1817_v32, %v1293_v39  ;;  %v2318_v12 = vmul.f32 %v3892_v2, %v4877_v35  ;;  %v3983_v32 = vld [vmem:[%s4207_s7 + $0x18] sm:$0xff] }
 0x67c   : > { %2147 = vadd.xlane.f32.xlu1 %v2146_v24  ;;  %v1826_v31 = vadd.f32 %v1818_v26, %v1294_v13  ;;  %v2317_v52 = vmul.f32 %v3894_v36, %v4879_v8 }
 0x67e   : > { %v2325_v57 = vadd.f32 %v2317_v52, %v1825_v56  ;;  %v2326_v6 = vadd.f32 %v2318_v12, %v1826_v31 }
 0x67f   : > { %v5009_v25 = vpop.xlane.xlu2 %2132 }
 0x697   : > { %v2627_v16 = vpop.xlane.xlu2 %2626 }
 0x698   : > { %3895 = vrcp.f32 %v2627_v16 }
 0x69d   : > { %v2630_v20 = vpop.xlane.xlu0 %2629 }
 0x69e   : > { %3897 = vrcp.f32 %v2630_v20  ;;  %v3896_v19 = vpop.eup %3895 }
 0x69f   : > { %v5017_v10 = vpop.xlane.xlu2 %1638  ;;  %3899 = vrcp.f32 %v1112_v5 }
 0x6a0   : > { %3901 = vrcp.f32 %v1636_v30 }
 0x6a1   : > { %3903 = vrcp.f32 %v2136_v23 }
 0x6a4   : > { %v3898_v37 = vpop.eup %3897 }
 0x6a5   : > { %v3900_v62 = vpop.eup %3899  ;;  %v1115_v0 = vpop.xlane.xlu0 %1114 }
 0x6a6   : > { %v3902_v9 = vpop.eup %3901  ;;  %v1296_v27 = vmul.f32 %v3900_v62, %v4558_v47 }
 0x6a7   : > { %v2636_v22 = vpop.xlane.xlu2 %2635  ;;  %v1820_v59 = vmul.f32 %v3902_v9, %v4726_v14  ;;  %v3904_v23 = vpop.eup %3903 }
 0x6a8   : > { %v2680_v4 = vpop.f32.mrf.mxu3  ;;  %v2699_v53 = vpop.f32.mrf.mxu0  ;;  %3905 = vrcp.f32 %v2636_v22  ;;  %v2320_v21 = vmul.f32 %v3904_v23, %v4882_v11 }
 0x6a9   : > { %v2817_v3 = vmul.f32 %v3896_v19, %v2680_v4  ;;  %v2818_v33 = vmul.f32 %v3898_v37, %v2699_v53  ;;  %v1828_v16 = vadd.f32 %v1820_v59, %v1296_v27  ;;  %v1118_v19 = vpop.xlane.xlu1 %1117  ;;  %3907 = vrcp.f32 %v5011_v28 }
 0x6aa   : > { %3909 = vrcp.f32 %v5007_v44 }
 0x6ab   : > { %v2825_v8 = vadd.f32 %v2817_v3, %v2325_v57  ;;  %v2826_v34 = vadd.f32 %v2818_v33, %v2326_v6  ;;  %v2328_v47 = vadd.f32 %v2320_v21, %v1828_v16  ;;  %3911 = vrcp.f32 %v1115_v0 }
 0x6ac   : > { %3913 = vrcp.f32 %v5009_v25 }
 0x6ad   : > { %v2836_v35 = vadd.f32 %v5026_v49, %v2825_v8  ;;  %v2837_v48 = vadd.f32 %v5026_v49, %v2826_v34  ;;  %v1642_v56 = vpop.xlane.xlu0 %1641  ;;  %3915 = vrcp.f32 %v5017_v10 }
 0x6ae   : > { %v3906_v41 = vpop.eup %3905  ;;  %3917 = vrcp.f32 %v1642_v56 }
 0x6af   : > { %v5031_v55 = vadd.f32 %v3981_v42, %v2836_v35  ;;  %v5034_v7 = vadd.f32 %v3982_v17, %v2837_v48  ;;  %v2142_v30 = vpop.xlane.xlu2 %2141  ;;  %v3908_v37 = vpop.eup %3907 }
 0x6b0   : > { %v2682_v24 = vpop.f32.mrf.mxu3  ;;  %v2701_v63 = vpop.f32.mrf.mxu0  ;;  %v1295_v10 = vmul.f32 %v3908_v37, %v4544_v45 }
 0x6b1   : > { %v2852_v40 = vsel %vm725_vm1, %v5031_v55, 0.0  ;;  %v2855_v5 = vsel %vm725_vm1, %v5034_v7, 0.0  ;;  %v3910_v57 = vpop.eup %3909 }
 0x6b2   : > { %2853 = vadd.xlane.f32.xlu1 %v2852_v40  ;;  %2856 = vadd.xlane.f32.xlu2 %v2855_v5  ;;  %v3912_v3 = vpop.eup %3911  ;;  %v1819_v28 = vmul.f32 %v3910_v57, %v4719_v54 }
 0x6b3   : > { %v3914_v6 = vpop.eup %3913  ;;  %v1297_v44 = vmul.f32 %v3912_v3, %v4572_v18 }
 0x6b4   : > { %v3916_v33 = vpop.eup %3915  ;;  %v2319_v8 = vmul.f32 %v3914_v6, %v4884_v58  ;;  %v1827_v22 = vadd.f32 %v1819_v28, %v1295_v10  ;;  %v3986_v10 = vld [vmem:[%s4207_s7 + $0x28] sm:$0xff] }
 0x6b5   : > { %v5049_v11 = vpop.xlane.xlu0 %1123  ;;  %v3918_v25 = vpop.eup %3917  ;;  %v1821_v35 = vmul.f32 %v3916_v33, %v4752_v46 }
 0x6b6   : > { %v2327_v63 = vadd.f32 %v2319_v8, %v1827_v22  ;;  %v1822_v58 = vmul.f32 %v3918_v25, %v4722_v1  ;;  %v5431_v22 = vld [vmem:[#allocation8_spill] sm:$0xff] }
 0x6b7   : > { %v1121_v4 = vpop.xlane.xlu2 %1120  ;;  %v1829_v17 = vadd.f32 %v1821_v35, %v1297_v44 }
 0x6b8   : > { %v2737_v20 = vpop.f32.mrf.mxu3 }
 0x6b9   : > { %v2820_v51 = vmul.f32 %v3906_v41, %v2737_v20 }
 0x6bb   : > { %v2828_v39 = vadd.f32 %v2820_v51, %v2328_v47  ;;  %v2756_v26 = vpop.f32.mrf.mxu1  ;;  %v3984_v47 = vld [vmem:[%s4207_s7 + $0x10] sm:$0xff] }
 0x6bd   : > { %v2839_v2 = vadd.f32 %v5026_v49, %v2828_v39  ;;  %v2639_v12 = vpop.xlane.xlu0 %2638 }
 0x6be   : > { %3919 = vrcp.f32 %v2639_v12 }
 0x6bf   : > { %v5045_v13 = vadd.f32 %v3983_v32, %v2839_v2  ;;  %v1648_v24 = vpop.xlane.xlu2 %1647 }
 0x6c0   : > { %v2739_v36 = vpop.f32.mrf.mxu3 }
 0x6c1   : > { %v2861_v14 = vsel %vm725_vm1, %v5045_v13, 0.0 }
 0x6c2   : > { %2862 = vadd.xlane.f32.xlu1 %v2861_v14 }
 0x6c3   : > { %v2758_v31 = vpop.f32.mrf.mxu1 }
 0x6c4   : > { %v3920_v34 = vpop.eup %3919 }
 0x6c5   : > { %v2821_v40 = vmul.f32 %v3920_v34, %v2756_v26  ;;  %v2145_v23 = vpop.xlane.xlu0 %2144  ;;  %v3985_v26 = vld [vmem:[%s4207_s7 + $0x20] sm:$0xff] }
 0x6cf   : > { %v2633_v52 = vpop.xlane.xlu1 %2632 }
 0x6d7   : > { %v2139_v53 = vpop.xlane.xlu1 %2138  ;;  %v2645_v32 = vpop.xlane.xlu2 %2644 }
 0x6d8   : > { %3921 = vrcp.f32 %v2139_v53  ;;  %v2648_v53 = vpop.xlane.xlu0 %2647 }
 0x6d9   : > { %3923 = vrcp.f32 %v2633_v52 }
 0x6da   : > { %3925 = vrcp.f32 %v1118_v19 }
 0x6db   : > { %3927 = vrcp.f32 %v2142_v30 }
 0x6de   : > { %v3922_v48 = vpop.eup %3921 }
 0x6df   : > { %v2642_v62 = vpop.xlane.xlu1 %2641  ;;  %v3924_v42 = vpop.eup %3923  ;;  %v2321_v9 = vmul.f32 %v3922_v48, %v4907_v61 }
 0x6e0   : > { %v2718_v54 = vpop.f32.mrf.mxu2  ;;  %v3926_v27 = vpop.eup %3925  ;;  %3929 = vrcp.f32 %v2642_v62 }
 0x6e1   : > { %v2819_v18 = vmul.f32 %v3924_v42, %v2718_v54  ;;  %v2329_v45 = vadd.f32 %v2321_v9, %v1829_v17  ;;  %v3928_v59 = vpop.eup %3927  ;;  %v1298_v61 = vmul.f32 %v3926_v27, %v4560_v38  ;;  %3931 = vrcp.f32 %v1121_v4  ;;  %v5432_v54 = vld [vmem:[#allocation9_spill] sm:$0xff] }
 0x6e2   : > { %3933 = vrcp.f32 %v2145_v23  ;;  %v2322_v1 = vmul.f32 %v3928_v59, %v4887_v15  ;;  %v4040_v23 = vmov 32.0  }
 0x6e3   : > { %v2827_v5 = vadd.f32 %v2819_v18, %v2327_v63  ;;  %v5062_v46 = vpop.f32.mrf.mxu3  ;;  %v2829_v16 = vadd.f32 %v2821_v40, %v2329_v45  ;;  %v1830_v20 = vadd.f32 %v1822_v58, %v1298_v61  ;;  %v3987_v45 = vld [vmem:[%s4207_s7 + $0x30] sm:$0xff] }
 0x6e5   : > { %v2838_v0 = vadd.f32 %v5026_v49, %v2827_v5  ;;  %v2840_v21 = vadd.f32 %v5026_v49, %v2829_v16  ;;  %v2330_v15 = vadd.f32 %v2322_v1, %v1830_v20 }
 0x6e6   : > { %v3930_v36 = vpop.eup %3929 }
 0x6e7   : > { %v1645_v41 = vpop.xlane.xlu1 %1644  ;;  %v5069_v51 = vadd.f32 %v3984_v47, %v2838_v0  ;;  %v5072_v2 = vadd.f32 %v3985_v26, %v2840_v21  ;;  %v3932_v30 = vpop.eup %3931 }
 0x6e8   : > { %3935 = vrcp.f32 %v1645_v41  ;;  %v2720_v39 = vpop.f32.mrf.mxu2  ;;  %v3934_v52 = vpop.eup %3933  ;;  %v1299_v4 = vmul.f32 %v3932_v30, %v4551_v60 }
 0x6e9   : > { %v2858_v38 = vsel %vm725_vm1, %v5069_v51, 0.0  ;;  %3937 = vrcp.f32 %v1648_v24  ;;  %v2864_v14 = vsel %vm725_vm1, %v5072_v2, 0.0  ;;  %v2323_v25 = vmul.f32 %v3934_v52, %v4889_v43 }
 0x6ea   : > { %v2775_v56 = vpop.f32.mrf.mxu0  ;;  %2859 = vadd.xlane.f32.xlu0 %v2858_v38  ;;  %3939 = vrcp.f32 %v5049_v11  ;;  %2865 = vadd.xlane.f32.xlu2 %v2864_v14 }
 0x6eb   : > { %v2822_v31 = vmul.f32 %v3930_v36, %v2775_v56  ;;  %v2815_v19 = vpop.f32.mrf.mxu3  ;;  %3941 = vrcp.f32 %v2645_v32 }
 0x6ed   : > { %v2830_v12 = vadd.f32 %v2822_v31, %v2330_v15  ;;  %v3988_v31 = vld [vmem:[%s4207_s7 + $0x38] sm:$0xff] }
 0x6ee   : > { %v3936_v37 = vpop.eup %3935 }
 0x6ef   : > { %v1823_v57 = vmul.f32 %v3936_v37, %v4724_v29  ;;  %v2148_v3 = vpop.xlane.xlu1 %2147  ;;  %v2841_v6 = vadd.f32 %v5026_v49, %v2830_v12  ;;  %v3938_v33 = vpop.eup %3937 }
 0x6f0   : > { %3943 = vrcp.f32 %v2148_v3  ;;  %v2794_v11 = vpop.f32.mrf.mxu2  ;;  %v3940_v28 = vpop.eup %3939  ;;  %v1824_v60 = vmul.f32 %v3938_v33, %v4736_v50 }
 0x6f1   : > { %v1831_v44 = vadd.f32 %v1823_v57, %v1299_v4  ;;  %v5084_v8 = vadd.f32 %v3986_v10, %v2841_v6  ;;  %v3942_v34 = vpop.eup %3941  ;;  %3945 = vrcp.f32 %v2648_v53  ;;  %v1300_v42 = vmul.f32 %v3940_v28, %v5431_v22 }
 0x6f2   : > { %v2777_v35 = vpop.f32.mrf.mxu0  ;;  %v2823_v48 = vmul.f32 %v3942_v34, %v2794_v11  ;;  %3947 = vrcp.f32 %v4040_v23 }
 0x6f3   : > { %v2331_v29 = vadd.f32 %v2323_v25, %v1831_v44  ;;  %v2867_v62 = vsel %vm725_vm1, %v5084_v8, 0.0  ;;  %v1832_v43 = vadd.f32 %v1824_v60, %v1300_v42 }
 0x6f4   : > { %2868 = vadd.xlane.f32.xlu0 %v2867_v62  ;;  %v3751_v62 = vld [vmem:[%s4180_s26 + $0x8] sm:$0xff] }
 0x6f5   : > { %v2831_v17 = vadd.f32 %v2823_v48, %v2331_v29  ;;  %3094 = vmatpush.bf16.msra.mxu1 %v3751_v62 }
 0x6f6   : > { %v3944_v9 = vpop.eup %3943 }
 0x6f7   : > { %v2324_v24 = vmul.f32 %v3944_v9, %v5432_v54  ;;  %v2842_v63 = vadd.f32 %v5026_v49, %v2831_v17  ;;  %v3946_v18 = vpop.eup %3945 }
 0x6f8   : > { %v2796_v27 = vpop.f32.mrf.mxu2  ;;  %v2824_v40 = vmul.f32 %v3946_v18, %v5062_v46  ;;  %v3948_v16 = vpop.eup %3947 }
 0x6f9   : > { %v2332_v50 = vadd.f32 %v2324_v24, %v1832_v43  ;;  %v2850_v58 = vadd.f32 %v3987_v45, %v2842_v63  ;;  %v2877_v61 = vmul.f32 32.0, %v3948_v16  ;;  %vm2881_vm4 = vweird.f32 %v3948_v16 }
 0x6fb   : > { %v2870_v5 = vsel %vm725_vm1, %v2850_v58, 0.0  ;;  %v2832_v59 = vadd.f32 %v2824_v40, %v2332_v50  ;;  %v2878_v0 = vsub.f32 1.0, %v2877_v61 }
 0x6fc   : > { %2871 = vadd.xlane.f32.xlu0 %v2870_v5 }
 0x6fd   : > { %v2879_v21 = vmul.f32 %v3948_v16, %v2878_v0  ;;  %v2843_v15 = vadd.f32 %v5026_v49, %v2832_v59 }
 0x6ff   : > { %v2880_v41 = vadd.f32 %v3948_v16, %v2879_v21 }
 0x701   : > { %v5095_v20 = vsel %vm2881_vm4, %v3948_v16, %v2880_v41 }
 0x725   : > { %v2857_v1 = vpop.xlane.xlu2 %2856  ;;  %v2854_v46 = vpop.xlane.xlu1 %2853 }
 0x726   : > { %v2884_v47 = vmul.f32 %v5095_v20, %v2857_v1  ;;  %v2883_v39 = vmul.f32 %v5095_v20, %v2854_v46  ;;  %v5163_v1 = vld [vmem:[%s5433_s30] ss:$0 sm:$0xff] }
 0x728   : > { %v5100_v26 = vsub.f32 %v5034_v7, %v2884_v47  ;;  %v5103_v32 = vsub.f32 %v5031_v55, %v2883_v39  ;;  %v2851_v7 = vadd.f32 %v3988_v31, %v2843_v15  ;;  %v5170_v39 = vld [vmem:[%s5434_s25] ss:$0 sm:$0xff] }
 0x72a   : > { %v2900_v38 = vmul.f32 %v5100_v26, %v5100_v26  ;;  %v2899_v36 = vmul.f32 %v5103_v32, %v5103_v32  ;;  %v2873_v19 = vsel %vm725_vm1, %v2851_v7, 0.0 }
 0x72c   : > { %v2910_v56 = vsel %vm725_vm1, %v2900_v38, 0.0  ;;  %v2907_v14 = vsel %vm725_vm1, %v2899_v36, 0.0 }
 0x72d   : > { %2911 = vadd.xlane.f32.xlu2 %v2910_v56  ;;  %2908 = vadd.xlane.f32.xlu1 %v2907_v14 }
 0x735   : > { %2874 = vadd.xlane.f32.xlu1 %v2873_v19  ;;  %v2863_v55 = vpop.xlane.xlu1 %2862 }
 0x736   : > { %v2886_v30 = vmul.f32 %v5095_v20, %v2863_v55 }
 0x738   : > { %v5116_v52 = vsub.f32 %v5045_v13, %v2886_v30 }
 0x73a   : > { %v2902_v12 = vmul.f32 %v5116_v52, %v5116_v52 }
 0x73c   : > { %v2916_v37 = vsel %vm725_vm1, %v2902_v12, 0.0 }
 0x73d   : > { %2917 = vadd.xlane.f32.xlu0 %v2916_v37 }
 0x75d   : > { %v2860_v49 = vpop.xlane.xlu0 %2859  ;;  %v2866_v4 = vpop.xlane.xlu2 %2865 }
 0x75e   : > { %v2885_v53 = vmul.f32 %v5095_v20, %v2860_v49  ;;  %v2887_v57 = vmul.f32 %v5095_v20, %v2866_v4 }
 0x760   : > { %v5124_v3 = vsub.f32 %v5069_v51, %v2885_v53  ;;  %v5127_v6 = vsub.f32 %v5072_v2, %v2887_v57 }
 0x762   : > { %v2901_v13 = vmul.f32 %v5124_v3, %v5124_v3  ;;  %v2903_v33 = vmul.f32 %v5127_v6, %v5127_v6 }
 0x764   : > { %v2913_v11 = vsel %vm725_vm1, %v2901_v13, 0.0  ;;  %v2919_v28 = vsel %vm725_vm1, %v2903_v33, 0.0 }
 0x765   : > { %2914 = vadd.xlane.f32.xlu2 %v2913_v11  ;;  %2920 = vadd.xlane.f32.xlu1 %v2919_v28 }
 0x767   : > { %v2869_v44 = vpop.xlane.xlu0 %2868 }
 0x768   : > { %v2888_v51 = vmul.f32 %v5095_v20, %v2869_v44 }
 0x76a   : > { %v5137_v2 = vsub.f32 %v5084_v8, %v2888_v51  ;;  %v3750_v8 = vld [vmem:[%s4180_s26] sm:$0xff] }
 0x76b   : > { %3095 = vmatpush.bf16.msra.mxu1 %v3750_v8 }
 0x76c   : > { %v2904_v25 = vmul.f32 %v5137_v2, %v5137_v2 }
 0x76e   : > { %v2922_v10 = vsel %vm725_vm1, %v2904_v25, 0.0 }
 0x76f   : > { %2923 = vadd.xlane.f32.xlu2 %v2922_v10  ;;  %v2872_v34 = vpop.xlane.xlu0 %2871 }
 0x770   : > { %v2889_v35 = vmul.f32 %v5095_v20, %v2872_v34 }
 0x772   : > { %v5143_v60 = vsub.f32 %v2850_v58, %v2889_v35 }
 0x774   : > { %v2905_v29 = vmul.f32 %v5143_v60, %v5143_v60 }
 0x776   : > { %v2925_v48 = vsel %vm725_vm1, %v2905_v29, 0.0 }
 0x777   : > { %2926 = vadd.xlane.f32.xlu0 %v2925_v48 }
 0x7a0   : > { %v2912_v22 = vpop.xlane.xlu2 %2911  ;;  %v2909_v42 = vpop.xlane.xlu1 %2908 }
 0x7a1   : > { %v2932_v17 = vmul.f32 %v2912_v22, %v5095_v20  ;;  %v2931_v9 = vmul.f32 %v2909_v42, %v5095_v20 }
 0x7a3   : > { %v2940_v43 = vadd.f32 1e-05, %v2932_v17  ;;  %v2939_v54 = vadd.f32 1e-05, %v2931_v9 }
 0x7a5   : > { %3949 = vrsqrt.f32 %v2940_v43  ;;  %vm2963_vm7 = vweird.f32 %v2940_v43  ;;  %vm2953_vm9 = vweird.f32 %v2939_v54 }
 0x7a6   : > { %3951 = vrsqrt.f32 %v2939_v54 }
 0x7a8   : > { %v2875_v24 = vpop.xlane.xlu1 %2874 }
 0x7a9   : > { %v2890_v63 = vmul.f32 %v5095_v20, %v2875_v24 }
 0x7ab   : > { %v3950_v18 = vpop.eup %3949  ;;  %v5153_v27 = vsub.f32 %v2851_v7, %v2890_v63 }
 0x7ac   : > { %v3952_v40 = vpop.eup %3951  ;;  %v2958_v50 = vmul.f32 %v3950_v18, %v2940_v43  ;;  %vm2964_vm5 = vweird.f32 %v3950_v18 }
 0x7ad   : > { %v2948_v45 = vmul.f32 %v3952_v40, %v2939_v54  ;;  %v2906_v58 = vmul.f32 %v5153_v27, %v5153_v27  ;;  %vm2954_vm6 = vweird.f32 %v3952_v40  ;;  %vm2965_vm8 = vmor %vm2963_vm7, %vm2964_vm5 }
 0x7ae   : > { %v2959_v5 = vmul.f32 %v3950_v18, %v2958_v50  ;;  %vm2955_vm10 = vmor %vm2953_vm9, %vm2954_vm6 }
 0x7af   : > { %v2949_v59 = vmul.f32 %v3952_v40, %v2948_v45  ;;  %v2928_v23 = vsel %vm725_vm1, %v2906_v58, 0.0 }
 0x7b0   : > { %v2960_v16 = vmul.f32 0.5, %v2959_v5  ;;  %2929 = vadd.xlane.f32.xlu1 %v2928_v23  ;;  %v2918_v55 = vpop.xlane.xlu0 %2917 }
 0x7b1   : > { %v2950_v61 = vmul.f32 0.5, %v2949_v59 }
 0x7b2   : > { %v2961_v0 = vsub.f32 1.5, %v2960_v16 }
 0x7b3   : > { %v2951_v21 = vsub.f32 1.5, %v2950_v61 }
 0x7b4   : > { %v2962_v41 = vmul.f32 %v3950_v18, %v2961_v0 }
 0x7b5   : > { %v2952_v46 = vmul.f32 %v3952_v40, %v2951_v21 }
 0x7b6   : > { %v2966_v47 = vsel %vm2965_vm8, %v3950_v18, %v2962_v41 }
 0x7b7   : > { %v3028_v38 = vmul.f32 %v2966_v47, %v5100_v26  ;;  %v2956_v36 = vsel %vm2955_vm10, %v3952_v40, %v2952_v46  ;;  %v2934_v26 = vmul.f32 %v2918_v55, %v5095_v20 }
 0x7b8   : > { %v3027_v56 = vmul.f32 %v2956_v36, %v5103_v32 }
 0x7b9   : > { %v3039_v14 = vmul.f32 %v5163_v1, %v3028_v38  ;;  %v2942_v30 = vadd.f32 1e-05, %v2934_v26  ;;  %v3755_v26 = vld [vmem:[%s4190_s18 + $0x18] sm:$0xff] }
 0x7ba   : > { %v3038_v15 = vmul.f32 %v5163_v1, %v3027_v56  ;;  %3173 = vmatpush.bf16.msra.mxu0 %v3755_v26 }
 0x7bb   : > { %v5177_v31 = vadd.f32 %v5170_v39, %v3039_v14  ;;  %3953 = vrsqrt.f32 %v2942_v30  ;;  %vm2983_vm12 = vweird.f32 %v2942_v30 }
 0x7bc   : > { %v5180_v7 = vadd.f32 %v5170_v39, %v3038_v15 }
 0x7be   : > { %v3057_v19 = vpack.c.bf16 %v5177_v31, %v5180_v7 }
 0x7c0   : > { %3718 = vmatmul.msk.bf16.vlgmr.msra.gmra.mxu1 %vm725_vm1, %v3057_v19 }
 0x7c1   : > { %v3954_v32 = vpop.eup %3953 }
 0x7c2   : > { %v2978_v12 = vmul.f32 %v3954_v32, %v2942_v30  ;;  %vm2984_vm11 = vweird.f32 %v3954_v32 }
 0x7c3   : > { %vm2985_vm13 = vmor %vm2983_vm12, %vm2984_vm11 }
 0x7c4   : > { %v2979_v37 = vmul.f32 %v3954_v32, %v2978_v12 }
 0x7c6   : > { %v2980_v33 = vmul.f32 0.5, %v2979_v37 }
 0x7c8   : > { %v2981_v28 = vsub.f32 1.5, %v2980_v33 }
 0x7ca   : > { %v2982_v34 = vmul.f32 %v3954_v32, %v2981_v28 }
 0x7cc   : > { %v2986_v8 = vsel %vm2985_vm13, %v3954_v32, %v2982_v34  ;;  %v3754_v32 = vld [vmem:[%s4190_s18 + $0x10] sm:$0xff] }
 0x7cd   : > { %v3030_v9 = vmul.f32 %v2986_v8, %v5116_v52  ;;  %3174 = vmatpush.bf16.msra.mxu0 %v3754_v32 }
 0x7cf   : > { %v3041_v50 = vmul.f32 %v5163_v1, %v3030_v9 }
 0x7d1   : > { %v5197_v52 = vadd.f32 %v5170_v39, %v3041_v50 }
 0x7d8   : > { %v2915_v49 = vpop.xlane.xlu2 %2914  ;;  %v2921_v4 = vpop.xlane.xlu1 %2920 }
 0x7d9   : > { %v2933_v53 = vmul.f32 %v2915_v49, %v5095_v20  ;;  %v2935_v57 = vmul.f32 %v2921_v4, %v5095_v20  ;;  %v3753_v4 = vld [vmem:[%s4190_s18 + $0x8] sm:$0xff] }
 0x7da   : > { %3175 = vmatpush.bf16.msra.mxu0 %v3753_v4 }
 0x7db   : > { %v2941_v13 = vadd.f32 1e-05, %v2933_v53  ;;  %v2943_v11 = vadd.f32 1e-05, %v2935_v57 }
 0x7dd   : > { %3955 = vrsqrt.f32 %v2941_v13  ;;  %vm2973_vm15 = vweird.f32 %v2941_v13  ;;  %vm2993_vm4 = vweird.f32 %v2943_v11 }
 0x7de   : > { %3957 = vrsqrt.f32 %v2943_v11 }
 0x7e2   : > { %v2924_v44 = vpop.xlane.xlu2 %2923 }
 0x7e3   : > { %v3956_v51 = vpop.eup %3955  ;;  %v2936_v25 = vmul.f32 %v2924_v44, %v5095_v20 }
 0x7e4   : > { %v3958_v10 = vpop.eup %3957  ;;  %v2968_v35 = vmul.f32 %v3956_v51, %v2941_v13  ;;  %vm2974_vm14 = vweird.f32 %v3956_v51  ;;  %v3752_v13 = vld [vmem:[%s4190_s18] sm:$0xff] }
 0x7e5   : > { %v2988_v29 = vmul.f32 %v3958_v10, %v2943_v11  ;;  %v2944_v48 = vadd.f32 1e-05, %v2936_v25  ;;  %vm2975_vm0 = vmor %vm2973_vm15, %vm2974_vm14  ;;  %vm2994_vm2 = vweird.f32 %v3958_v10  ;;  %3176 = vmatpush.bf16.msra.mxu0 %v3752_v13  ;;  %vm3156_vm14 = vcmask 523264  }
 0x7e6   : > { %v2969_v62 = vmul.f32 %v3956_v51, %v2968_v35  ;;  %vm2995_vm5 = vmor %vm2993_vm4, %vm2994_vm2 }
 0x7e7   : > { %3959 = vrsqrt.f32 %v2944_v48  ;;  %v2989_v22 = vmul.f32 %v3958_v10, %v2988_v29  ;;  %vm3003_vm6 = vweird.f32 %v2944_v48 }
 0x7e8   : > { %v2970_v42 = vmul.f32 0.5, %v2969_v62 }
 0x7e9   : > { %v2990_v43 = vmul.f32 0.5, %v2989_v22 }
 0x7ea   : > { %v2971_v17 = vsub.f32 1.5, %v2970_v42 }
 0x7eb   : > { %v2991_v45 = vsub.f32 1.5, %v2990_v43 }
 0x7ec   : > { %v2972_v54 = vmul.f32 %v3956_v51, %v2971_v17 }
 0x7ed   : > { %v3960_v24 = vpop.eup %3959  ;;  %v2992_v16 = vmul.f32 %v3958_v10, %v2991_v45 }
 0x7ee   : > { %v2976_v63 = vsel %vm2975_vm0, %v3956_v51, %v2972_v54  ;;  %v2998_v18 = vmul.f32 %v3960_v24, %v2944_v48  ;;  %vm3004_vm3 = vweird.f32 %v3960_v24 }
 0x7ef   : > { %v3029_v40 = vmul.f32 %v2976_v63, %v5124_v3  ;;  %vm3005_vm7 = vmor %vm3003_vm6, %vm3004_vm3  ;;  %v2996_v21 = vsel %vm2995_vm5, %v3958_v10, %v2992_v16 }
 0x7f0   : > { %v2999_v58 = vmul.f32 %v3960_v24, %v2998_v18  ;;  %v3031_v47 = vmul.f32 %v2996_v21, %v5127_v6 }
 0x7f1   : > { %v3040_v5 = vmul.f32 %v5163_v1, %v3029_v40 }
 0x7f2   : > { %v3000_v59 = vmul.f32 0.5, %v2999_v58  ;;  %v3042_v36 = vmul.f32 %v5163_v1, %v3031_v47 }
 0x7f3   : > { %v5194_v23 = vadd.f32 %v5170_v39, %v3040_v5 }
 0x7f4   : > { %v3001_v61 = vsub.f32 1.5, %v3000_v59  ;;  %v5210_v14 = vadd.f32 %v5170_v39, %v3042_v36  ;;  %v3816_v36 = vld [vmem:[%s635_s22] ss:$0 sm:$0xff] }
 0x7f5   : > { %v3058_v3 = vpack.c.bf16 %v5197_v52, %v5194_v23 }
 0x7f6   : > { %v3002_v0 = vmul.f32 %v3960_v24, %v3001_v61 }
 0x7f7   : > { %3719 = vmatmul.msk.bf16.gmra.mxu1 %vm725_vm1, %v3058_v3 }
 0x7f8   : > { %v3006_v41 = vsel %vm3005_vm7, %v3960_v24, %v3002_v0 }
 0x7f9   : > { %v3032_v46 = vmul.f32 %v3006_v41, %v5137_v2  ;;  %v2927_v2 = vpop.xlane.xlu0 %2926 }
 0x7fa   : > { %v2937_v19 = vmul.f32 %v2927_v2, %v5095_v20 }
 0x7fb   : > { %v3043_v38 = vmul.f32 %v5163_v1, %v3032_v46 }
 0x7fc   : > { %v2945_v6 = vadd.f32 1e-05, %v2937_v19 }
 0x7fd   : > { %v5207_v56 = vadd.f32 %v5170_v39, %v3043_v38 }
 0x7fe   : > { %3961 = vrsqrt.f32 %v2945_v6  ;;  %vm3013_vm9 = vweird.f32 %v2945_v6 }
 0x7ff   : > { %v3059_v15 = vpack.c.bf16 %v5207_v56, %v5210_v14 }
 0x804   : > { %v3962_v55 = vpop.eup %3961 }
 0x805   : > { %v3008_v30 = vmul.f32 %v3962_v55, %v2945_v6  ;;  %vm3014_vm8 = vweird.f32 %v3962_v55 }
 0x806   : > { %vm3015_vm10 = vmor %vm3013_vm9, %vm3014_vm8 }
 0x807   : > { %3720 = vmatmul.msk.bf16.gmra.mxu1 %vm725_vm1, %v3059_v15  ;;  %v3009_v12 = vmul.f32 %v3962_v55, %v3008_v30 }
 0x809   : > { %v3010_v57 = vmul.f32 0.5, %v3009_v12 }
 0x80b   : > { %v3011_v33 = vsub.f32 1.5, %v3010_v57 }
 0x80d   : > { %v3012_v28 = vmul.f32 %v3962_v55, %v3011_v33 }
 0x80f   : > { %v3016_v25 = vsel %vm3015_vm10, %v3962_v55, %v3012_v28 }
 0x810   : > { %v3033_v35 = vmul.f32 %v3016_v25, %v5143_v60  ;;  %v3815_v60 = vld [vmem:[%s5435_s15] ss:$0 sm:$0xff] }
 0x812   : > { %v3044_v8 = vmul.f32 %v5163_v1, %v3033_v35 }
 0x814   : > { %v5226_v17 = vadd.f32 %v5170_v39, %v3044_v8 }
 0x823   : > { %v2930_v37 = vpop.xlane.xlu1 %2929 }
 0x824   : > { %v2938_v49 = vmul.f32 %v2930_v37, %v5095_v20 }
 0x826   : > { %v2946_v53 = vadd.f32 1e-05, %v2938_v49 }
 0x828   : > { %3963 = vrsqrt.f32 %v2946_v53  ;;  %vm3023_vm12 = vweird.f32 %v2946_v53 }
 0x82e   : > { %v3964_v11 = vpop.eup %3963 }
 0x82f   : > { %v3018_v44 = vmul.f32 %v3964_v11, %v2946_v53  ;;  %vm3024_vm11 = vweird.f32 %v3964_v11 }
 0x830   : > { %vm3025_vm13 = vmor %vm3023_vm12, %vm3024_vm11 }
 0x831   : > { %v3019_v51 = vmul.f32 %v3964_v11, %v3018_v44 }
 0x833   : > { %v3020_v10 = vmul.f32 0.5, %v3019_v51 }
 0x835   : > { %v3021_v34 = vsub.f32 1.5, %v3020_v10 }
 0x837   : > { %v3022_v29 = vmul.f32 %v3964_v11, %v3021_v34 }
 0x839   : > { %v3026_v48 = vsel %vm3025_vm13, %v3964_v11, %v3022_v29 }
 0x83a   : > { %v3034_v62 = vmul.f32 %v3026_v48, %v5153_v27 }
 0x83c   : > { %v3045_v22 = vmul.f32 %v5163_v1, %v3034_v62 }
 0x83d   : > { %v3097_v42 = vpop.f32.mrf.mxu1 }
 0x83e   : > { %v5229_v9 = vadd.f32 %v5170_v39, %v3045_v22  ;;  %v3098_v27 = vadd.f32 %v3815_v60, %v3097_v42 }
 0x840   : > { %v3060_v43 = vpack.c.bf16 %v5229_v9, %v5226_v17  ;;  %v3117_v24 = vmax.f32 %v3098_v27, 0.0 }
 0x842   : > { %3721 = vmatmul.msk.bf16.gmra.mxu1 %vm725_vm1, %v3060_v43 }
 0x845   : > { %v3099_v54 = vpop.f32.mrf.mxu1 }
 0x846   : > { %v3100_v1 = vadd.f32 %v3815_v60, %v3099_v54 }
 0x848   : > { %v3118_v63 = vmax.f32 %v3100_v1, 0.0 }
 0x84a   : > { %v3125_v18 = vpack.c.bf16 %v3118_v63, %v3117_v24 }
 0x84c   : > { %3738 = vmatmul.msk.bf16.vlgmr.msra.gmra.mxu0 %vm3156_vm14, %v3125_v18 }
 0x874   : > { %v3102_v39 = vpop.f32.mrf.mxu1 }
 0x875   : > { %v3103_v40 = vadd.f32 %v3815_v60, %v3102_v39 }
 0x877   : > { %v3119_v58 = vmax.f32 %v3103_v40, 0.0 }
 0x87c   : > { %v3104_v50 = vpop.f32.mrf.mxu1 }
 0x87d   : > { %v3105_v45 = vadd.f32 %v3815_v60, %v3104_v50 }
 0x87f   : > { %v3120_v5 = vmax.f32 %v3105_v45, 0.0 }
 0x881   : > { %v3126_v59 = vpack.c.bf16 %v3120_v5, %v3119_v58 }
 0x883   : > { %3739 = vmatmul.msk.bf16.gmra.mxu0 %vm3156_vm14, %v3126_v59 }
 0x884   : > { %v3107_v16 = vpop.f32.mrf.mxu1 }
 0x885   : > { %v3108_v61 = vadd.f32 %v3815_v60, %v3107_v16 }
 0x887   : > { %v3121_v21 = vmax.f32 %v3108_v61, 0.0 }
 0x88c   : > { %v3109_v3 = vpop.f32.mrf.mxu1 }
 0x88d   : > { %v3110_v0 = vadd.f32 %v3815_v60, %v3109_v3 }
 0x88f   : > { %v3122_v41 = vmax.f32 %v3110_v0, 0.0 }
 0x891   : > { %v3127_v46 = vpack.c.bf16 %v3122_v41, %v3121_v21 }
 0x893   : > { %3740 = vmatmul.msk.bf16.gmra.mxu0 %vm3156_vm14, %v3127_v46 }
 0x8bf   : > { %v3112_v47 = vpop.f32.mrf.mxu1 }
 0x8c0   : > { %v3113_v38 = vadd.f32 %v3815_v60, %v3112_v47 }
 0x8c2   : > { %v3123_v6 = vmax.f32 %v3113_v38, 0.0 }
 0x8c7   : > { %v3114_v15 = vpop.f32.mrf.mxu1 }
 0x8c8   : > { %v3115_v2 = vadd.f32 %v3815_v60, %v3114_v15 }
 0x8c9   : > { %v3178_v19 = vpop.f32.mrf.mxu0 }
 0x8ca   : > { %v3124_v55 = vmax.f32 %v3115_v2, 0.0  ;;  %v3179_v26 = vadd.f32 %v3816_v36, %v3178_v19 }
 0x8cc   : > { %v3128_v30 = vpack.c.bf16 %v3124_v55, %v3123_v6  ;;  %v3198_v32 = vadd.f32 %v3179_v26, %v5180_v7 }
 0x8ce   : > { %v3206_v12 = vsel %vm725_vm1, %v3198_v32, 0.0  ;;  %3741 = vmatmul.msk.bf16.gmra.mxu0 %vm3156_vm14, %v3128_v30 }
 0x8cf   : > { %3207 = vadd.xlane.f32.xlu2 %v3206_v12 }
 0x8d1   : > { %v3180_v37 = vpop.f32.mrf.mxu0 }
 0x8d2   : > { %v3181_v49 = vadd.f32 %v3816_v36, %v3180_v37 }
 0x8d4   : > { %v3199_v4 = vadd.f32 %v3181_v49, %v5177_v31 }
 0x8d6   : > { %v3209_v53 = vsel %vm725_vm1, %v3199_v4, 0.0 }
 0x8d7   : > { %3210 = vadd.xlane.f32.xlu0 %v3209_v53 }
 0x900   : > { %v3183_v57 = vpop.f32.mrf.mxu0 }
 0x901   : > { %v3184_v13 = vadd.f32 %v3816_v36, %v3183_v57 }
 0x903   : > { %v3200_v33 = vadd.f32 %v3184_v13, %v5194_v23 }
 0x905   : > { %v3212_v11 = vsel %vm725_vm1, %v3200_v33, 0.0 }
 0x906   : > { %3213 = vadd.xlane.f32.xlu1 %v3212_v11 }
 0x908   : > { %v3185_v7 = vpop.f32.mrf.mxu0 }
 0x909   : > { %v3186_v28 = vadd.f32 %v3816_v36, %v3185_v7 }
 0x90b   : > { %v3201_v44 = vadd.f32 %v3186_v28, %v5197_v52 }
 0x90d   : > { %v3215_v51 = vsel %vm725_vm1, %v3201_v44, 0.0 }
 0x90e   : > { %3216 = vadd.xlane.f32.xlu2 %v3215_v51 }
 0x910   : > { %v3188_v25 = vpop.f32.mrf.mxu0 }
 0x911   : > { %v3189_v10 = vadd.f32 %v3816_v36, %v3188_v25 }
 0x913   : > { %v3202_v31 = vadd.f32 %v3189_v10, %v5210_v14 }
 0x915   : > { %v3218_v34 = vsel %vm725_vm1, %v3202_v31, 0.0 }
 0x916   : > { %3219 = vadd.xlane.f32.xlu0 %v3218_v34 }
 0x918   : > { %v3190_v35 = vpop.f32.mrf.mxu0 }
 0x919   : > { %v3191_v29 = vadd.f32 %v3816_v36, %v3190_v35  ;;  %v5318_v35 = vld [vmem:[%s638_s2] ss:$0 sm:$0xff] }
 0x91b   : > { %v3203_v23 = vadd.f32 %v3191_v29, %v5207_v56 }
 0x91d   : > { %v3221_v48 = vsel %vm725_vm1, %v3203_v23, 0.0 }
 0x91e   : > { %3222 = vadd.xlane.f32.xlu1 %v3221_v48  ;;  %v5326_v48 = vld [vmem:[%s641_s20] ss:$0 sm:$0xff] }
 0x942   : > { %v3208_v62 = vpop.xlane.xlu2 %3207 }
 0x943   : > { %v3230_v52 = vmul.f32 %v3208_v62, %v5095_v20 }
 0x945   : > { %v5261_v8 = vsub.f32 %v3198_v32, %v3230_v52 }
 0x947   : > { %v3246_v22 = vmul.f32 %v5261_v8, %v5261_v8 }
 0x949   : > { %v3254_v14 = vsel %vm725_vm1, %v3246_v22, 0.0 }
 0x94a   : > { %3255 = vadd.xlane.f32.xlu1 %v3254_v14  ;;  %v3211_v42 = vpop.xlane.xlu0 %3210 }
 0x94b   : > { %v3193_v60 = vpop.f32.mrf.mxu0  ;;  %v3231_v43 = vmul.f32 %v3211_v42, %v5095_v20 }
 0x94c   : > { %v3194_v27 = vadd.f32 %v3816_v36, %v3193_v60 }
 0x94d   : > { %v5268_v54 = vsub.f32 %v3199_v4, %v3231_v43 }
 0x94e   : > { %v3204_v56 = vadd.f32 %v3194_v27, %v5226_v17 }
 0x94f   : > { %v3247_v18 = vmul.f32 %v5268_v54, %v5268_v54 }
 0x950   : > { %v3224_v1 = vsel %vm725_vm1, %v3204_v56, 0.0 }
 0x951   : > { %3225 = vadd.xlane.f32.xlu2 %v3224_v1  ;;  %v3257_v50 = vsel %vm725_vm1, %v3247_v18, 0.0 }
 0x953   : > { %v3195_v24 = vpop.f32.mrf.mxu0 }
 0x954   : > { %v3196_v63 = vadd.f32 %v3816_v36, %v3195_v24 }
 0x956   : > { %v3205_v39 = vadd.f32 %v3196_v63, %v5229_v9 }
 0x958   : > { %v3227_v40 = vsel %vm725_vm1, %v3205_v39, 0.0 }
 0x959   : > { %3228 = vadd.xlane.f32.xlu0 %v3227_v40  ;;  %3258 = vadd.xlane.f32.xlu2 %v3257_v50 }
 0x979   : > { %v3214_v45 = vpop.xlane.xlu1 %3213 }
 0x97a   : > { %v3232_v17 = vmul.f32 %v3214_v45, %v5095_v20 }
 0x97c   : > { %v5277_v58 = vsub.f32 %v3200_v33, %v3232_v17 }
 0x97e   : > { %v3248_v5 = vmul.f32 %v5277_v58, %v5277_v58 }
 0x980   : > { %v3260_v59 = vsel %vm725_vm1, %v3248_v5, 0.0 }
 0x981   : > { %v3217_v16 = vpop.xlane.xlu2 %3216  ;;  %3261 = vadd.xlane.f32.xlu0 %v3260_v59 }
 0x982   : > { %v3233_v9 = vmul.f32 %v3217_v16, %v5095_v20 }
 0x984   : > { %v5283_v61 = vsub.f32 %v3201_v44, %v3233_v9 }
 0x986   : > { %v3249_v3 = vmul.f32 %v5283_v61, %v5283_v61 }
 0x988   : > { %v3263_v0 = vsel %vm725_vm1, %v3249_v3, 0.0 }
 0x989   : > { %3264 = vadd.xlane.f32.xlu1 %v3263_v0  ;;  %v3220_v21 = vpop.xlane.xlu0 %3219 }
 0x98a   : > { %v3234_v41 = vmul.f32 %v3220_v21, %v5095_v20 }
 0x98c   : > { %v5289_v46 = vsub.f32 %v3202_v31, %v3234_v41 }
 0x98e   : > { %v3250_v47 = vmul.f32 %v5289_v46, %v5289_v46 }
 0x990   : > { %v3266_v38 = vsel %vm725_vm1, %v3250_v47, 0.0 }
 0x991   : > { %v3223_v36 = vpop.xlane.xlu1 %3222  ;;  %3267 = vadd.xlane.f32.xlu2 %v3266_v38 }
 0x992   : > { %v3235_v15 = vmul.f32 %v3223_v36, %v5095_v20 }
 0x994   : > { %v5295_v2 = vsub.f32 %v3203_v23, %v3235_v15 }
 0x996   : > { %v3251_v19 = vmul.f32 %v5295_v2, %v5295_v2 }
 0x998   : > { %v3269_v6 = vsel %vm725_vm1, %v3251_v19, 0.0 }
 0x999   : > { %3270 = vadd.xlane.f32.xlu0 %v3269_v6 }
 0x9bd   : > { %v3256_v55 = vpop.xlane.xlu1 %3255 }
 0x9be   : > { %v3278_v26 = vmul.f32 %v3256_v55, %v5095_v20 }
 0x9c0   : > { %v3286_v30 = vadd.f32 1e-05, %v3278_v26 }
 0x9c2   : > { %3965 = vrsqrt.f32 %v3286_v30  ;;  %vm3300_vm0 = vweird.f32 %v3286_v30 }
 0x9c4   : > { %v3226_v32 = vpop.xlane.xlu2 %3225 }
 0x9c5   : > { %v3236_v12 = vmul.f32 %v3226_v32, %v5095_v20 }
 0x9c7   : > { %v5302_v37 = vsub.f32 %v3204_v56, %v3236_v12 }
 0x9c8   : > { %v3966_v49 = vpop.eup %3965 }
 0x9c9   : > { %v3295_v4 = vmul.f32 %v3966_v49, %v3286_v30  ;;  %v3252_v53 = vmul.f32 %v5302_v37, %v5302_v37  ;;  %vm3301_vm15 = vweird.f32 %v3966_v49 }
 0x9ca   : > { %vm3302_vm2 = vmor %vm3300_vm0, %vm3301_vm15 }
 0x9cb   : > { %v3296_v57 = vmul.f32 %v3966_v49, %v3295_v4  ;;  %v3272_v13 = vsel %vm725_vm1, %v3252_v53, 0.0 }
 0x9cc   : > { %3273 = vadd.xlane.f32.xlu1 %v3272_v13  ;;  %v3259_v33 = vpop.xlane.xlu2 %3258  ;;  %v3229_v11 = vpop.xlane.xlu0 %3228 }
 0x9cd   : > { %v3297_v7 = vmul.f32 0.5, %v3296_v57  ;;  %v3279_v28 = vmul.f32 %v3259_v33, %v5095_v20  ;;  %v3237_v44 = vmul.f32 %v3229_v11, %v5095_v20 }
 0x9cf   : > { %v3298_v51 = vsub.f32 1.5, %v3297_v7  ;;  %v3287_v25 = vadd.f32 1e-05, %v3279_v28  ;;  %v5309_v10 = vsub.f32 %v3205_v39, %v3237_v44 }
 0x9d1   : > { %v3299_v31 = vmul.f32 %v3966_v49, %v3298_v51  ;;  %3967 = vrsqrt.f32 %v3287_v25  ;;  %v3253_v34 = vmul.f32 %v5309_v10, %v5309_v10  ;;  %vm3310_vm4 = vweird.f32 %v3287_v25 }
 0x9d3   : > { %v3303_v29 = vsel %vm3302_vm2, %v3966_v49, %v3299_v31  ;;  %v3275_v23 = vsel %vm725_vm1, %v3253_v34, 0.0 }
 0x9d4   : > { %v3374_v62 = vmul.f32 %v3303_v29, %v5261_v8  ;;  %3276 = vadd.xlane.f32.xlu2 %v3275_v23 }
 0x9d6   : > { %v3385_v52 = vmul.f32 %v5318_v35, %v3374_v62 }
 0x9d7   : > { %v3968_v22 = vpop.eup %3967 }
 0x9d8   : > { %v3396_v14 = vadd.f32 %v5326_v48, %v3385_v52  ;;  %v3305_v42 = vmul.f32 %v3968_v22, %v3287_v25  ;;  %vm3311_vm3 = vweird.f32 %v3968_v22 }
 0x9d9   : > { %vm3312_vm5 = vmor %vm3310_vm4, %vm3311_vm3 }
 0x9da   : > { %3404 = vst.msk [vmem:[%s4207_s7] sm:$0xff] %vm725_vm1, %v3396_v14  ;;  %v3306_v60 = vmul.f32 %v3968_v22, %v3305_v42 }
 0x9dc   : > { %v3307_v43 = vmul.f32 0.5, %v3306_v60 }
 0x9de   : > { %v3308_v27 = vsub.f32 1.5, %v3307_v43 }
 0x9e0   : > { %v3309_v56 = vmul.f32 %v3968_v22, %v3308_v27 }
 0x9e2   : > { %v3313_v1 = vsel %vm3312_vm5, %v3968_v22, %v3309_v56 }
 0x9e3   : > { %v3375_v8 = vmul.f32 %v3313_v1, %v5268_v54 }
 0x9e5   : > { %v3386_v24 = vmul.f32 %v5318_v35, %v3375_v8 }
 0x9e7   : > { %v3397_v63 = vadd.f32 %v5326_v48, %v3386_v24 }
 0x9e9   : > { %3405 = vst.msk [vmem:[%s4207_s7 + $0x8] sm:$0xff] %vm725_vm1, %v3397_v63 }
 0x9f4   : > { %v3262_v18 = vpop.xlane.xlu0 %3261 }
 0x9f5   : > { %v3280_v39 = vmul.f32 %v3262_v18, %v5095_v20 }
 0x9f7   : > { %v3288_v40 = vadd.f32 1e-05, %v3280_v39 }
 0x9f9   : > { %3969 = vrsqrt.f32 %v3288_v40  ;;  %vm3320_vm7 = vweird.f32 %v3288_v40 }
 0x9fc   : > { %v3265_v50 = vpop.xlane.xlu1 %3264 }
 0x9fd   : > { %v3281_v45 = vmul.f32 %v3265_v50, %v5095_v20 }
 0x9ff   : > { %v3970_v17 = vpop.eup %3969  ;;  %v3289_v5 = vadd.f32 1e-05, %v3281_v45 }
 0xa00   : > { %v3315_v59 = vmul.f32 %v3970_v17, %v3288_v40  ;;  %vm3321_vm6 = vweird.f32 %v3970_v17 }
 0xa01   : > { %3971 = vrsqrt.f32 %v3289_v5  ;;  %vm3322_vm8 = vmor %vm3320_vm7, %vm3321_vm6  ;;  %vm3330_vm10 = vweird.f32 %v3289_v5 }
 0xa02   : > { %v3316_v16 = vmul.f32 %v3970_v17, %v3315_v59 }
 0xa04   : > { %v3317_v54 = vmul.f32 0.5, %v3316_v16  ;;  %v3268_v9 = vpop.xlane.xlu2 %3267 }
 0xa05   : > { %v3282_v3 = vmul.f32 %v3268_v9, %v5095_v20 }
 0xa06   : > { %v3318_v0 = vsub.f32 1.5, %v3317_v54 }
 0xa07   : > { %v3972_v21 = vpop.eup %3971  ;;  %v3290_v41 = vadd.f32 1e-05, %v3282_v3 }
 0xa08   : > { %v3319_v47 = vmul.f32 %v3970_v17, %v3318_v0  ;;  %v3325_v38 = vmul.f32 %v3972_v21, %v3289_v5  ;;  %vm3331_vm9 = vweird.f32 %v3972_v21 }
 0xa09   : > { %3973 = vrsqrt.f32 %v3290_v41  ;;  %vm3332_vm11 = vmor %vm3330_vm10, %vm3331_vm9  ;;  %vm3340_vm13 = vweird.f32 %v3290_v41 }
 0xa0a   : > { %v3323_v36 = vsel %vm3322_vm8, %v3970_v17, %v3319_v47  ;;  %v3326_v15 = vmul.f32 %v3972_v21, %v3325_v38 }
 0xa0b   : > { %v3376_v19 = vmul.f32 %v3323_v36, %v5277_v58 }
 0xa0c   : > { %v3327_v6 = vmul.f32 0.5, %v3326_v15  ;;  %v3271_v55 = vpop.xlane.xlu0 %3270 }
 0xa0d   : > { %v3387_v26 = vmul.f32 %v5318_v35, %v3376_v19  ;;  %v3283_v30 = vmul.f32 %v3271_v55, %v5095_v20 }
 0xa0e   : > { %v3328_v32 = vsub.f32 1.5, %v3327_v6 }
 0xa0f   : > { %v3974_v12 = vpop.eup %3973  ;;  %v3398_v49 = vadd.f32 %v5326_v48, %v3387_v26  ;;  %v3291_v4 = vadd.f32 1e-05, %v3283_v30 }
 0xa10   : > { %v3329_v53 = vmul.f32 %v3972_v21, %v3328_v32  ;;  %v3335_v57 = vmul.f32 %v3974_v12, %v3290_v41  ;;  %vm3341_vm12 = vweird.f32 %v3974_v12 }
 0xa11   : > { %3406 = vst.msk [vmem:[%s4207_s7 + $0x10] sm:$0xff] %vm725_vm1, %v3398_v49  ;;  %3975 = vrsqrt.f32 %v3291_v4  ;;  %vm3342_vm14 = vmor %vm3340_vm13, %vm3341_vm12  ;;  %vm3350_vm0 = vweird.f32 %v3291_v4 }
 0xa12   : > { %v3333_v58 = vsel %vm3332_vm11, %v3972_v21, %v3329_v53  ;;  %v3336_v13 = vmul.f32 %v3974_v12, %v3335_v57 }
 0xa13   : > { %v3377_v33 = vmul.f32 %v3333_v58, %v5283_v61 }
 0xa14   : > { %v3337_v11 = vmul.f32 0.5, %v3336_v13 }
 0xa15   : > { %v3388_v7 = vmul.f32 %v5318_v35, %v3377_v33 }
 0xa16   : > { %v3338_v28 = vsub.f32 1.5, %v3337_v11 }
 0xa17   : > { %v3976_v44 = vpop.eup %3975  ;;  %v3399_v51 = vadd.f32 %v5326_v48, %v3388_v7 }
 0xa18   : > { %v3339_v25 = vmul.f32 %v3974_v12, %v3338_v28  ;;  %v3345_v31 = vmul.f32 %v3976_v44, %v3291_v4  ;;  %vm3351_vm15 = vweird.f32 %v3976_v44 }
 0xa19   : > { %3407 = vst.msk [vmem:[%s4207_s7 + $0x18] sm:$0xff] %vm725_vm1, %v3399_v51  ;;  %vm3352_vm2 = vmor %vm3350_vm0, %vm3351_vm15 }
 0xa1a   : > { %v3343_v34 = vsel %vm3342_vm14, %v3974_v12, %v3339_v25  ;;  %v3346_v29 = vmul.f32 %v3976_v44, %v3345_v31 }
 0xa1b   : > { %v3378_v61 = vmul.f32 %v3343_v34, %v5289_v46 }
 0xa1c   : > { %v3347_v23 = vmul.f32 0.5, %v3346_v29 }
 0xa1d   : > { %v3389_v62 = vmul.f32 %v5318_v35, %v3378_v61 }
 0xa1e   : > { %v3348_v52 = vsub.f32 1.5, %v3347_v23 }
 0xa1f   : > { %v3400_v22 = vadd.f32 %v5326_v48, %v3389_v62 }
 0xa20   : > { %v3349_v14 = vmul.f32 %v3976_v44, %v3348_v52 }
 0xa21   : > { %3408 = vst.msk [vmem:[%s4207_s7 + $0x20] sm:$0xff] %vm725_vm1, %v3400_v22 }
 0xa22   : > { %v3353_v42 = vsel %vm3352_vm2, %v3976_v44, %v3349_v14 }
 0xa23   : > { %v3379_v60 = vmul.f32 %v3353_v42, %v5295_v2 }
 0xa25   : > { %v3390_v43 = vmul.f32 %v5318_v35, %v3379_v60 }
 0xa27   : > { %v3401_v27 = vadd.f32 %v5326_v48, %v3390_v43 }
 0xa29   : > { %3409 = vst.msk [vmem:[%s4207_s7 + $0x28] sm:$0xff] %vm725_vm1, %v3401_v27 }
 0xa3f   : > { %v3274_v46 = vpop.xlane.xlu1 %3273 }
 0xa40   : > { %v3284_v56 = vmul.f32 %v3274_v46, %v5095_v20 }
 0xa42   : > { %v3292_v1 = vadd.f32 1e-05, %v3284_v56 }
 0xa44   : > { %3977 = vrsqrt.f32 %v3292_v1  ;;  %vm3360_vm4 = vweird.f32 %v3292_v1 }
 0xa47   : > { %v3277_v8 = vpop.xlane.xlu2 %3276 }
 0xa48   : > { %v3285_v24 = vmul.f32 %v3277_v8, %v5095_v20 }
 0xa4a   : > { %v3978_v63 = vpop.eup %3977  ;;  %v3293_v18 = vadd.f32 1e-05, %v3285_v24 }
 0xa4b   : > { %v3355_v39 = vmul.f32 %v3978_v63, %v3292_v1  ;;  %vm3361_vm3 = vweird.f32 %v3978_v63 }
 0xa4c   : > { %3979 = vrsqrt.f32 %v3293_v18  ;;  %vm3362_vm5 = vmor %vm3360_vm4, %vm3361_vm3  ;;  %vm3370_vm7 = vweird.f32 %v3293_v18 }
 0xa4d   : > { %v3356_v40 = vmul.f32 %v3978_v63, %v3355_v39 }
 0xa4f   : > { %v3357_v2 = vmul.f32 0.5, %v3356_v40 }
 0xa51   : > { %v3358_v50 = vsub.f32 1.5, %v3357_v2 }
 0xa52   : > { %v3980_v45 = vpop.eup %3979 }
 0xa53   : > { %v3359_v17 = vmul.f32 %v3978_v63, %v3358_v50  ;;  %v3365_v5 = vmul.f32 %v3980_v45, %v3293_v18  ;;  %vm3371_vm6 = vweird.f32 %v3980_v45 }
 0xa54   : > { %vm3372_vm8 = vmor %vm3370_vm7, %vm3371_vm6 }
 0xa55   : > { %v3363_v59 = vsel %vm3362_vm5, %v3978_v63, %v3359_v17  ;;  %v3366_v16 = vmul.f32 %v3980_v45, %v3365_v5 }
 0xa56   : > { %v3380_v54 = vmul.f32 %v3363_v59, %v5302_v37 }
 0xa57   : > { %v3367_v20 = vmul.f32 0.5, %v3366_v16 }
 0xa58   : > { %v3391_v9 = vmul.f32 %v5318_v35, %v3380_v54 }
 0xa59   : > { %v3368_v3 = vsub.f32 1.5, %v3367_v20 }
 0xa5a   : > { %v3402_v0 = vadd.f32 %v5326_v48, %v3391_v9 }
 0xa5b   : > { %v3369_v21 = vmul.f32 %v3980_v45, %v3368_v3 }
 0xa5c   : > { %3410 = vst.msk [vmem:[%s4207_s7 + $0x30] sm:$0xff] %vm725_vm1, %v3402_v0 }
 0xa5d   : > { %v3373_v41 = vsel %vm3372_vm8, %v3980_v45, %v3369_v21 }
 0xa5e   : > { %v3381_v47 = vmul.f32 %v3373_v41, %v5309_v10 }
 0xa60   : > { %v3392_v38 = vmul.f32 %v5318_v35, %v3381_v47 }
 0xa62   : > { %v3403_v36 = vadd.f32 %v5326_v48, %v3392_v38 }
 0xa64   : > { %3411 = vst.msk [vmem:[%s4207_s7 + $0x38] sm:$0xff] %vm725_vm1, %v3403_v36 }
 0xa65 PF: > { %s5436_s16 = sld [smem:[#allocation5_spill]] }
 0xa66   : > { %s5437_s25 = sld [smem:[#allocation3_spill]] }
 0xa67   : > { %s5438_s26 = sld [smem:[#allocation4_spill]] }
 0xa68   : > { %s5439_s27 = sld [smem:[#allocation6_spill]] }
 0xa69   : > { %s5440_s28 = sld [smem:[#allocation7_spill]] }
 0xa6b   : > { %s23_s29 = sadd.s32 1, %s5436_s16  }
 0xa6c   : > { %p20_p8 = scmp.ge.s32.totalorder %s23_s29, 6  }
 0xa6e   :  { %22 = sbr.rel (!%p20_p8) target bundleno = 7 (0x7), region = 142 }

</bundles_post_ra>
